<compile_context>
chip_gen: v6e
topology: v6e:2x2x1
jax: 0.10.0
libtpu: 0.0.40
codegen_flags: <defaults>
</compile_context>

<pallas_src>
import math

import jax
import jax.numpy as jnp
from jax import lax
from jax.experimental import pallas as pl
from jax.experimental.pallas import tpu as pltpu


def _round_up(x, m):
    return (x + m - 1) // m * m


def _vmem_limit_bytes(block_bytes):
    # double-buffered blocks + headroom, clamped to fit v7x's 64 MiB physical VMEM
    return int(min(max(2 * block_bytes + (8 << 20), 32 << 20), 48 << 20))


def _rmsnorm(x):
    return x * lax.rsqrt(jnp.mean(x * x, axis=-1, keepdims=True) + 1e-6)


# ----------------------------------------------------------------------------
# Kernel 1: prefill — grid = (L,); the whole batch lives in one block so every
# layer weight is DMA'd exactly once.  The residual stream is a VMEM scratch
# carried across the layer axis; only the last position's hidden state and the
# per-layer KV cache leave the kernel.
# ----------------------------------------------------------------------------
def prefill_block_kernel(x_ref, mask_ref, ln1_ref, wqkv_ref, wo_ref,
                         ln2_ref, w1_ref, w2_ref,
                         hlast_ref, kout_ref, vout_ref, h_sc):
    l = pl.program_id(0)

    @pl.when(l == 0)
    def _():
        h_sc[...] = x_ref[...]             # seed residual stream with embeddings

    h = h_sc[...]                           # (B, S, D) f32
    B, S, D = h.shape
    S_max = kout_ref.shape[1]
    scale = jnp.float32(1.0 / math.sqrt(D))

    # ---- attention sub-block (pre-RMSNorm), bf16 MXU / f32 accumulate ----
    hn = _rmsnorm(h) * ln1_ref[...]
    qkv = jnp.dot(hn.reshape(B * S, D).astype(jnp.bfloat16), wqkv_ref[...],
                  preferred_element_type=jnp.float32).reshape(B, S, 3 * D)
    q = qkv[..., 0:D]
    k = qkv[..., D:2 * D]
    v = qkv[..., 2 * D:3 * D]
    k_bf = k.astype(jnp.bfloat16)
    v_bf = v.astype(jnp.bfloat16)

    # KV cache for this layer: prompt rows [0, S); zero tail (decode fills it).
    kout_ref[:, 0:S, :] = k_bf
    vout_ref[:, 0:S, :] = v_bf
    if S_max > S:
        kout_ref[:, S:, :] = jnp.zeros((B, S_max - S, D), jnp.bfloat16)
        vout_ref[:, S:, :] = jnp.zeros((B, S_max - S, D), jnp.bfloat16)

    scores = jnp.einsum('bqd,bkd->bqk', q.astype(jnp.bfloat16), k_bf,
                        preferred_element_type=jnp.float32) * scale
    # causal + key-valid mask built in-kernel (no (B, S, S) bias in HBM)
    qpos = lax.broadcasted_iota(jnp.int32, (S, S), 0)
    kpos = lax.broadcasted_iota(jnp.int32, (S, S), 1)
    causal = (kpos <= qpos)[None, :, :]
    key_ok = mask_ref[...][:, None, :] > 0.0
    scores = jnp.where(jnp.logical_and(causal, key_ok), scores, -1e30)

    m = jnp.max(scores, axis=-1, keepdims=True)
    p = jnp.exp(scores - m)
    p = p * pl.reciprocal(jnp.sum(p, axis=-1, keepdims=True), approx=True)
    attn = jnp.einsum('bqk,bkd->bqd', p.astype(jnp.bfloat16), v_bf,
                      preferred_element_type=jnp.float32)
    attn = jnp.dot(attn.reshape(B * S, D).astype(jnp.bfloat16), wo_ref[...],
                   preferred_element_type=jnp.float32).reshape(B, S, D)
    h = h + attn

    # ---- MLP sub-block (pre-RMSNorm, SiLU) ----
    hn2 = _rmsnorm(h) * ln2_ref[...]
    up = jnp.dot(hn2.reshape(B * S, D).astype(jnp.bfloat16), w1_ref[...],
                 preferred_element_type=jnp.float32)
    up = up * jax.nn.sigmoid(up)
    down = jnp.dot(up.astype(jnp.bfloat16), w2_ref[...],
                   preferred_element_type=jnp.float32).reshape(B, S, D)
    h = h + down
    h_sc[...] = h

    @pl.when(l == pl.num_programs(0) - 1)
    def _():
        hlast_ref[...] = h[:, S - 1:S, :]   # only the last position feeds LM head


def prefill_stack(x, key_valid, params, S_max):
    """x: (B, S, D) f32, key_valid: (B, S) f32 -> (h_last, k_cache, v_cache)."""
    B, S, D = x.shape
    L = params['wqkv'].shape[0]
    F = params['w1'].shape[-1]

    out_shape = (
        jax.ShapeDtypeStruct((B, 1, D), jnp.float32),            # last-pos hidden
        jax.ShapeDtypeStruct((L, B, S_max, D), jnp.bfloat16),    # K cache
        jax.ShapeDtypeStruct((L, B, S_max, D), jnp.bfloat16),    # V cache
    )
    in_specs = [
        pl.BlockSpec((B, S, D), lambda l: (0, 0, 0)),            # embeddings
        pl.BlockSpec((B, S), lambda l: (0, 0)),                  # key validity
        pl.BlockSpec((None, 1, D), lambda l: (l, 0, 0)),         # ln1
        pl.BlockSpec((None, D, 3 * D), lambda l: (l, 0, 0)),     # Wqkv (bf16)
        pl.BlockSpec((None, D, D), lambda l: (l, 0, 0)),         # Wo   (bf16)
        pl.BlockSpec((None, 1, D), lambda l: (l, 0, 0)),         # ln2
        pl.BlockSpec((None, D, F), lambda l: (l, 0, 0)),         # W1   (bf16)
        pl.BlockSpec((None, F, D), lambda l: (l, 0, 0)),         # W2   (bf16)
    ]
    out_specs = (
        pl.BlockSpec((B, 1, D), lambda l: (0, 0, 0)),
        pl.BlockSpec((None, B, S_max, D), lambda l: (l, 0, 0, 0)),
        pl.BlockSpec((None, B, S_max, D), lambda l: (l, 0, 0, 0)),
    )
    block_bytes = (B * S * D * 4 + B * S * 4 + 2 * D * 4
                   + D * 3 * D * 2 + D * D * 2 + 2 * D * F * 2
                   + B * D * 4 + 2 * B * S_max * D * 2 + B * S * D * 4)
    return pl.pallas_call(
        prefill_block_kernel,
        out_shape=out_shape,
        grid=(L,),
        in_specs=in_specs,
        out_specs=out_specs,
        scratch_shapes=[pltpu.VMEM((B, S, D), jnp.float32)],     # residual stream
        compiler_params=pltpu.CompilerParams(
            dimension_semantics=("arbitrary",),
            vmem_limit_bytes=_vmem_limit_bytes(block_bytes)),
    )(x, key_valid, params['ln1'], params['wqkv'], params['wo'],
      params['ln2'], params['w1'], params['w2'])


# ----------------------------------------------------------------------------
# Kernel 2: single-token decode step.  grid = (L,), batch folded into the
# block.  The KV cache is READ-ONLY here; the write position q comes in via
# scalar prefetch (SMEM) and only the new (B, 1, D) K/V rows per layer leave
# the kernel (the wrapper scatters them into the cache in place).
# ----------------------------------------------------------------------------
def decode_block_kernel(q_ref, x_ref, mask_ref, kc_ref, vc_ref,
                        ln1_ref, wqkv_ref, wo_ref, ln2_ref, w1_ref, w2_ref,
                        h_ref, krow_ref, vrow_ref):
    l = pl.program_id(0)

    @pl.when(l == 0)
    def _():
        h_ref[...] = x_ref[...]

    h = h_ref[...][:, 0, :]                  # (B, D) f32
    B, D = h.shape
    scale = jnp.float32(1.0 / math.sqrt(D))
    qpos = q_ref[0]                           # scalar write/attend position (SMEM)

    # ---- attention sub-block ----
    hn = _rmsnorm(h) * ln1_ref[...]
    qkv = jnp.dot(hn.astype(jnp.bfloat16), wqkv_ref[...],
                  preferred_element_type=jnp.float32)            # (B, 3D)
    qv = qkv[:, 0:D]
    k_new = qkv[:, D:2 * D]
    v_new = qkv[:, 2 * D:3 * D]

    # only the new rows leave the kernel (scattered into the cache by caller)
    krow_ref[...] = k_new.astype(jnp.bfloat16)[:, None, :]
    vrow_ref[...] = v_new.astype(jnp.bfloat16)[:, None, :]

    kc = kc_ref[...]                          # (B, S_max, D) bf16 (read-only)
    vc = vc_ref[...]
    S_max = kc.shape[1]

    scores = jnp.einsum('bqd,bkd->bqk', qv[:, None, :].astype(jnp.bfloat16), kc,
                        preferred_element_type=jnp.float32)      # (B, 1, S_max)
    # cache row qpos still holds zeros; splice in the current token's score
    kiota = lax.broadcasted_iota(jnp.int32, (1, 1, S_max), 2)
    is_q = kiota == qpos
    score_new = jnp.sum(qv * k_new, axis=-1, keepdims=True)[:, None, :]  # (B,1,1)
    scores = jnp.where(is_q, score_new, scores) * scale
    bias = jnp.where(mask_ref[...][:, None, :] > 0.0, 0.0, -1e30)
    scores = scores + bias

    m = jnp.max(scores, axis=-1, keepdims=True)
    p = jnp.exp(scores - m)
    p = p * pl.reciprocal(jnp.sum(p, axis=-1, keepdims=True), approx=True)
    attn = jnp.einsum('bqk,bkd->bqd', p.astype(jnp.bfloat16), vc,
                      preferred_element_type=jnp.float32)        # (B, 1, D)
    p_q = jnp.sum(jnp.where(is_q, p, 0.0), axis=-1, keepdims=True)   # (B, 1, 1)
    attn = attn[:, 0, :] + p_q[:, :, 0] * v_new                  # add current row
    attn = jnp.dot(attn.astype(jnp.bfloat16), wo_ref[...],
                   preferred_element_type=jnp.float32)
    h = h + attn

    # ---- MLP sub-block ----
    hn2 = _rmsnorm(h) * ln2_ref[...]
    up = jnp.dot(hn2.astype(jnp.bfloat16), w1_ref[...],
                 preferred_element_type=jnp.float32)
    up = up * jax.nn.sigmoid(up)
    down = jnp.dot(up.astype(jnp.bfloat16), w2_ref[...],
                   preferred_element_type=jnp.float32)
    h_ref[...] = (h + down)[:, None, :]


def decode_step(x_new, mask, q_pos, k_cache, v_cache, params):
    """x_new: (B,1,D), mask: (B,S_max), q_pos: (1,) int32 newest-token position."""
    B, _, D = x_new.shape
    L, _, S_max, _ = k_cache.shape
    F = params['w1'].shape[-1]

    out_shape = (
        jax.ShapeDtypeStruct((B, 1, D), jnp.float32),            # new hidden
        jax.ShapeDtypeStruct((L, B, 1, D), jnp.bfloat16),        # new K rows
        jax.ShapeDtypeStruct((L, B, 1, D), jnp.bfloat16),        # new V rows
    )
    grid_spec = pltpu.PrefetchScalarGridSpec(
        num_scalar_prefetch=1,
        grid=(L,),
        in_specs=[
            pl.BlockSpec((B, 1, D), lambda l, q: (0, 0, 0)),             # x_new
            pl.BlockSpec((B, S_max), lambda l, q: (0, 0)),               # key mask
            pl.BlockSpec((None, B, S_max, D), lambda l, q: (l, 0, 0, 0)),  # K cache
            pl.BlockSpec((None, B, S_max, D), lambda l, q: (l, 0, 0, 0)),  # V cache
            pl.BlockSpec((None, 1, D), lambda l, q: (l, 0, 0)),          # ln1
            pl.BlockSpec((None, D, 3 * D), lambda l, q: (l, 0, 0)),      # Wqkv
            pl.BlockSpec((None, D, D), lambda l, q: (l, 0, 0)),          # Wo
            pl.BlockSpec((None, 1, D), lambda l, q: (l, 0, 0)),          # ln2
            pl.BlockSpec((None, D, F), lambda l, q: (l, 0, 0)),          # W1
            pl.BlockSpec((None, F, D), lambda l, q: (l, 0, 0)),          # W2
        ],
        out_specs=(
            pl.BlockSpec((B, 1, D), lambda l, q: (0, 0, 0)),             # hidden
            pl.BlockSpec((None, B, 1, D), lambda l, q: (l, 0, 0, 0)),    # K rows
            pl.BlockSpec((None, B, 1, D), lambda l, q: (l, 0, 0, 0)),    # V rows
        ),
    )
    block_bytes = (B * D * 4 + B * S_max * 4 + 2 * B * S_max * D * 2
                   + 2 * D * 4 + D * 3 * D * 2 + D * D * 2 + 2 * D * F * 2
                   + B * D * 4 + 2 * B * D * 2)
    return pl.pallas_call(
        decode_block_kernel,
        out_shape=out_shape,
        grid_spec=grid_spec,
        compiler_params=pltpu.CompilerParams(
            dimension_semantics=("arbitrary",),
            vmem_limit_bytes=_vmem_limit_bytes(block_bytes)),
    )(q_pos, x_new, mask, k_cache, v_cache,
      params['ln1'], params['wqkv'], params['wo'],
      params['ln2'], params['w1'], params['w2'])


# ----------------------------------------------------------------------------
# Kernel 3: fused LM head + greedy argmax for the last position only.
# grid = (V_pad // TV,) "arbitrary"; running max/argmax kept in VMEM scratch so
# the kernel emits (B, 1) int32 token ids instead of (B, V) f32 logits.
# ----------------------------------------------------------------------------
def _make_lm_head_kernel(v_real, tv):
    def kernel(h_ref, w_ref, tok_ref, max_sc, arg_sc):
        j = pl.program_id(0)
        logits = jnp.dot(h_ref[...].astype(jnp.bfloat16), w_ref[...],
                         preferred_element_type=jnp.float32)        # (B, TV)
        col = lax.broadcasted_iota(jnp.int32, logits.shape, 1) + j * tv
        logits = jnp.where(col < v_real, logits, -1e30)              # mask vocab pad
        tile_max = jnp.max(logits, axis=-1, keepdims=True)           # (B, 1)
        tile_arg = jnp.min(jnp.where(logits >= tile_max, col, jnp.int32(2 ** 30)),
                           axis=-1, keepdims=True)                   # (B, 1)

        @pl.when(j == 0)
        def _():
            max_sc[...] = tile_max
            arg_sc[...] = tile_arg

        @pl.when(j > 0)
        def _():
            better = tile_max > max_sc[...]
            arg_sc[...] = jnp.where(better, tile_arg, arg_sc[...])
            max_sc[...] = jnp.maximum(tile_max, max_sc[...])

        @pl.when(j == pl.num_programs(0) - 1)
        def _():
            tok_ref[...] = arg_sc[...]
    return kernel


def lm_head_argmax(h, w):
    """h: (B, D) f32, w: (D, V) bf16 -> (B,) int32 greedy token ids."""
    B, D = h.shape
    V = w.shape[1]
    V_pad = _round_up(V, 128)
    if V_pad != V:
        w = jnp.pad(w, ((0, 0), (0, V_pad - V)))
    TV = next(t for t in (2048, 1024, 512, 256, 128) if V_pad % t == 0)
    # keep double-buffered weight tiles modest for v7x's 64 MiB VMEM
    while TV > 128 and 2 * D * TV * 2 > (24 << 20):
        TV //= 2
    block_bytes = B * D * 4 + D * TV * 2 + B * 4
    tok = pl.pallas_call(
        _make_lm_head_kernel(V, TV),
        out_shape=jax.ShapeDtypeStruct((B, 1), jnp.int32),
        grid=(V_pad // TV,),
        in_specs=[pl.BlockSpec((B, D), lambda j: (0, 0)),
                  pl.BlockSpec((D, TV), lambda j: (0, j))],
        out_specs=pl.BlockSpec((B, 1), lambda j: (0, 0)),
        scratch_shapes=[pltpu.VMEM((B, 1), jnp.float32),
                        pltpu.VMEM((B, 1), jnp.int32)],
        compiler_params=pltpu.CompilerParams(
            dimension_semantics=("arbitrary",),
            vmem_limit_bytes=_vmem_limit_bytes(block_bytes)),
    )(h, w)
    return tok[:, 0]


# ----------------------------------------------------------------------------
# Wrapper replicating GREENModel.forward: greedy generate() with prefill +
# KV-cache incremental decode; text decode + regex green-score parsing have no
# tensor equivalent.
# ----------------------------------------------------------------------------
def _green_forward_impl(input_ids, attention_mask, params, gen_steps, pad_id):
    B, S = input_ids.shape
    V, D = params['emb'].shape
    S_out = S + gen_steps
    S_max = _round_up(S_out, 8)            # KV-cache / mask length (sublane pad)

    emb = params['emb']
    pos = params['pos']
    lm_w = params['lm_head']

    # ---- prefill over the prompt ----
    # TODO(synk): HF shifts position_ids for left padding; absolute positions here.
    x = jnp.take(emb, input_ids.astype(jnp.int32), axis=0) + pos[None, :S, :]
    key_valid = attention_mask.astype(jnp.float32)                   # (B, S)

    h_last, k_cache, v_cache = prefill_stack(x, key_valid, params, S_max)   # Pallas
    tok0 = lm_head_argmax(h_last[:, 0, :], lm_w)                            # Pallas

    tokens = jnp.concatenate(
        [input_ids.astype(jnp.int32),
         jnp.full((B, gen_steps), pad_id, jnp.int32)], axis=1)       # (B, S_out)
    tokens = tokens.at[:, S].set(tok0)

    mask = jnp.concatenate(
        [key_valid, jnp.zeros((B, S_max - S), jnp.float32)], axis=1)  # (B, S_max)
    mask = mask.at[:, S].set(1.0)

    def step(t, carry):
        tokens, mask, kc, vc = carry
        q = S + t - 1                                   # position of newest token
        q_arr = jnp.reshape(q, (1,)).astype(jnp.int32)
        tok_q = lax.dynamic_slice_in_dim(tokens, q, 1, axis=1)        # (B, 1)
        pos_q = lax.dynamic_slice_in_dim(pos, q, 1, axis=0)           # (1, D)
        x_new = jnp.take(emb, tok_q, axis=0) + pos_q[None, :, :]      # (B, 1, D)

        h_new, k_rows, v_rows = decode_step(x_new, mask, q_arr, kc, vc, params)
        # scatter only the new rows into the carried caches (in place under jit)
        kc = lax.dynamic_update_slice(kc, k_rows, (0, 0, q, 0))
        vc = lax.dynamic_update_slice(vc, v_rows, (0, 0, q, 0))

        ntok = lm_head_argmax(h_new[:, 0, :], lm_w)                   # Pallas
        tokens = lax.dynamic_update_slice(tokens, ntok[:, None], (0, q + 1))
        mask = lax.dynamic_update_slice(
            mask, jnp.ones((B, 1), jnp.float32), (0, q + 1))
        return tokens, mask, kc, vc

    tokens, mask, k_cache, v_cache = lax.fori_loop(
        1, gen_steps, step, (tokens, mask, k_cache, v_cache))

    output_ids = tokens
    # TODO(synk): tokenizer.batch_decode + regex parse_error_counts/compute_green
    # operate on decoded text and have no Pallas/tensor equivalent.
    greens = jnp.zeros((0,), jnp.float32)
    return greens, output_ids


green_forward = jax.jit(_green_forward_impl, static_argnums=(3, 4))


if __name__ == "__main__":
    B, S, D, F, V, L, GEN = 2, 8, 128, 256, 256, 2, 4

    key = jax.random.PRNGKey(0)
    ks = jax.random.split(key, 10)
    # matmul weights cast to bf16 once here; norms/embeddings stay f32
    params = {
        'emb':     jax.random.normal(ks[0], (V, D), jnp.float32) * 0.02,
        'pos':     jax.random.normal(ks[1], (S + GEN, D), jnp.float32) * 0.02,
        'ln1':     jnp.ones((L, 1, D), jnp.float32),
        'wqkv':    (jax.random.normal(ks[2], (L, D, 3 * D), jnp.float32)
                    * 0.02).astype(jnp.bfloat16),
        'wo':      (jax.random.normal(ks[3], (L, D, D), jnp.float32)
                    * 0.02).astype(jnp.bfloat16),
        'ln2':     jnp.ones((L, 1, D), jnp.float32),
        'w1':      (jax.random.normal(ks[4], (L, D, F), jnp.float32)
                    * 0.02).astype(jnp.bfloat16),
        'w2':      (jax.random.normal(ks[5], (L, F, D), jnp.float32)
                    * 0.02).astype(jnp.bfloat16),
        'lm_head': (jax.random.normal(ks[6], (D, V), jnp.float32)
                    * 0.02).astype(jnp.bfloat16),
    }

    input_ids = jax.random.randint(ks[7], (B, S), 0, V, dtype=jnp.int32)
    # left-padded attention mask, like the HF tokenizer with padding_side='left'
    attention_mask = jnp.array([[1] * S,
                                [0, 0] + [1] * (S - 2)], dtype=jnp.int32)

    greens, output_ids = green_forward(input_ids, attention_mask, params, GEN, 0)
    jax.block_until_ready(output_ids)
    jax.block_until_ready(greens)
    print("KERNEL_OK")
</pallas_src>

<mosaic_0001>
module attributes {stable_mosaic.version = 11 : i64} {
  func.func @prefill_block_kernel(%arg0: i32, %arg1: memref<2x8x128xf32, #tpu.memory_space<vmem>>, %arg2: memref<2x8xf32, #tpu.memory_space<vmem>>, %arg3: memref<1x1x128xf32, #tpu.memory_space<vmem>>, %arg4: memref<1x128x384xbf16, #tpu.memory_space<vmem>>, %arg5: memref<1x128x128xbf16, #tpu.memory_space<vmem>>, %arg6: memref<1x1x128xf32, #tpu.memory_space<vmem>>, %arg7: memref<1x128x256xbf16, #tpu.memory_space<vmem>>, %arg8: memref<1x256x128xbf16, #tpu.memory_space<vmem>>, %arg9: memref<2x1x128xf32, #tpu.memory_space<vmem>>, %arg10: memref<1x2x16x128xbf16, #tpu.memory_space<vmem>>, %arg11: memref<1x2x16x128xbf16, #tpu.memory_space<vmem>>, %arg12: memref<2x8x128xf32, #tpu.memory_space<vmem>>) attributes {dimension_semantics = [#tpu.dimension_semantics<arbitrary>], iteration_bounds = array<i64: 2>, scalar_prefetch = 0 : i64, scratch_operands = 1 : i64, tpu.core_type = #tpu.core_type<tc>, window_params = [{pipeline_mode = #tpu.pipeline_mode<synchronous>, transform_indices = @transform_0, window_bounds = array<i64: 2, 8, 128>}, {pipeline_mode = #tpu.pipeline_mode<synchronous>, transform_indices = @transform_1, window_bounds = array<i64: 2, 8>}, {transform_indices = @transform_2, window_bounds = array<i64: 1, 1, 128>}, {transform_indices = @transform_3, window_bounds = array<i64: 1, 128, 384>}, {transform_indices = @transform_4, window_bounds = array<i64: 1, 128, 128>}, {transform_indices = @transform_5, window_bounds = array<i64: 1, 1, 128>}, {transform_indices = @transform_6, window_bounds = array<i64: 1, 128, 256>}, {transform_indices = @transform_7, window_bounds = array<i64: 1, 256, 128>}, {pipeline_mode = #tpu.pipeline_mode<synchronous>, transform_indices = @transform_8, window_bounds = array<i64: 2, 1, 128>}, {transform_indices = @transform_9, window_bounds = array<i64: 1, 2, 16, 128>}, {transform_indices = @transform_10, window_bounds = array<i64: 1, 2, 16, 128>}]} {
    %c0_i32 = arith.constant 0 : i32
    %0 = arith.cmpi eq, %arg0, %c0_i32 : i32
    %1 = arith.extui %0 : i1 to i32
    %c0_i32_0 = arith.constant 0 : i32
    %2 = arith.cmpi ne, %1, %c0_i32_0 : i32
    scf.if %2 {
      %c0_61 = arith.constant 0 : index
      %c0_62 = arith.constant 0 : index
      %c0_63 = arith.constant 0 : index
      %116 = vector.load %arg1[%c0_61, %c0_62, %c0_63] : memref<2x8x128xf32, #tpu.memory_space<vmem>>, vector<2x8x128xf32>
      %c0_64 = arith.constant 0 : index
      %c0_65 = arith.constant 0 : index
      %c0_66 = arith.constant 0 : index
      %117 = vector.load %arg12[%c0_64, %c0_65, %c0_66] : memref<2x8x128xf32, #tpu.memory_space<vmem>>, vector<2x8x128xf32>
      tpu.vector_store %arg12[%c0_64, %c0_65, %c0_66], %116 {strides = array<i32>} : memref<2x8x128xf32, #tpu.memory_space<vmem>>, vector<2x8x128xf32>,
    } else {
    }
    %c0 = arith.constant 0 : index
    %c0_1 = arith.constant 0 : index
    %c0_2 = arith.constant 0 : index
    %3 = vector.load %arg12[%c0, %c0_1, %c0_2] : memref<2x8x128xf32, #tpu.memory_space<vmem>>, vector<2x8x128xf32>
    %4 = arith.mulf %3, %3 : vector<2x8x128xf32>
    %cst = arith.constant dense<0.000000e+00> : vector<2x8xf32>
    %5 = vector.multi_reduction <add>, %4, %cst [2] : vector<2x8x128xf32> to vector<2x8xf32>
    %6 = vector.shape_cast %5 : vector<2x8xf32> to vector<2x8x1xf32>
    %cst_3 = arith.constant 1.280000e+02 : f32
    %7 = vector.broadcast %cst_3 : f32 to vector<2x8x1xf32>
    %8 = arith.divf %6, %7 : vector<2x8x1xf32>
    %cst_4 = arith.constant 9.99999997E-7 : f32
    %9 = vector.broadcast %cst_4 : f32 to vector<2x8x1xf32>
    %10 = arith.addf %8, %9 : vector<2x8x1xf32>
    %11 = math.rsqrt %10 : vector<2x8x1xf32>
    %12 = vector.broadcast %11 : vector<2x8x1xf32> to vector<2x8x128xf32>
    %13 = arith.mulf %3, %12 : vector<2x8x128xf32>
    %c0_5 = arith.constant 0 : index
    %c0_6 = arith.constant 0 : index
    %c0_7 = arith.constant 0 : index
    %14 = vector.load %arg3[%c0_5, %c0_6, %c0_7] : memref<1x1x128xf32, #tpu.memory_space<vmem>>, vector<1x1x128xf32>
    %15 = vector.shape_cast %14 : vector<1x1x128xf32> to vector<1x128xf32>
    %16 = vector.shape_cast %15 : vector<1x128xf32> to vector<1x1x128xf32>
    %17 = vector.broadcast %16 : vector<1x1x128xf32> to vector<2x8x128xf32>
    %18 = arith.mulf %13, %17 : vector<2x8x128xf32>
    %19 = vector.shape_cast %18 : vector<2x8x128xf32> to vector<16x128xf32>
    %20 = arith.truncf %19 : vector<16x128xf32> to vector<16x128xbf16>
    %c0_8 = arith.constant 0 : index
    %c0_9 = arith.constant 0 : index
    %c0_10 = arith.constant 0 : index
    %21 = vector.load %arg4[%c0_8, %c0_9, %c0_10] : memref<1x128x384xbf16, #tpu.memory_space<vmem>>, vector<1x128x384xbf16>
    %22 = vector.shape_cast %21 : vector<1x128x384xbf16> to vector<128x384xbf16>
    %cst_11 = arith.constant dense<0.000000e+00> : vector<16x384xf32>
    %23 = tpu.matmul %20, %22, %cst_11 {dimension_numbers = #tpu.dot_dimension_numbers<[1], [0], [0], [1], [0, 0, 1, 1], [], []>} : vector<16x128xbf16>, vector<128x384xbf16>, vector<16x384xf32> -> vector<16x384xf32>
    %24 = vector.shape_cast %23 : vector<16x384xf32> to vector<2x8x384xf32>
    %25 = vector.extract_strided_slice %24 {offsets = [0, 0, 0], sizes = [2, 8, 128], strides = [1, 1, 1]} : vector<2x8x384xf32> to vector<2x8x128xf32>
    %26 = vector.extract_strided_slice %24 {offsets = [0, 0, 128], sizes = [2, 8, 128], strides = [1, 1, 1]} : vector<2x8x384xf32> to vector<2x8x128xf32>
    %27 = vector.extract_strided_slice %24 {offsets = [0, 0, 256], sizes = [2, 8, 128], strides = [1, 1, 1]} : vector<2x8x384xf32> to vector<2x8x128xf32>
    %28 = arith.truncf %26 : vector<2x8x128xf32> to vector<2x8x128xbf16>
    %29 = arith.truncf %27 : vector<2x8x128xf32> to vector<2x8x128xbf16>
    %c0_12 = arith.constant 0 : index
    %c0_13 = arith.constant 0 : index
    %c0_14 = arith.constant 0 : index
    %c0_15 = arith.constant 0 : index
    %30 = vector.load %arg10[%c0_12, %c0_13, %c0_14, %c0_15] : memref<1x2x16x128xbf16, #tpu.memory_space<vmem>>, vector<1x2x8x128xbf16>
    %31 = vector.shape_cast %30 : vector<1x2x8x128xbf16> to vector<2x8x128xbf16>
    %32 = vector.shape_cast %28 : vector<2x8x128xbf16> to vector<1x2x8x128xbf16>
    tpu.vector_store %arg10[%c0_12, %c0_13, %c0_14, %c0_15], %32 {strides = array<i32>} : memref<1x2x16x128xbf16, #tpu.memory_space<vmem>>, vector<1x2x8x128xbf16>,
    %c0_16 = arith.constant 0 : index
    %c0_17 = arith.constant 0 : index
    %c0_18 = arith.constant 0 : index
    %c0_19 = arith.constant 0 : index
    %33 = vector.load %arg11[%c0_16, %c0_17, %c0_18, %c0_19] : memref<1x2x16x128xbf16, #tpu.memory_space<vmem>>, vector<1x2x8x128xbf16>
    %34 = vector.shape_cast %33 : vector<1x2x8x128xbf16> to vector<2x8x128xbf16>
    %35 = vector.shape_cast %29 : vector<2x8x128xbf16> to vector<1x2x8x128xbf16>
    tpu.vector_store %arg11[%c0_16, %c0_17, %c0_18, %c0_19], %35 {strides = array<i32>} : memref<1x2x16x128xbf16, #tpu.memory_space<vmem>>, vector<1x2x8x128xbf16>,
    %cst_20 = arith.constant 0.000000e+00 : bf16
    %36 = vector.broadcast %cst_20 : bf16 to vector<2x8x128xbf16>
    %c0_21 = arith.constant 0 : index
    %c0_22 = arith.constant 0 : index
    %c8 = arith.constant 8 : index
    %c0_23 = arith.constant 0 : index
    %37 = vector.load %arg10[%c0_21, %c0_22, %c8, %c0_23] : memref<1x2x16x128xbf16, #tpu.memory_space<vmem>>, vector<1x2x8x128xbf16>
    %38 = vector.shape_cast %37 : vector<1x2x8x128xbf16> to vector<2x8x128xbf16>
    %39 = vector.shape_cast %36 : vector<2x8x128xbf16> to vector<1x2x8x128xbf16>
    tpu.vector_store %arg10[%c0_21, %c0_22, %c8, %c0_23], %39 {strides = array<i32>} : memref<1x2x16x128xbf16, #tpu.memory_space<vmem>>, vector<1x2x8x128xbf16>,
    %cst_24 = arith.constant 0.000000e+00 : bf16
    %40 = vector.broadcast %cst_24 : bf16 to vector<2x8x128xbf16>
    %c0_25 = arith.constant 0 : index
    %c0_26 = arith.constant 0 : index
    %c8_27 = arith.constant 8 : index
    %c0_28 = arith.constant 0 : index
    %41 = vector.load %arg11[%c0_25, %c0_26, %c8_27, %c0_28] : memref<1x2x16x128xbf16, #tpu.memory_space<vmem>>, vector<1x2x8x128xbf16>
    %42 = vector.shape_cast %41 : vector<1x2x8x128xbf16> to vector<2x8x128xbf16>
    %43 = vector.shape_cast %40 : vector<2x8x128xbf16> to vector<1x2x8x128xbf16>
    tpu.vector_store %arg11[%c0_25, %c0_26, %c8_27, %c0_28], %43 {strides = array<i32>} : memref<1x2x16x128xbf16, #tpu.memory_space<vmem>>, vector<1x2x8x128xbf16>,
    %44 = arith.truncf %25 : vector<2x8x128xf32> to vector<2x8x128xbf16>
    "tpu.trace_start"() <{level = 10 : i32, message = "bqd,bkd->bqk"}> : () -> ()
    %cst_29 = arith.constant dense<0.000000e+00> : vector<2x8x8xf32>
    %45 = tpu.matmul %44, %28, %cst_29 {dimension_numbers = #tpu.dot_dimension_numbers<[2], [2], [1], [1], [0, 0, 0, 1, 1, 1], [0], [0]>} : vector<2x8x128xbf16>, vector<2x8x128xbf16>, vector<2x8x8xf32> -> vector<2x8x8xf32>
    "tpu.trace_stop"() : () -> ()
    %cst_30 = arith.constant 0.0883883461 : f32
    %46 = vector.broadcast %cst_30 : f32 to vector<2x8x8xf32>
    %47 = arith.mulf %45, %46 : vector<2x8x8xf32>
    %48 = tpu.iota {dimensions = array<i32: 0>} : vector<8x8xi32>
    %49 = tpu.iota {dimensions = array<i32: 1>} : vector<8x8xi32>
    %50 = arith.cmpi sle, %49, %48 : vector<8x8xi32>
    %51 = vector.shape_cast %50 : vector<8x8xi1> to vector<1x8x8xi1>
    %c0_31 = arith.constant 0 : index
    %c0_32 = arith.constant 0 : index
    %52 = vector.load %arg2[%c0_31, %c0_32] : memref<2x8xf32, #tpu.memory_space<vmem>>, vector<2x8xf32>
    %53 = vector.shape_cast %52 : vector<2x8xf32> to vector<2x1x8xf32>
    %cst_33 = arith.constant 0.000000e+00 : f32
    %54 = vector.broadcast %cst_33 : f32 to vector<2x1x8xf32>
    %55 = arith.cmpf ogt, %53, %54 : vector<2x1x8xf32>
    %56 = vector.broadcast %51 : vector<1x8x8xi1> to vector<2x8x8xi1>
    %57 = vector.broadcast %55 : vector<2x1x8xi1> to vector<2x8x8xi1>
    %58 = arith.andi %56, %57 : vector<2x8x8xi1>
    %cst_34 = arith.constant -1.000000e+30 : f32
    %59 = vector.broadcast %cst_34 : f32 to vector<2x8x8xf32>
    %60 = arith.select %58, %47, %59 : vector<2x8x8xi1>, vector<2x8x8xf32>
    %cst_35 = arith.constant dense<0xFF800000> : vector<2x8xf32>
    %61 = vector.multi_reduction <maximumf>, %60, %cst_35 [2] : vector<2x8x8xf32> to vector<2x8xf32>
    %62 = vector.shape_cast %61 : vector<2x8xf32> to vector<2x8x1xf32>
    %63 = vector.broadcast %62 : vector<2x8x1xf32> to vector<2x8x8xf32>
    %64 = arith.subf %60, %63 : vector<2x8x8xf32>
    %65 = math.exp %64 : vector<2x8x8xf32>
    %cst_36 = arith.constant dense<0.000000e+00> : vector<2x8xf32>
    %66 = vector.multi_reduction <add>, %65, %cst_36 [2] : vector<2x8x8xf32> to vector<2x8xf32>
    %67 = vector.shape_cast %66 : vector<2x8xf32> to vector<2x8x1xf32>
    %68 = tpu.reciprocal %67 {approx = true} : vector<2x8x1xf32> -> vector<2x8x1xf32>
    %69 = vector.broadcast %68 : vector<2x8x1xf32> to vector<2x8x8xf32>
    %70 = arith.mulf %65, %69 : vector<2x8x8xf32>
    %71 = arith.truncf %70 : vector<2x8x8xf32> to vector<2x8x8xbf16>
    "tpu.trace_start"() <{level = 10 : i32, message = "bqk,bkd->bqd"}> : () -> ()
    %cst_37 = arith.constant dense<0.000000e+00> : vector<2x8x128xf32>
    %72 = tpu.matmul %71, %29, %cst_37 {dimension_numbers = #tpu.dot_dimension_numbers<[2], [1], [1], [2], [0, 0, 0, 1, 1, 2], [0], [0]>} : vector<2x8x8xbf16>, vector<2x8x128xbf16>, vector<2x8x128xf32> -> vector<2x8x128xf32>
    "tpu.trace_stop"() : () -> ()
    %73 = vector.shape_cast %72 : vector<2x8x128xf32> to vector<16x128xf32>
    %74 = arith.truncf %73 : vector<16x128xf32> to vector<16x128xbf16>
    %c0_38 = arith.constant 0 : index
    %c0_39 = arith.constant 0 : index
    %c0_40 = arith.constant 0 : index
    %75 = vector.load %arg5[%c0_38, %c0_39, %c0_40] : memref<1x128x128xbf16, #tpu.memory_space<vmem>>, vector<1x128x128xbf16>
    %76 = vector.shape_cast %75 : vector<1x128x128xbf16> to vector<128x128xbf16>
    %cst_41 = arith.constant dense<0.000000e+00> : vector<16x128xf32>
    %77 = tpu.matmul %74, %76, %cst_41 {dimension_numbers = #tpu.dot_dimension_numbers<[1], [0], [0], [1], [0, 0, 1, 1], [], []>} : vector<16x128xbf16>, vector<128x128xbf16>, vector<16x128xf32> -> vector<16x128xf32>
    %78 = vector.shape_cast %77 : vector<16x128xf32> to vector<2x8x128xf32>
    %79 = arith.addf %3, %78 : vector<2x8x128xf32>
    %80 = arith.mulf %79, %79 : vector<2x8x128xf32>
    %cst_42 = arith.constant dense<0.000000e+00> : vector<2x8xf32>
    %81 = vector.multi_reduction <add>, %80, %cst_42 [2] : vector<2x8x128xf32> to vector<2x8xf32>
    %82 = vector.shape_cast %81 : vector<2x8xf32> to vector<2x8x1xf32>
    %cst_43 = arith.constant 1.280000e+02 : f32
    %83 = vector.broadcast %cst_43 : f32 to vector<2x8x1xf32>
    %84 = arith.divf %82, %83 : vector<2x8x1xf32>
    %cst_44 = arith.constant 9.99999997E-7 : f32
    %85 = vector.broadcast %cst_44 : f32 to vector<2x8x1xf32>
    %86 = arith.addf %84, %85 : vector<2x8x1xf32>
    %87 = math.rsqrt %86 : vector<2x8x1xf32>
    %88 = vector.broadcast %87 : vector<2x8x1xf32> to vector<2x8x128xf32>
    %89 = arith.mulf %79, %88 : vector<2x8x128xf32>
    %c0_45 = arith.constant 0 : index
    %c0_46 = arith.constant 0 : index
    %c0_47 = arith.constant 0 : index
    %90 = vector.load %arg6[%c0_45, %c0_46, %c0_47] : memref<1x1x128xf32, #tpu.memory_space<vmem>>, vector<1x1x128xf32>
    %91 = vector.shape_cast %90 : vector<1x1x128xf32> to vector<1x128xf32>
    %92 = vector.shape_cast %91 : vector<1x128xf32> to vector<1x1x128xf32>
    %93 = vector.broadcast %92 : vector<1x1x128xf32> to vector<2x8x128xf32>
    %94 = arith.mulf %89, %93 : vector<2x8x128xf32>
    %95 = vector.shape_cast %94 : vector<2x8x128xf32> to vector<16x128xf32>
    %96 = arith.truncf %95 : vector<16x128xf32> to vector<16x128xbf16>
    %c0_48 = arith.constant 0 : index
    %c0_49 = arith.constant 0 : index
    %c0_50 = arith.constant 0 : index
    %97 = vector.load %arg7[%c0_48, %c0_49, %c0_50] : memref<1x128x256xbf16, #tpu.memory_space<vmem>>, vector<1x128x256xbf16>
    %98 = vector.shape_cast %97 : vector<1x128x256xbf16> to vector<128x256xbf16>
    %cst_51 = arith.constant dense<0.000000e+00> : vector<16x256xf32>
    %99 = tpu.matmul %96, %98, %cst_51 {dimension_numbers = #tpu.dot_dimension_numbers<[1], [0], [0], [1], [0, 0, 1, 1], [], []>} : vector<16x128xbf16>, vector<128x256xbf16>, vector<16x256xf32> -> vector<16x256xf32>
    %100 = arith.negf %99 : vector<16x256xf32>
    %101 = math.exp %100 : vector<16x256xf32>
    %cst_52 = arith.constant 1.000000e+00 : f32
    %102 = vector.broadcast %cst_52 : f32 to vector<16x256xf32>
    %103 = arith.addf %102, %101 : vector<16x256xf32>
    %104 = arith.divf %102, %103 : vector<16x256xf32>
    %105 = arith.mulf %99, %104 : vector<16x256xf32>
    %106 = arith.truncf %105 : vector<16x256xf32> to vector<16x256xbf16>
    %c0_53 = arith.constant 0 : index
    %c0_54 = arith.constant 0 : index
    %c0_55 = arith.constant 0 : index
    %107 = vector.load %arg8[%c0_53, %c0_54, %c0_55] : memref<1x256x128xbf16, #tpu.memory_space<vmem>>, vector<1x256x128xbf16>
    %108 = vector.shape_cast %107 : vector<1x256x128xbf16> to vector<256x128xbf16>
    %cst_56 = arith.constant dense<0.000000e+00> : vector<16x128xf32>
    %109 = tpu.matmul %106, %108, %cst_56 {dimension_numbers = #tpu.dot_dimension_numbers<[1], [0], [0], [1], [0, 0, 1, 1], [], []>} : vector<16x256xbf16>, vector<256x128xbf16>, vector<16x128xf32> -> vector<16x128xf32>
    %110 = vector.shape_cast %109 : vector<16x128xf32> to vector<2x8x128xf32>
    %111 = arith.addf %79, %110 : vector<2x8x128xf32>
    %c0_57 = arith.constant 0 : index
    %c0_58 = arith.constant 0 : index
    %c0_59 = arith.constant 0 : index
    %112 = vector.load %arg12[%c0_57, %c0_58, %c0_59] : memref<2x8x128xf32, #tpu.memory_space<vmem>>, vector<2x8x128xf32>
    tpu.vector_store %arg12[%c0_57, %c0_58, %c0_59], %111 {strides = array<i32>} : memref<2x8x128xf32, #tpu.memory_space<vmem>>, vector<2x8x128xf32>,
    %c1_i32 = arith.constant 1 : i32
    %113 = arith.cmpi eq, %arg0, %c1_i32 : i32
    %114 = arith.extui %113 : i1 to i32
    %c0_i32_60 = arith.constant 0 : i32
    %115 = arith.cmpi ne, %114, %c0_i32_60 : i32
    scf.if %115 {
      %116 = vector.extract_strided_slice %111 {offsets = [0, 7, 0], sizes = [2, 1, 128], strides = [1, 1, 1]} : vector<2x8x128xf32> to vector<2x1x128xf32>
      %c0_61 = arith.constant 0 : index
      %c0_62 = arith.constant 0 : index
      %c0_63 = arith.constant 0 : index
      %117 = vector.load %arg9[%c0_61, %c0_62, %c0_63] : memref<2x1x128xf32, #tpu.memory_space<vmem>>, vector<2x1x128xf32>
      tpu.vector_store %arg9[%c0_61, %c0_62, %c0_63], %116 {strides = array<i32>} : memref<2x1x128xf32, #tpu.memory_space<vmem>>, vector<2x1x128xf32>,
    } else {
    }
    return
  }
  func.func @transform_0(%arg0: i32) -> (i32, i32, i32) {
    %c0_i32 = arith.constant 0 : i32
    %c0_i32_0 = arith.constant 0 : i32
    %c0_i32_1 = arith.constant 0 : i32
    %c0_i32_2 = arith.constant 0 : i32
    return %c0_i32, %c0_i32_0, %c0_i32_1 : i32, i32, i32
  }
  func.func @transform_1(%arg0: i32) -> (i32, i32) {
    %c0_i32 = arith.constant 0 : i32
    %c0_i32_0 = arith.constant 0 : i32
    %c0_i32_1 = arith.constant 0 : i32
    return %c0_i32, %c0_i32_0 : i32, i32
  }
  func.func @transform_2(%arg0: i32) -> (i32, i32, i32) {
    %c0_i32 = arith.constant 0 : i32
    %c0_i32_0 = arith.constant 0 : i32
    %c0_i32_1 = arith.constant 0 : i32
    return %arg0, %c0_i32, %c0_i32_0 : i32, i32, i32
  }
  func.func @transform_3(%arg0: i32) -> (i32, i32, i32) {
    %c0_i32 = arith.constant 0 : i32
    %c0_i32_0 = arith.constant 0 : i32
    %c0_i32_1 = arith.constant 0 : i32
    return %arg0, %c0_i32, %c0_i32_0 : i32, i32, i32
  }
  func.func @transform_4(%arg0: i32) -> (i32, i32, i32) {
    %c0_i32 = arith.constant 0 : i32
    %c0_i32_0 = arith.constant 0 : i32
    %c0_i32_1 = arith.constant 0 : i32
    return %arg0, %c0_i32, %c0_i32_0 : i32, i32, i32
  }
  func.func @transform_5(%arg0: i32) -> (i32, i32, i32) {
    %c0_i32 = arith.constant 0 : i32
    %c0_i32_0 = arith.constant 0 : i32
    %c0_i32_1 = arith.constant 0 : i32
    return %arg0, %c0_i32, %c0_i32_0 : i32, i32, i32
  }
  func.func @transform_6(%arg0: i32) -> (i32, i32, i32) {
    %c0_i32 = arith.constant 0 : i32
    %c0_i32_0 = arith.constant 0 : i32
    %c0_i32_1 = arith.constant 0 : i32
    return %arg0, %c0_i32, %c0_i32_0 : i32, i32, i32
  }
  func.func @transform_7(%arg0: i32) -> (i32, i32, i32) {
    %c0_i32 = arith.constant 0 : i32
    %c0_i32_0 = arith.constant 0 : i32
    %c0_i32_1 = arith.constant 0 : i32
    return %arg0, %c0_i32, %c0_i32_0 : i32, i32, i32
  }
  func.func @transform_8(%arg0: i32) -> (i32, i32, i32) {
    %c0_i32 = arith.constant 0 : i32
    %c0_i32_0 = arith.constant 0 : i32
    %c0_i32_1 = arith.constant 0 : i32
    %c0_i32_2 = arith.constant 0 : i32
    return %c0_i32, %c0_i32_0, %c0_i32_1 : i32, i32, i32
  }
  func.func @transform_9(%arg0: i32) -> (i32, i32, i32, i32) {
    %c0_i32 = arith.constant 0 : i32
    %c0_i32_0 = arith.constant 0 : i32
    %c0_i32_1 = arith.constant 0 : i32
    %c0_i32_2 = arith.constant 0 : i32
    return %arg0, %c0_i32, %c0_i32_0, %c0_i32_1 : i32, i32, i32, i32
  }
  func.func @transform_10(%arg0: i32) -> (i32, i32, i32, i32) {
    %c0_i32 = arith.constant 0 : i32
    %c0_i32_0 = arith.constant 0 : i32
    %c0_i32_1 = arith.constant 0 : i32
    %c0_i32_2 = arith.constant 0 : i32
    return %arg0, %c0_i32, %c0_i32_0, %c0_i32_1 : i32, i32, i32, i32
  }
}

module attributes {stable_mosaic.version = 11 : i64} {
  func.func @kernel(%arg0: i32, %arg1: memref<2x128xf32, #tpu.memory_space<vmem>>, %arg2: memref<128x256xbf16, #tpu.memory_space<vmem>>, %arg3: memref<2x1xi32, #tpu.memory_space<vmem>>, %arg4: memref<2x1xf32, #tpu.memory_space<vmem>>, %arg5: memref<2x1xi32, #tpu.memory_space<vmem>>) attributes {dimension_semantics = [#tpu.dimension_semantics<arbitrary>], iteration_bounds = array<i64: 1>, scalar_prefetch = 0 : i64, scratch_operands = 2 : i64, tpu.core_type = #tpu.core_type<tc>, window_params = [{pipeline_mode = #tpu.pipeline_mode<synchronous>, transform_indices = @transform_0, window_bounds = array<i64: 2, 128>}, {transform_indices = @transform_1, window_bounds = array<i64: 128, 256>}, {pipeline_mode = #tpu.pipeline_mode<synchronous>, transform_indices = @transform_2, window_bounds = array<i64: 2, 1>}]} {
    %c0 = arith.constant 0 : index
    %c0_0 = arith.constant 0 : index
    %0 = vector.load %arg1[%c0, %c0_0] : memref<2x128xf32, #tpu.memory_space<vmem>>, vector<2x128xf32>
    %1 = arith.truncf %0 : vector<2x128xf32> to vector<2x128xbf16>
    %c0_1 = arith.constant 0 : index
    %c0_2 = arith.constant 0 : index
    %2 = vector.load %arg2[%c0_1, %c0_2] : memref<128x256xbf16, #tpu.memory_space<vmem>>, vector<128x256xbf16>
    %cst = arith.constant dense<0.000000e+00> : vector<2x256xf32>
    %3 = tpu.matmul %1, %2, %cst {dimension_numbers = #tpu.dot_dimension_numbers<[1], [0], [0], [1], [0, 0, 1, 1], [], []>} : vector<2x128xbf16>, vector<128x256xbf16>, vector<2x256xf32> -> vector<2x256xf32>
    %4 = tpu.iota {dimensions = array<i32: 1>} : vector<2x256xi32>
    %c256_i32 = arith.constant 256 : i32
    %5 = arith.muli %arg0, %c256_i32 : i32
    %6 = vector.broadcast %5 : i32 to vector<2x256xi32>
    %7 = arith.addi %4, %6 : vector<2x256xi32>
    %c256_i32_3 = arith.constant 256 : i32
    %8 = vector.broadcast %c256_i32_3 : i32 to vector<2x256xi32>
    %9 = arith.cmpi slt, %7, %8 : vector<2x256xi32>
    %cst_4 = arith.constant -1.000000e+30 : f32
    %10 = vector.broadcast %cst_4 : f32 to vector<2x256xf32>
    %11 = arith.select %9, %3, %10 : vector<2x256xi1>, vector<2x256xf32>
    %cst_5 = arith.constant dense<0xFF800000> : vector<2xf32>
    %12 = vector.multi_reduction <maximumf>, %11, %cst_5 [1] : vector<2x256xf32> to vector<2xf32>
    %13 = vector.shape_cast %12 : vector<2xf32> to vector<2x1xf32>
    %14 = vector.broadcast %13 : vector<2x1xf32> to vector<2x256xf32>
    %15 = arith.cmpf oge, %11, %14 : vector<2x256xf32>
    %c1073741824_i32 = arith.constant 1073741824 : i32
    %16 = vector.broadcast %c1073741824_i32 : i32 to vector<2x256xi32>
    %17 = arith.select %15, %7, %16 : vector<2x256xi1>, vector<2x256xi32>
    %cst_6 = arith.constant dense<2147483647> : vector<2xi32>
    %18 = vector.multi_reduction <minsi>, %17, %cst_6 [1] : vector<2x256xi32> to vector<2xi32>
    %19 = vector.shape_cast %18 : vector<2xi32> to vector<2x1xi32>
    %c0_i32 = arith.constant 0 : i32
    %20 = arith.cmpi eq, %arg0, %c0_i32 : i32
    %21 = arith.extui %20 : i1 to i32
    %c0_i32_7 = arith.constant 0 : i32
    %22 = arith.cmpi ne, %21, %c0_i32_7 : i32
    scf.if %22 {
      %c0_12 = arith.constant 0 : index
      %c0_13 = arith.constant 0 : index
      %29 = vector.load %arg4[%c0_12, %c0_13] : memref<2x1xf32, #tpu.memory_space<vmem>>, vector<2x1xf32>
      tpu.vector_store %arg4[%c0_12, %c0_13], %13 {strides = array<i32>} : memref<2x1xf32, #tpu.memory_space<vmem>>, vector<2x1xf32>,
      %c0_14 = arith.constant 0 : index
      %c0_15 = arith.constant 0 : index
      %30 = vector.load %arg5[%c0_14, %c0_15] : memref<2x1xi32, #tpu.memory_space<vmem>>, vector<2x1xi32>
      tpu.vector_store %arg5[%c0_14, %c0_15], %19 {strides = array<i32>} : memref<2x1xi32, #tpu.memory_space<vmem>>, vector<2x1xi32>,
    } else {
    }
    %c0_i32_8 = arith.constant 0 : i32
    %23 = arith.cmpi sgt, %arg0, %c0_i32_8 : i32
    %24 = arith.extui %23 : i1 to i32
    %c0_i32_9 = arith.constant 0 : i32
    %25 = arith.cmpi ne, %24, %c0_i32_9 : i32
    scf.if %25 {
      %c0_12 = arith.constant 0 : index
      %c0_13 = arith.constant 0 : index
      %29 = vector.load %arg4[%c0_12, %c0_13] : memref<2x1xf32, #tpu.memory_space<vmem>>, vector<2x1xf32>
      %30 = arith.cmpf ogt, %13, %29 : vector<2x1xf32>
      %c0_14 = arith.constant 0 : index
      %c0_15 = arith.constant 0 : index
      %31 = vector.load %arg5[%c0_14, %c0_15] : memref<2x1xi32, #tpu.memory_space<vmem>>, vector<2x1xi32>
      %32 = arith.select %30, %19, %31 : vector<2x1xi1>, vector<2x1xi32>
      %c0_16 = arith.constant 0 : index
      %c0_17 = arith.constant 0 : index
      %33 = vector.load %arg5[%c0_16, %c0_17] : memref<2x1xi32, #tpu.memory_space<vmem>>, vector<2x1xi32>
      tpu.vector_store %arg5[%c0_16, %c0_17], %32 {strides = array<i32>} : memref<2x1xi32, #tpu.memory_space<vmem>>, vector<2x1xi32>,
      %c0_18 = arith.constant 0 : index
      %c0_19 = arith.constant 0 : index
      %34 = vector.load %arg4[%c0_18, %c0_19] : memref<2x1xf32, #tpu.memory_space<vmem>>, vector<2x1xf32>
      %35 = arith.maximumf %13, %34 : vector<2x1xf32>
      %c0_20 = arith.constant 0 : index
      %c0_21 = arith.constant 0 : index
      %36 = vector.load %arg4[%c0_20, %c0_21] : memref<2x1xf32, #tpu.memory_space<vmem>>, vector<2x1xf32>
      tpu.vector_store %arg4[%c0_20, %c0_21], %35 {strides = array<i32>} : memref<2x1xf32, #tpu.memory_space<vmem>>, vector<2x1xf32>,
    } else {
    }
    %c0_i32_10 = arith.constant 0 : i32
    %26 = arith.cmpi eq, %arg0, %c0_i32_10 : i32
    %27 = arith.extui %26 : i1 to i32
    %c0_i32_11 = arith.constant 0 : i32
    %28 = arith.cmpi ne, %27, %c0_i32_11 : i32
    scf.if %28 {
      %c0_12 = arith.constant 0 : index
      %c0_13 = arith.constant 0 : index
      %29 = vector.load %arg5[%c0_12, %c0_13] : memref<2x1xi32, #tpu.memory_space<vmem>>, vector<2x1xi32>
      %c0_14 = arith.constant 0 : index
      %c0_15 = arith.constant 0 : index
      %30 = vector.load %arg3[%c0_14, %c0_15] : memref<2x1xi32, #tpu.memory_space<vmem>>, vector<2x1xi32>
      tpu.vector_store %arg3[%c0_14, %c0_15], %29 {strides = array<i32>} : memref<2x1xi32, #tpu.memory_space<vmem>>, vector<2x1xi32>,
    } else {
    }
    return
  }
  func.func @transform_0(%arg0: i32) -> (i32, i32) {
    %c0_i32 = arith.constant 0 : i32
    %c0_i32_0 = arith.constant 0 : i32
    %c0_i32_1 = arith.constant 0 : i32
    return %c0_i32, %c0_i32_0 : i32, i32
  }
  func.func @transform_1(%arg0: i32) -> (i32, i32) {
    %c0_i32 = arith.constant 0 : i32
    %c0_i32_0 = arith.constant 0 : i32
    return %c0_i32, %arg0 : i32, i32
  }
  func.func @transform_2(%arg0: i32) -> (i32, i32) {
    %c0_i32 = arith.constant 0 : i32
    %c0_i32_0 = arith.constant 0 : i32
    %c0_i32_1 = arith.constant 0 : i32
    return %c0_i32, %c0_i32_0 : i32, i32
  }
}

module attributes {stable_mosaic.version = 11 : i64} {
  func.func @decode_block_kernel(%arg0: i32, %arg1: memref<1xi32, #tpu.memory_space<smem>>, %arg2: memref<2x1x128xf32, #tpu.memory_space<vmem>>, %arg3: memref<2x16xf32, #tpu.memory_space<vmem>>, %arg4: memref<1x2x16x128xbf16, #tpu.memory_space<vmem>>, %arg5: memref<1x2x16x128xbf16, #tpu.memory_space<vmem>>, %arg6: memref<1x1x128xf32, #tpu.memory_space<vmem>>, %arg7: memref<1x128x384xbf16, #tpu.memory_space<vmem>>, %arg8: memref<1x128x128xbf16, #tpu.memory_space<vmem>>, %arg9: memref<1x1x128xf32, #tpu.memory_space<vmem>>, %arg10: memref<1x128x256xbf16, #tpu.memory_space<vmem>>, %arg11: memref<1x256x128xbf16, #tpu.memory_space<vmem>>, %arg12: memref<2x1x128xf32, #tpu.memory_space<vmem>>, %arg13: memref<1x2x1x128xbf16, #tpu.memory_space<vmem>>, %arg14: memref<1x2x1x128xbf16, #tpu.memory_space<vmem>>) attributes {dimension_semantics = [#tpu.dimension_semantics<arbitrary>], iteration_bounds = array<i64: 2>, scalar_prefetch = 1 : i64, scratch_operands = 0 : i64, tpu.core_type = #tpu.core_type<tc>, window_params = [{pipeline_mode = #tpu.pipeline_mode<synchronous>, transform_indices = @transform_0, window_bounds = array<i64: 2, 1, 128>}, {pipeline_mode = #tpu.pipeline_mode<synchronous>, transform_indices = @transform_1, window_bounds = array<i64: 2, 16>}, {transform_indices = @transform_2, window_bounds = array<i64: 1, 2, 16, 128>}, {transform_indices = @transform_3, window_bounds = array<i64: 1, 2, 16, 128>}, {transform_indices = @transform_4, window_bounds = array<i64: 1, 1, 128>}, {transform_indices = @transform_5, window_bounds = array<i64: 1, 128, 384>}, {transform_indices = @transform_6, window_bounds = array<i64: 1, 128, 128>}, {transform_indices = @transform_7, window_bounds = array<i64: 1, 1, 128>}, {transform_indices = @transform_8, window_bounds = array<i64: 1, 128, 256>}, {transform_indices = @transform_9, window_bounds = array<i64: 1, 256, 128>}, {pipeline_mode = #tpu.pipeline_mode<synchronous>, transform_indices = @transform_10, window_bounds = array<i64: 2, 1, 128>}, {transform_indices = @transform_11, window_bounds = array<i64: 1, 2, 1, 128>}, {transform_indices = @transform_12, window_bounds = array<i64: 1, 2, 1, 128>}]} {
    %c0_i32 = arith.constant 0 : i32
    %0 = arith.cmpi eq, %arg0, %c0_i32 : i32
    %1 = arith.extui %0 : i1 to i32
    %c0_i32_0 = arith.constant 0 : i32
    %2 = arith.cmpi ne, %1, %c0_i32_0 : i32
    scf.if %2 {
      %c0_64 = arith.constant 0 : index
      %c0_65 = arith.constant 0 : index
      %c0_66 = arith.constant 0 : index
      %125 = vector.load %arg2[%c0_64, %c0_65, %c0_66] : memref<2x1x128xf32, #tpu.memory_space<vmem>>, vector<2x1x128xf32>
      %c0_67 = arith.constant 0 : index
      %c0_68 = arith.constant 0 : index
      %c0_69 = arith.constant 0 : index
      %126 = vector.load %arg12[%c0_67, %c0_68, %c0_69] : memref<2x1x128xf32, #tpu.memory_space<vmem>>, vector<2x1x128xf32>
      tpu.vector_store %arg12[%c0_67, %c0_68, %c0_69], %125 {strides = array<i32>} : memref<2x1x128xf32, #tpu.memory_space<vmem>>, vector<2x1x128xf32>,
    } else {
    }
    %c0 = arith.constant 0 : index
    %c0_1 = arith.constant 0 : index
    %c0_2 = arith.constant 0 : index
    %3 = vector.load %arg12[%c0, %c0_1, %c0_2] : memref<2x1x128xf32, #tpu.memory_space<vmem>>, vector<2x1x128xf32>
    %4 = vector.shape_cast %3 : vector<2x1x128xf32> to vector<2x128xf32>
    %c0_3 = arith.constant 0 : index
    %5 = memref.load %arg1[%c0_3] : memref<1xi32, #tpu.memory_space<smem>>
    %6 = arith.mulf %4, %4 : vector<2x128xf32>
    %cst = arith.constant dense<0.000000e+00> : vector<2xf32>
    %7 = vector.multi_reduction <add>, %6, %cst [1] : vector<2x128xf32> to vector<2xf32>
    %8 = vector.shape_cast %7 : vector<2xf32> to vector<2x1xf32>
    %cst_4 = arith.constant 1.280000e+02 : f32
    %9 = vector.broadcast %cst_4 : f32 to vector<2x1xf32>
    %10 = arith.divf %8, %9 : vector<2x1xf32>
    %cst_5 = arith.constant 9.99999997E-7 : f32
    %11 = vector.broadcast %cst_5 : f32 to vector<2x1xf32>
    %12 = arith.addf %10, %11 : vector<2x1xf32>
    %13 = math.rsqrt %12 : vector<2x1xf32>
    %14 = vector.broadcast %13 : vector<2x1xf32> to vector<2x128xf32>
    %15 = arith.mulf %4, %14 : vector<2x128xf32>
    %c0_6 = arith.constant 0 : index
    %c0_7 = arith.constant 0 : index
    %c0_8 = arith.constant 0 : index
    %16 = vector.load %arg6[%c0_6, %c0_7, %c0_8] : memref<1x1x128xf32, #tpu.memory_space<vmem>>, vector<1x1x128xf32>
    %17 = vector.shape_cast %16 : vector<1x1x128xf32> to vector<1x128xf32>
    %18 = vector.broadcast %17 : vector<1x128xf32> to vector<2x128xf32>
    %19 = arith.mulf %15, %18 : vector<2x128xf32>
    %20 = arith.truncf %19 : vector<2x128xf32> to vector<2x128xbf16>
    %c0_9 = arith.constant 0 : index
    %c0_10 = arith.constant 0 : index
    %c0_11 = arith.constant 0 : index
    %21 = vector.load %arg7[%c0_9, %c0_10, %c0_11] : memref<1x128x384xbf16, #tpu.memory_space<vmem>>, vector<1x128x384xbf16>
    %22 = vector.shape_cast %21 : vector<1x128x384xbf16> to vector<128x384xbf16>
    %cst_12 = arith.constant dense<0.000000e+00> : vector<2x384xf32>
    %23 = tpu.matmul %20, %22, %cst_12 {dimension_numbers = #tpu.dot_dimension_numbers<[1], [0], [0], [1], [0, 0, 1, 1], [], []>} : vector<2x128xbf16>, vector<128x384xbf16>, vector<2x384xf32> -> vector<2x384xf32>
    %24 = vector.extract_strided_slice %23 {offsets = [0, 0], sizes = [2, 128], strides = [1, 1]} : vector<2x384xf32> to vector<2x128xf32>
    %25 = vector.extract_strided_slice %23 {offsets = [0, 128], sizes = [2, 128], strides = [1, 1]} : vector<2x384xf32> to vector<2x128xf32>
    %26 = vector.extract_strided_slice %23 {offsets = [0, 256], sizes = [2, 128], strides = [1, 1]} : vector<2x384xf32> to vector<2x128xf32>
    %27 = arith.truncf %25 : vector<2x128xf32> to vector<2x128xbf16>
    %28 = vector.shape_cast %27 : vector<2x128xbf16> to vector<2x1x128xbf16>
    %c0_13 = arith.constant 0 : index
    %c0_14 = arith.constant 0 : index
    %c0_15 = arith.constant 0 : index
    %c0_16 = arith.constant 0 : index
    %29 = vector.load %arg13[%c0_13, %c0_14, %c0_15, %c0_16] : memref<1x2x1x128xbf16, #tpu.memory_space<vmem>>, vector<1x2x1x128xbf16>
    %30 = vector.shape_cast %29 : vector<1x2x1x128xbf16> to vector<2x1x128xbf16>
    %31 = vector.shape_cast %28 : vector<2x1x128xbf16> to vector<1x2x1x128xbf16>
    tpu.vector_store %arg13[%c0_13, %c0_14, %c0_15, %c0_16], %31 {strides = array<i32>} : memref<1x2x1x128xbf16, #tpu.memory_space<vmem>>, vector<1x2x1x128xbf16>,
    %32 = arith.truncf %26 : vector<2x128xf32> to vector<2x128xbf16>
    %33 = vector.shape_cast %32 : vector<2x128xbf16> to vector<2x1x128xbf16>
    %c0_17 = arith.constant 0 : index
    %c0_18 = arith.constant 0 : index
    %c0_19 = arith.constant 0 : index
    %c0_20 = arith.constant 0 : index
    %34 = vector.load %arg14[%c0_17, %c0_18, %c0_19, %c0_20] : memref<1x2x1x128xbf16, #tpu.memory_space<vmem>>, vector<1x2x1x128xbf16>
    %35 = vector.shape_cast %34 : vector<1x2x1x128xbf16> to vector<2x1x128xbf16>
    %36 = vector.shape_cast %33 : vector<2x1x128xbf16> to vector<1x2x1x128xbf16>
    tpu.vector_store %arg14[%c0_17, %c0_18, %c0_19, %c0_20], %36 {strides = array<i32>} : memref<1x2x1x128xbf16, #tpu.memory_space<vmem>>, vector<1x2x1x128xbf16>,
    %c0_21 = arith.constant 0 : index
    %c0_22 = arith.constant 0 : index
    %c0_23 = arith.constant 0 : index
    %c0_24 = arith.constant 0 : index
    %37 = vector.load %arg4[%c0_21, %c0_22, %c0_23, %c0_24] : memref<1x2x16x128xbf16, #tpu.memory_space<vmem>>, vector<1x2x16x128xbf16>
    %38 = vector.shape_cast %37 : vector<1x2x16x128xbf16> to vector<2x16x128xbf16>
    %c0_25 = arith.constant 0 : index
    %c0_26 = arith.constant 0 : index
    %c0_27 = arith.constant 0 : index
    %c0_28 = arith.constant 0 : index
    %39 = vector.load %arg5[%c0_25, %c0_26, %c0_27, %c0_28] : memref<1x2x16x128xbf16, #tpu.memory_space<vmem>>, vector<1x2x16x128xbf16>
    %40 = vector.shape_cast %39 : vector<1x2x16x128xbf16> to vector<2x16x128xbf16>
    %41 = vector.shape_cast %24 : vector<2x128xf32> to vector<2x1x128xf32>
    %42 = arith.truncf %41 : vector<2x1x128xf32> to vector<2x1x128xbf16>
    "tpu.trace_start"() <{level = 10 : i32, message = "bqd,bkd->bqk"}> : () -> ()
    %cst_29 = arith.constant dense<0.000000e+00> : vector<2x1x16xf32>
    %43 = tpu.matmul %42, %38, %cst_29 {dimension_numbers = #tpu.dot_dimension_numbers<[2], [2], [1], [1], [0, 0, 0, 1, 1, 1], [0], [0]>} : vector<2x1x128xbf16>, vector<2x16x128xbf16>, vector<2x1x16xf32> -> vector<2x1x16xf32>
    "tpu.trace_stop"() : () -> ()
    %44 = tpu.iota {dimensions = array<i32: 2>} : vector<1x1x16xi32>
    %45 = vector.broadcast %5 : i32 to vector<1x1x16xi32>
    %46 = arith.cmpi eq, %44, %45 : vector<1x1x16xi32>
    %47 = arith.mulf %24, %25 : vector<2x128xf32>
    %cst_30 = arith.constant dense<0.000000e+00> : vector<2xf32>
    %48 = vector.multi_reduction <add>, %47, %cst_30 [1] : vector<2x128xf32> to vector<2xf32>
    %49 = vector.shape_cast %48 : vector<2xf32> to vector<2x1xf32>
    %50 = vector.shape_cast %49 : vector<2x1xf32> to vector<2x1x1xf32>
    %51 = vector.shape_cast %46 : vector<1x1x16xi1> to vector<1x1x16xi1>
    %52 = vector.broadcast %51 : vector<1x1x16xi1> to vector<2x1x16xi1>
    %53 = vector.shape_cast %50 : vector<2x1x1xf32> to vector<2x1x1xf32>
    %54 = vector.broadcast %53 : vector<2x1x1xf32> to vector<2x1x16xf32>
    %55 = arith.select %52, %54, %43 : vector<2x1x16xi1>, vector<2x1x16xf32>
    %cst_31 = arith.constant 0.0883883461 : f32
    %56 = vector.broadcast %cst_31 : f32 to vector<2x1x16xf32>
    %57 = arith.mulf %55, %56 : vector<2x1x16xf32>
    %c0_32 = arith.constant 0 : index
    %c0_33 = arith.constant 0 : index
    %58 = vector.load %arg3[%c0_32, %c0_33] : memref<2x16xf32, #tpu.memory_space<vmem>>, vector<2x16xf32>
    %59 = vector.shape_cast %58 : vector<2x16xf32> to vector<2x1x16xf32>
    %cst_34 = arith.constant 0.000000e+00 : f32
    %60 = vector.broadcast %cst_34 : f32 to vector<2x1x16xf32>
    %61 = arith.cmpf ogt, %59, %60 : vector<2x1x16xf32>
    %cst_35 = arith.constant 0.000000e+00 : f32
    %cst_36 = arith.constant -1.000000e+30 : f32
    %62 = vector.broadcast %cst_35 : f32 to vector<2x1x16xf32>
    %63 = vector.broadcast %cst_36 : f32 to vector<2x1x16xf32>
    %64 = arith.select %61, %62, %63 : vector<2x1x16xi1>, vector<2x1x16xf32>
    %65 = arith.addf %57, %64 : vector<2x1x16xf32>
    %cst_37 = arith.constant dense<0xFF800000> : vector<2x1xf32>
    %66 = vector.multi_reduction <maximumf>, %65, %cst_37 [2] : vector<2x1x16xf32> to vector<2x1xf32>
    %67 = vector.shape_cast %66 : vector<2x1xf32> to vector<2x1x1xf32>
    %68 = vector.broadcast %67 : vector<2x1x1xf32> to vector<2x1x16xf32>
    %69 = arith.subf %65, %68 : vector<2x1x16xf32>
    %70 = math.exp %69 : vector<2x1x16xf32>
    %cst_38 = arith.constant dense<0.000000e+00> : vector<2x1xf32>
    %71 = vector.multi_reduction <add>, %70, %cst_38 [2] : vector<2x1x16xf32> to vector<2x1xf32>
    %72 = vector.shape_cast %71 : vector<2x1xf32> to vector<2x1x1xf32>
    %73 = tpu.reciprocal %72 {approx = true} : vector<2x1x1xf32> -> vector<2x1x1xf32>
    %74 = vector.broadcast %73 : vector<2x1x1xf32> to vector<2x1x16xf32>
    %75 = arith.mulf %70, %74 : vector<2x1x16xf32>
    %76 = arith.truncf %75 : vector<2x1x16xf32> to vector<2x1x16xbf16>
    "tpu.trace_start"() <{level = 10 : i32, message = "bqk,bkd->bqd"}> : () -> ()
    %cst_39 = arith.constant dense<0.000000e+00> : vector<2x1x128xf32>
    %77 = tpu.matmul %76, %40, %cst_39 {dimension_numbers = #tpu.dot_dimension_numbers<[2], [1], [1], [2], [0, 0, 0, 1, 1, 2], [0], [0]>} : vector<2x1x16xbf16>, vector<2x16x128xbf16>, vector<2x1x128xf32> -> vector<2x1x128xf32>
    %cst_40 = arith.constant 0.000000e+00 : f32
    "tpu.trace_stop"() : () -> ()
    %78 = vector.shape_cast %46 : vector<1x1x16xi1> to vector<1x1x16xi1>
    %79 = vector.broadcast %78 : vector<1x1x16xi1> to vector<2x1x16xi1>
    %80 = vector.broadcast %cst_40 : f32 to vector<2x1x16xf32>
    %81 = arith.select %79, %75, %80 : vector<2x1x16xi1>, vector<2x1x16xf32>
    %cst_41 = arith.constant dense<0.000000e+00> : vector<2x1xf32>
    %82 = vector.multi_reduction <add>, %81, %cst_41 [2] : vector<2x1x16xf32> to vector<2x1xf32>
    %83 = vector.shape_cast %82 : vector<2x1xf32> to vector<2x1x1xf32>
    %84 = vector.shape_cast %77 : vector<2x1x128xf32> to vector<2x128xf32>
    %85 = vector.shape_cast %83 : vector<2x1x1xf32> to vector<2x1xf32>
    %86 = vector.broadcast %85 : vector<2x1xf32> to vector<2x128xf32>
    %87 = arith.mulf %86, %26 : vector<2x128xf32>
    %88 = arith.addf %84, %87 : vector<2x128xf32>
    %89 = arith.truncf %88 : vector<2x128xf32> to vector<2x128xbf16>
    %c0_42 = arith.constant 0 : index
    %c0_43 = arith.constant 0 : index
    %c0_44 = arith.constant 0 : index
    %90 = vector.load %arg8[%c0_42, %c0_43, %c0_44] : memref<1x128x128xbf16, #tpu.memory_space<vmem>>, vector<1x128x128xbf16>
    %91 = vector.shape_cast %90 : vector<1x128x128xbf16> to vector<128x128xbf16>
    %cst_45 = arith.constant dense<0.000000e+00> : vector<2x128xf32>
    %92 = tpu.matmul %89, %91, %cst_45 {dimension_numbers = #tpu.dot_dimension_numbers<[1], [0], [0], [1], [0, 0, 1, 1], [], []>} : vector<2x128xbf16>, vector<128x128xbf16>, vector<2x128xf32> -> vector<2x128xf32>
    %93 = arith.addf %4, %92 : vector<2x128xf32>
    %94 = arith.mulf %93, %93 : vector<2x128xf32>
    %cst_46 = arith.constant dense<0.000000e+00> : vector<2xf32>
    %95 = vector.multi_reduction <add>, %94, %cst_46 [1] : vector<2x128xf32> to vector<2xf32>
    %96 = vector.shape_cast %95 : vector<2xf32> to vector<2x1xf32>
    %cst_47 = arith.constant 1.280000e+02 : f32
    %97 = vector.broadcast %cst_47 : f32 to vector<2x1xf32>
    %98 = arith.divf %96, %97 : vector<2x1xf32>
    %cst_48 = arith.constant 9.99999997E-7 : f32
    %99 = vector.broadcast %cst_48 : f32 to vector<2x1xf32>
    %100 = arith.addf %98, %99 : vector<2x1xf32>
    %101 = math.rsqrt %100 : vector<2x1xf32>
    %102 = vector.broadcast %101 : vector<2x1xf32> to vector<2x128xf32>
    %103 = arith.mulf %93, %102 : vector<2x128xf32>
    %c0_49 = arith.constant 0 : index
    %c0_50 = arith.constant 0 : index
    %c0_51 = arith.constant 0 : index
    %104 = vector.load %arg9[%c0_49, %c0_50, %c0_51] : memref<1x1x128xf32, #tpu.memory_space<vmem>>, vector<1x1x128xf32>
    %105 = vector.shape_cast %104 : vector<1x1x128xf32> to vector<1x128xf32>
    %106 = vector.broadcast %105 : vector<1x128xf32> to vector<2x128xf32>
    %107 = arith.mulf %103, %106 : vector<2x128xf32>
    %108 = arith.truncf %107 : vector<2x128xf32> to vector<2x128xbf16>
    %c0_52 = arith.constant 0 : index
    %c0_53 = arith.constant 0 : index
    %c0_54 = arith.constant 0 : index
    %109 = vector.load %arg10[%c0_52, %c0_53, %c0_54] : memref<1x128x256xbf16, #tpu.memory_space<vmem>>, vector<1x128x256xbf16>
    %110 = vector.shape_cast %109 : vector<1x128x256xbf16> to vector<128x256xbf16>
    %cst_55 = arith.constant dense<0.000000e+00> : vector<2x256xf32>
    %111 = tpu.matmul %108, %110, %cst_55 {dimension_numbers = #tpu.dot_dimension_numbers<[1], [0], [0], [1], [0, 0, 1, 1], [], []>} : vector<2x128xbf16>, vector<128x256xbf16>, vector<2x256xf32> -> vector<2x256xf32>
    %112 = arith.negf %111 : vector<2x256xf32>
    %113 = math.exp %112 : vector<2x256xf32>
    %cst_56 = arith.constant 1.000000e+00 : f32
    %114 = vector.broadcast %cst_56 : f32 to vector<2x256xf32>
    %115 = arith.addf %114, %113 : vector<2x256xf32>
    %116 = arith.divf %114, %115 : vector<2x256xf32>
    %117 = arith.mulf %111, %116 : vector<2x256xf32>
    %118 = arith.truncf %117 : vector<2x256xf32> to vector<2x256xbf16>
    %c0_57 = arith.constant 0 : index
    %c0_58 = arith.constant 0 : index
    %c0_59 = arith.constant 0 : index
    %119 = vector.load %arg11[%c0_57, %c0_58, %c0_59] : memref<1x256x128xbf16, #tpu.memory_space<vmem>>, vector<1x256x128xbf16>
    %120 = vector.shape_cast %119 : vector<1x256x128xbf16> to vector<256x128xbf16>
    %cst_60 = arith.constant dense<0.000000e+00> : vector<2x128xf32>
    %121 = tpu.matmul %118, %120, %cst_60 {dimension_numbers = #tpu.dot_dimension_numbers<[1], [0], [0], [1], [0, 0, 1, 1], [], []>} : vector<2x256xbf16>, vector<256x128xbf16>, vector<2x128xf32> -> vector<2x128xf32>
    %122 = arith.addf %93, %121 : vector<2x128xf32>
    %123 = vector.shape_cast %122 : vector<2x128xf32> to vector<2x1x128xf32>
    %c0_61 = arith.constant 0 : index
    %c0_62 = arith.constant 0 : index
    %c0_63 = arith.constant 0 : index
    %124 = vector.load %arg12[%c0_61, %c0_62, %c0_63] : memref<2x1x128xf32, #tpu.memory_space<vmem>>, vector<2x1x128xf32>
    tpu.vector_store %arg12[%c0_61, %c0_62, %c0_63], %123 {strides = array<i32>} : memref<2x1x128xf32, #tpu.memory_space<vmem>>, vector<2x1x128xf32>,
    return
  }
  func.func @transform_0(%arg0: i32, %arg1: memref<1xi32, #tpu.memory_space<smem>>) -> (i32, i32, i32) {
    %c0_i32 = arith.constant 0 : i32
    %c0_i32_0 = arith.constant 0 : i32
    %c0_i32_1 = arith.constant 0 : i32
    %c0_i32_2 = arith.constant 0 : i32
    return %c0_i32, %c0_i32_0, %c0_i32_1 : i32, i32, i32
  }
  func.func @transform_1(%arg0: i32, %arg1: memref<1xi32, #tpu.memory_space<smem>>) -> (i32, i32) {
    %c0_i32 = arith.constant 0 : i32
    %c0_i32_0 = arith.constant 0 : i32
    %c0_i32_1 = arith.constant 0 : i32
    return %c0_i32, %c0_i32_0 : i32, i32
  }
  func.func @transform_2(%arg0: i32, %arg1: memref<1xi32, #tpu.memory_space<smem>>) -> (i32, i32, i32, i32) {
    %c0_i32 = arith.constant 0 : i32
    %c0_i32_0 = arith.constant 0 : i32
    %c0_i32_1 = arith.constant 0 : i32
    %c0_i32_2 = arith.constant 0 : i32
    return %arg0, %c0_i32, %c0_i32_0, %c0_i32_1 : i32, i32, i32, i32
  }
  func.func @transform_3(%arg0: i32, %arg1: memref<1xi32, #tpu.memory_space<smem>>) -> (i32, i32, i32, i32) {
    %c0_i32 = arith.constant 0 : i32
    %c0_i32_0 = arith.constant 0 : i32
    %c0_i32_1 = arith.constant 0 : i32
    %c0_i32_2 = arith.constant 0 : i32
    return %arg0, %c0_i32, %c0_i32_0, %c0_i32_1 : i32, i32, i32, i32
  }
  func.func @transform_4(%arg0: i32, %arg1: memref<1xi32, #tpu.memory_space<smem>>) -> (i32, i32, i32) {
    %c0_i32 = arith.constant 0 : i32
    %c0_i32_0 = arith.constant 0 : i32
    %c0_i32_1 = arith.constant 0 : i32
    return %arg0, %c0_i32, %c0_i32_0 : i32, i32, i32
  }
  func.func @transform_5(%arg0: i32, %arg1: memref<1xi32, #tpu.memory_space<smem>>) -> (i32, i32, i32) {
    %c0_i32 = arith.constant 0 : i32
    %c0_i32_0 = arith.constant 0 : i32
    %c0_i32_1 = arith.constant 0 : i32
    return %arg0, %c0_i32, %c0_i32_0 : i32, i32, i32
  }
  func.func @transform_6(%arg0: i32, %arg1: memref<1xi32, #tpu.memory_space<smem>>) -> (i32, i32, i32) {
    %c0_i32 = arith.constant 0 : i32
    %c0_i32_0 = arith.constant 0 : i32
    %c0_i32_1 = arith.constant 0 : i32
    return %arg0, %c0_i32, %c0_i32_0 : i32, i32, i32
  }
  func.func @transform_7(%arg0: i32, %arg1: memref<1xi32, #tpu.memory_space<smem>>) -> (i32, i32, i32) {
    %c0_i32 = arith.constant 0 : i32
    %c0_i32_0 = arith.constant 0 : i32
    %c0_i32_1 = arith.constant 0 : i32
    return %arg0, %c0_i32, %c0_i32_0 : i32, i32, i32
  }
  func.func @transform_8(%arg0: i32, %arg1: memref<1xi32, #tpu.memory_space<smem>>) -> (i32, i32, i32) {
    %c0_i32 = arith.constant 0 : i32
    %c0_i32_0 = arith.constant 0 : i32
    %c0_i32_1 = arith.constant 0 : i32
    return %arg0, %c0_i32, %c0_i32_0 : i32, i32, i32
  }
  func.func @transform_9(%arg0: i32, %arg1: memref<1xi32, #tpu.memory_space<smem>>) -> (i32, i32, i32) {
    %c0_i32 = arith.constant 0 : i32
    %c0_i32_0 = arith.constant 0 : i32
    %c0_i32_1 = arith.constant 0 : i32
    return %arg0, %c0_i32, %c0_i32_0 : i32, i32, i32
  }
  func.func @transform_10(%arg0: i32, %arg1: memref<1xi32, #tpu.memory_space<smem>>) -> (i32, i32, i32) {
    %c0_i32 = arith.constant 0 : i32
    %c0_i32_0 = arith.constant 0 : i32
    %c0_i32_1 = arith.constant 0 : i32
    %c0_i32_2 = arith.constant 0 : i32
    return %c0_i32, %c0_i32_0, %c0_i32_1 : i32, i32, i32
  }
  func.func @transform_11(%arg0: i32, %arg1: memref<1xi32, #tpu.memory_space<smem>>) -> (i32, i32, i32, i32) {
    %c0_i32 = arith.constant 0 : i32
    %c0_i32_0 = arith.constant 0 : i32
    %c0_i32_1 = arith.constant 0 : i32
    %c0_i32_2 = arith.constant 0 : i32
    return %arg0, %c0_i32, %c0_i32_0, %c0_i32_1 : i32, i32, i32, i32
  }
  func.func @transform_12(%arg0: i32, %arg1: memref<1xi32, #tpu.memory_space<smem>>) -> (i32, i32, i32, i32) {
    %c0_i32 = arith.constant 0 : i32
    %c0_i32_0 = arith.constant 0 : i32
    %c0_i32_1 = arith.constant 0 : i32
    %c0_i32_2 = arith.constant 0 : i32
    return %arg0, %c0_i32, %c0_i32_0, %c0_i32_1 : i32, i32, i32, i32
  }
}

</mosaic_0001>

<bundles_post_ra>
// kernel: _green_forward_impl.3
= control target key start
LH: loop header
LB: loop body
LE: loop exit
PB: predicated region body
PF: predicated region fallthrough
CT: control target
= control target key end

     0   :  { %v261_v1 = vmov 0   ;;  %vm162_vm0 = vcmask 1041408   ;;  %v151_v26 = vlaneseq  ;;  %vm194_vm1 = vcmask 1024   ;;  %s337_s1 = inlined_call_operand.vmem [shape: bf16[128,256], index: 1, kind: input, shape index: {}]   ;;  %s338_s0 = inlined_call_operand.vmem [shape: f32[2,128], index: 0, kind: input, shape index: {}]   ;;  %s339_s2 = inlined_call_operand.vmem [shape: s32[2,1], index: 2, kind: output, shape index: {}]  }
   0x1   :  { %v237_v0 = vld [vmem:[%s337_s1 + $0x74] ss:$8 sps:$4 sm:$0xff]   ;;  %142 = vmatprep.mubr.bf16.mxu0 %v261_v1  ;;  %v239_v2 = vld [vmem:[%s337_s1 + $0x70] ss:$8 sps:$4 sm:$0xff]   ;;  %v240_v3 = vld [vmem:[%s337_s1 + $0x64] ss:$8 sps:$4 sm:$0xff]  }
   0x2   :  { %110 = vmatprep.subr.bf16.mxu0 %v237_v0  ;;  %v242_v4 = vld [vmem:[%s337_s1 + $0x60] ss:$8 sps:$4 sm:$0xff]   ;;  %v243_v5 = vld [vmem:[%s337_s1 + $0x54] ss:$8 sps:$4 sm:$0xff]   ;;  %v245_v6 = vld [vmem:[%s337_s1 + $0x50] ss:$8 sps:$4 sm:$0xff]  }
   0x3   :  { %111 = vmatpush1.bf16.msra.mxu0 %v239_v2  ;;  %v246_v7 = vld [vmem:[%s337_s1 + $0x44] ss:$8 sps:$4 sm:$0xff]   ;;  %v248_v8 = vld [vmem:[%s337_s1 + $0x40] ss:$8 sps:$4 sm:$0xff]   ;;  %v249_v9 = vld [vmem:[%s337_s1 + $0x34] ss:$8 sps:$4 sm:$0xff]  }
   0x4   :  { %112 = vmatprep.subr.bf16.mxu0 %v240_v3  ;;  %v251_v10 = vld [vmem:[%s337_s1 + $0x30] ss:$8 sps:$4 sm:$0xff]   ;;  %v252_v11 = vld [vmem:[%s337_s1 + $0x24] ss:$8 sps:$4 sm:$0xff]   ;;  %v254_v12 = vld [vmem:[%s337_s1 + $0x20] ss:$8 sps:$4 sm:$0xff]  }
   0x5   :  { %v255_v13 = vld [vmem:[%s337_s1 + $0x14] ss:$8 sps:$4 sm:$0xff]   ;;  %v257_v14 = vld [vmem:[%s337_s1 + $0x10] ss:$8 sps:$4 sm:$0xff]   ;;  %v258_v15 = vld [vmem:[%s337_s1 + $0x4] ss:$8 sps:$4 sm:$0xff]  }
   0x6   :  { %v260_v16 = vld [vmem:[%s337_s1] ss:$8 sps:$4 sm:$0xff]   ;;  %v152_v27 = vand.u32 127, %v151_v26 }
   0x7   :  { %113 = vmatpush1.bf16.msra.mxu0 %v242_v4  ;;  %v12_v17 = vld [vmem:[%s338_s0] sm:$0x3] }
   0x8   :  { %114 = vmatprep.subr.bf16.mxu0 %v243_v5  ;;  %v13_v18 = vpack.c.bf16 %v12_v17, %v12_v17  ;;  %v153_v28 = vadd.s32 128, %v152_v27 }
   0xb   :  { %115 = vmatpush1.bf16.msra.mxu0 %v245_v6 }
   0xc   :  { %116 = vmatprep.subr.bf16.mxu0 %v246_v7 }
   0xf   :  { %117 = vmatpush1.bf16.msra.mxu0 %v248_v8 }
  0x10   :  { %118 = vmatprep.subr.bf16.mxu0 %v249_v9 }
  0x13   :  { %119 = vmatpush1.bf16.msra.mxu0 %v251_v10 }
  0x14   :  { %120 = vmatprep.subr.bf16.mxu0 %v252_v11 }
  0x17   :  { %121 = vmatpush1.bf16.msra.mxu0 %v254_v12 }
  0x18   :  { %122 = vmatprep.subr.bf16.mxu0 %v255_v13 }
  0x1b   :  { %123 = vmatpush1.bf16.msra.mxu0 %v257_v14 }
  0x1c   :  { %124 = vmatprep.subr.bf16.mxu0 %v258_v15 }
  0x1f   :  { %125 = vmatpush1.bf16.msra.mxu0 %v260_v16 }
  0x22   :  { %143 = vmatmul.mubr.bf16.vlgmr.msra.gmra.mxu0 %v13_v18 }
  0xe2   :  { %v144_v19 = vpop.f32.mrf.mxu0 }
  0xe3   :  { %v163_v21 = vsel %vm162_vm0, %v144_v19, -inf }
  0xe4   :  { %v146_v20 = vpop.f32.mrf.mxu0 }
  0xe5   :  { %v164_v22 = vsel %vm162_vm0, %v146_v20, -inf }
  0xe6   :  { %v148_v23 = vpop.f32.mrf.mxu0  ;;  %v165_v24 = vmax.f32 %v163_v21, %v164_v22 }
  0xe8   :  { %166 = vmax.xlane.f32.xlu0 %v165_v24  ;;  %v149_v25 = vpop.f32.mrf.mxu0 }
 0x171   :  { %v167_v29 = vpop.xlane.xlu0 %166 }
 0x172   :  { %vm168_vm2 = vcmp.ge.f32.partialorder %v144_v19, %v167_v29  ;;  %vm169_vm3 = vcmp.ge.f32.partialorder %v146_v20, %v167_v29 }
 0x173   :  { %v170_v30 = vsel %vm168_vm2, %v152_v27, 1073741824  ;;  %v171_v31 = vsel %vm169_vm3, %v153_v28, 1073741824 }
 0x174   :  { %v172_v32 = vsel %vm162_vm0, %v170_v30, 2147483647  ;;  %v173_v33 = vsel %vm162_vm0, %v171_v31, 2147483647 }
 0x175   :  { %vm174_vm4 = vcmp.lt.s32.totalorder %v172_v32, %v173_v33 }
 0x176   :  { %v175_v34 = vsel %vm174_vm4, %v172_v32, %v173_v33 }
 0x177   :  { %v177_v35 = vshra.s32 %v175_v34, 16  ;;  %v176_v37 = vand.u32 65535, %v175_v34 }
 0x179   :  { %v179_v36 = vcvt.s32.f32 %v177_v35  ;;  %v178_v39 = vcvt.s32.f32 %v176_v37 }
 0x17b   :  { %180 = vmin.xlane.f32.xlu0 %v179_v36 }
 0x204   :  { %v181_v38 = vpop.xlane.xlu0 %180 }
 0x205   :  { %vm182_vm5 = vcmp.eq.f32.partialorder %v179_v36, %v181_v38  ;;  %v187_v41 = vcvt.f32.s32 %v181_v38 }
 0x206   :  { %v183_v40 = vsel %vm182_vm5, %v178_v39, inf }
 0x207   :  { %184 = vmin.xlane.f32.xlu1 %v183_v40  ;;  %v188_v43 = vshll.u32 %v187_v41, 16 }
 0x290   :  { %v185_v42 = vpop.xlane.xlu1 %184 }
 0x291   :  { %v186_v44 = vcvt.f32.s32 %v185_v42 }
 0x293   :  { %v189_v45 = vadd.s32 %v188_v43, %v186_v44 }
 0x295   :  { %196 = vst.msk [vmem:[#allocation3] sm:$0x3] %vm194_vm1, %v189_v45 }
 0x29c   :  { %v213_v46 = vld [vmem:[#allocation3] sm:$0x3] }
 0x29d   :  { %215 = vst.msk [vmem:[%s339_s2] sm:$0x3] %vm194_vm1, %v213_v46 }

// kernel: _green_forward_impl.2
= control target key start
LH: loop header
LB: loop body
LE: loop exit
PB: predicated region body
PF: predicated region fallthrough
CT: control target
= control target key end

     0   :  { %s2682_s0 = inlined_call_operand.vmem [shape: f32[2,8,128], index: 0, kind: input, shape index: {}]   ;;  %s2683_s1 = inlined_call_operand.vmem [shape: f32[2,8], index: 1, kind: input, shape index: {}]   ;;  %s2684_s2 = inlined_call_operand.vmem [shape: f32[2,1,128], index: 2, kind: input, shape index: {}]   ;;  %s2685_s3 = inlined_call_operand.hbm [shape: bf16[2,128,384], index: 3, kind: input, shape index: {}]   ;;  %s2686_s4 = inlined_call_operand.hbm [shape: bf16[2,128,128], index: 4, kind: input, shape index: {}]   ;;  %s2687_s5 = inlined_call_operand.vmem [shape: f32[2,1,128], index: 5, kind: input, shape index: {}]   ;;  %s2688_s6 = inlined_call_operand.vmem [shape: bf16[2,128,256], index: 6, kind: input, shape index: {}]   ;;  %s2689_s7 = inlined_call_operand.hbm [shape: bf16[2,256,128], index: 7, kind: input, shape index: {}]   ;;  %s2690_s8 = inlined_call_operand.vmem [shape: f32[2,1,128], index: 8, kind: output, shape index: {0}]   ;;  %s2691_s9 = inlined_call_operand.vmem [shape: bf16[2,2,16,128], index: 9, kind: output, shape index: {1}]   ;;  %s2692_s10 = inlined_call_operand.vmem [shape: bf16[2,2,16,128], index: 10, kind: output, shape index: {2}]  }
   0x1   :  { %2700 = sst [smem:[#allocation13_spill]] %s2685_s3 }
   0x2   :  { %2701 = sst [smem:[#allocation14_spill]] %s2686_s4 }
   0x3   :  { %2702 = sst [smem:[#allocation15_spill]] %s2690_s8 }
   0x4   :  { %16 = vsyncpa [#allocation4], 0 }
   0x5   :  { %18 = vsyncpa [#allocation4 + $0x1], 0 }
   0x6   :  { %19 = vsyncpa [#allocation6], 0 }
   0x7   :  { %21 = vsyncpa [#allocation6 + $0x1], 0  ;;  %s2294_s13 = smov 0   ;;  %s2296_s14 = smov 0  }
   0x8   :  { %s2298_s15 = smov 0   ;;  %s2300_s16 = smov 0  }
   0x9 LB: > { %2703 = sst [smem:[#allocation10_spill]] %s2222_s15  ;;  %s2313_s17 = sadd.s32 4294967295, %s2226_s16   ;;  %s2226_s16 = sphi %s2300_s16, %s2717_s16   ;;  %s2222_s15 = sphi %s2298_s15, %s2719_s15   ;;  %s2218_s14 = sphi %s2296_s14, %s2721_s14   ;;  %s2214_s13 = sphi %s2294_s13, %s2720_s13  }
   0xa   : > { %s2316_s18 = sadd.s32 1, %s2226_s16   ;;  %s102_s20 = sadd.s32 1, %s2222_s15 }
   0xb   : > { %2704 = sst [smem:[#allocation11_spill]] %s2316_s18  ;;  %s99_s19 = ssub.s32 %s2226_s16, %s2316_s18 }
   0xc   : > { %p100_p0 = scmp.eq.s32.totalorder %s99_s19, 0  ;;  %p109_p1 = scmp.ne.s32.totalorder %s2222_s15, %s2218_s14 }
   0xd   : > { %p110_p2 = scmp.eq.s32.totalorder %s2226_s16, 0  ;;  %p115_p3 = scmp.ne.s32.totalorder %s2218_s14, %s2214_s13 }
   0xe   : > { %s2326_s21 = scalar_select %p100_p0, %s2222_s15, %s102_s20  }
   0xf   : > { %p111_p4 = por %p110_p2, %p109_p1  ;;  %p116_p5 = scmp.eq.s32.totalorder %s2313_s17, 0 }
  0x10   : > { %2705 = sst [smem:[#allocation12_spill]] %s2326_s21  ;;  %p1951_p6 = scmp.lt.s32.totalorder %s2226_s16, 2 }
  0x11   : > { %p2330_p7 = por %p116_p5, %p115_p3  ;;  %s2335_s23 = sand.u32 1, %s2222_s15  }
  0x12   : > { %p2337_p8 = pnand %p1951_p6, %p111_p4  ;;  %s349_s25 = sand.u32 1, %s2226_s16  }
  0x13   : > { %s2706_s22 = scalar_select %p2330_p7, 1, 0 }
  0x14   : > { %s1723_s26 = sshll.u32 %s2335_s23, 6  ;;  %s1815_s27 = sshll.u32 %s2226_s16, 10 }
  0x15   : > { %s353_s28 = scalar_lea.vmem [#allocation5], %s1723_s26  ;;  %s2708_s4 = sld [smem:[#allocation14_spill]] }
  0x16   : > { %s360_s29 = sshll.u32 %s353_s28, 4  ;;  %s2351_s13 = scalar_lea.sflag [#allocation6], %s349_s25  ;;  %s2349_s29 = int_to_ptr.vmem [resolvable:$true] %s360_s29 }
  0x17   : > { %p2357_p10 = pneg %p2337_p8 }
  0x1b   : > { %s2347_s12 = scalar_lea.hbm %s2708_s4, %s1815_s27  ;;  %s2109_s28 = scalar_lea.hbm %s2708_s4, 2048 }
  0x1c   : > { %s2104_s19 = scalar_lea.hbm %s2347_s12, 1024  ;;  %p2110_p13 = scmp.lt.s32.totalorder %s2347_s12, %s2708_s4 }
  0x1d   : > { %p2105_p9 = scmp.ne.s32.totalorder %s2347_s12, %s2104_s19  ;;  %p2111_p0 = scmp.lt.s32.totalorder %s2109_s28, %s2104_s19 }
  0x1f   : > { %p2107_p11 = pnand %p2357_p10, %p2105_p9  ;;  %p2112_p1 = por %p2111_p0, %p2110_p13 }
  0x21   : > { %p2108_p12 = pneg %p2107_p11 }
  0x23   : > { %p2113_p2 = pnand %p2112_p1, %p2108_p12 }
  0x25   : > { %2116 = shalt.err (!%p2113_p2)
}
  0x26   : > { %s2117_s25 = scalar_lea.vmem %s2349_s29, 1024  ;;  %s2228_s21 = smov [#allocation5]  }
  0x27   : > { %p2118_p3 = scmp.ne.s32.totalorder %s2349_s29, %s2117_s25  ;;  %s2122_s26 = sshll.u32 %s2228_s21, 4  ;;  %s2123_s26 = int_to_ptr.vmem [resolvable:$false] %s2122_s26 }
  0x28   : > { %s2124_s27 = scalar_lea.vmem %s2123_s26, 2048  ;;  %p2125_p6 = scmp.lt.s32.totalorder %s2349_s29, %s2123_s26 }
  0x29   : > { %p2120_p4 = pnand %p2118_p3, %p2357_p10  ;;  %p2126_p9 = scmp.lt.s32.totalorder %s2124_s27, %s2117_s25 }
  0x2b   : > { %p2121_p5 = pneg %p2120_p4  ;;  %p2127_p11 = por %p2126_p9, %p2125_p6 }
  0x2d   : > { %p2128_p7 = pnand %p2127_p11, %p2121_p5 }
  0x2f   : > { %2131 = shalt.err (!%p2128_p7)
}
  0x30   : > { %s2695_s19 = smov 64   ;;  %s2696_s28 = smov 4  }
  0x31   : > { %1947 = dma.hbm_to_vmem [thread:$0]  (!%p2337_p8), %s2347_s12, 1024, %s2349_s29, %s2351_s13, %s2695_s19, %s2695_s19, %s2696_s28  }
  0x32   : > { %p1729_p12 = scmp.ge.s32.totalorder %s2226_s16, 1  ;;  %p403_p13 = scmp.lt.s32.totalorder %s2226_s16, 3 }
  0x33   : > { %s1932_s21 = smul.u32 192, %s2335_s23  ;;  %s2711_s3 = sld [smem:[#allocation13_spill]] }
  0x34   : > { %p2386_p7 = pnand %p1729_p12, %p403_p13  ;;  %s1933_s11 = smul.u32 3072, %s2226_s16 }
  0x35   : > { %s332_s4 = scalar_lea.vmem [#allocation3], %s1932_s21  ;;  %s329_s29 = scalar_lea.sflag [#allocation4], %s2335_s23 }
  0x36   : > { %s2710_s30 = scalar_select %p2386_p7, 1, 0 }
  0x37   : > { %s339_s15 = sshll.u32 %s332_s4, 4  ;;  %s2396_s15 = int_to_ptr.vmem [resolvable:$true] %s339_s15 }
  0x39   : > { %s2394_s27 = scalar_lea.hbm %s2711_s3, %s1933_s11  ;;  %s2137_s18 = scalar_lea.hbm %s2711_s3, 6144 }
  0x3a   : > { %s2132_s12 = scalar_lea.hbm %s2394_s27, 3072  ;;  %p2138_p3 = scmp.lt.s32.totalorder %s2394_s27, %s2711_s3 }
  0x3b   : > { %p2133_p0 = scmp.ne.s32.totalorder %s2394_s27, %s2132_s12  ;;  %p2139_p4 = scmp.lt.s32.totalorder %s2137_s18, %s2132_s12 }
  0x3d   : > { %p2135_p1 = pnand %p2133_p0, %p2357_p10  ;;  %p2140_p5 = por %p2139_p4, %p2138_p3 }
  0x3f   : > { %p2136_p2 = pneg %p2135_p1 }
  0x41   : > { %p2141_p6 = pnand %p2140_p5, %p2136_p2 }
  0x43   : > { %2144 = shalt.err (!%p2141_p6)
}
  0x44   : > { %s2145_s4 = scalar_lea.vmem %s2396_s15, 3072  ;;  %s2231_s21 = smov [#allocation3]  }
  0x45   : > { %p2146_p9 = scmp.ne.s32.totalorder %s2396_s15, %s2145_s4  ;;  %s2150_s19 = sshll.u32 %s2231_s21, 4  ;;  %s2151_s19 = int_to_ptr.vmem [resolvable:$false] %s2150_s19 }
  0x46   : > { %s2152_s28 = scalar_lea.vmem %s2151_s19, 6144  ;;  %p2153_p13 = scmp.lt.s32.totalorder %s2396_s15, %s2151_s19 }
  0x47   : > { %p2148_p11 = pnand %p2146_p9, %p2357_p10  ;;  %p2154_p0 = scmp.lt.s32.totalorder %s2152_s28, %s2145_s4 }
  0x49   : > { %p2149_p12 = pneg %p2148_p11  ;;  %p2155_p1 = por %p2154_p0, %p2153_p13 }
  0x4b   : > { %p2156_p7 = pnand %p2155_p1, %p2149_p12 }
  0x4d   : > { %2159 = shalt.err (!%p2156_p7)
}
  0x4e   : > { %s2232_s18 = smov 192   ;;  %s2233_s26 = smov 12  }
  0x4f   : > { %1944 = dma.hbm_to_vmem [thread:$0]  (!%p2337_p8), %s2394_s27, 3072, %s2396_s15, %s329_s29, %s2232_s18, %s2232_s18, %s2233_s26  }
  0x50   : > { %s1726_s12 = sshll.u32 %s2335_s23, 7  ;;  %s1816_s25 = sshll.u32 %s2226_s16, 11 }
  0x51   : > { %s2426_s4 = scalar_lea.hbm %s2689_s7, %s1816_s25  ;;  %s388_s19 = scalar_lea.vmem [#allocation7], %s1726_s12 }
  0x52   : > { %s395_s28 = sshll.u32 %s388_s19, 4  ;;  %s2160_s3 = scalar_lea.hbm %s2426_s4, 2048  ;;  %s396_s28 = int_to_ptr.vmem [resolvable:$true] %s395_s28 }
  0x53   : > { %p2161_p7 = scmp.ne.s32.totalorder %s2426_s4, %s2160_s3  ;;  %s2165_s16 = scalar_lea.hbm %s2689_s7, 4096 }
  0x54   : > { %p2166_p4 = scmp.lt.s32.totalorder %s2426_s4, %s2689_s7  ;;  %p2167_p5 = scmp.lt.s32.totalorder %s2165_s16, %s2160_s3 }
  0x55   : > { %p2163_p2 = pnand %p2161_p7, %p2357_p10 }
  0x56   : > { %p2168_p6 = por %p2167_p5, %p2166_p4 }
  0x57   : > { %p2164_p3 = pneg %p2163_p2 }
  0x59   : > { %p2169_p9 = pnand %p2168_p6, %p2164_p3 }
  0x5b   : > { %2172 = shalt.err (!%p2169_p9)
}
  0x5c   : > { %s2173_s29 = scalar_lea.vmem %s396_s28, 2048  ;;  %s2234_s18 = smov [#allocation7]  }
  0x5d   : > { %p2174_p11 = scmp.ne.s32.totalorder %s396_s28, %s2173_s29  ;;  %s2178_s26 = sshll.u32 %s2234_s18, 4  ;;  %s2179_s26 = int_to_ptr.vmem [resolvable:$false] %s2178_s26 }
  0x5e   : > { %s2180_s12 = scalar_lea.vmem %s2179_s26, 4096  ;;  %p2181_p0 = scmp.lt.s32.totalorder %s396_s28, %s2179_s26 }
  0x5f   : > { %p2176_p12 = pnand %p2174_p11, %p2357_p10  ;;  %p2182_p1 = scmp.lt.s32.totalorder %s2180_s12, %s2173_s29 }
  0x61   : > { %p2177_p13 = pneg %p2176_p12  ;;  %p2183_p7 = por %p2182_p1, %p2181_p0 }
  0x63   : > { %p2184_p2 = pnand %p2183_p7, %p2177_p13 }
  0x65   : > { %2187 = shalt.err (!%p2184_p2)
}
  0x66   : > { %s2712_s3 = smov 4   ;;  %s2713_s8 = smov 64  }
  0x67   : > { %1950 = dma.hbm_to_vmem [thread:$0]  (!%p2337_p8), %s2426_s4, 2048, %s396_s28, %s2351_s13, %s2713_s8, %s2713_s8, %s2712_s3  }
  0x68   : > { %p2714_p10 = scmp.ne.s32.totalorder %s2710_s30, 0 }
  0x69   : > { %s409_s20 = sand.u32 (!%p2714_p10), 1, %s2218_s14   ;;  %p2715_p3 = scmp.ne.s32.totalorder (!%p2714_p10), %s2706_s22, 0 }
  0x6a   : > { %407 = sbr.rel (%p2714_p10) target bundleno = 2021 (0x7e5), region = 52  ;;  %s410_s11 = scalar_lea.sflag (!%p2714_p10), [#allocation4], %s409_s20 }
  0x6b   : > { %s1934_s25 = smul.u32 (!%p2714_p10), 192, %s409_s20 }
  0x6d   : > { %s2451_s21 = scalar_lea.vmem (!%p2714_p10), [#allocation3], %s1934_s25 }
  0x6f   : > { %2205 = dma.done.wait (%p2715_p3), %s410_s11, 3072  }
  0x70   : > { %2207 = vsyncadd (%p2715_p3), %s410_s11, 4294964224  ;;  %s418_s24 = sand.u32 1, %s2313_s17   ;;  %s1730_s19 = sshll.u32 %s409_s20, 6 }
  0x71   : > { %s419_s13 = scalar_lea.sflag [#allocation6], %s418_s24  ;;  %s2458_s4 = scalar_lea.vmem [#allocation5], %s1730_s19 }
  0x72   : > { %2209 = dma.done.wait (%p2715_p3), %s419_s13, 3072  }
  0x73   : > { %2211 = vsyncadd (%p2715_p3), %s419_s13, 4294964224  ;;  %s1731_s30 = sshll.u32 %s409_s20, 7  ;;  %p494_p8 = scmp.lt.s32.totalorder %s2313_s17, 1 }
  0x74   : > { %s2493_s15 = scalar_lea.vmem [#allocation7], %s1731_s30  ;;  %p1738_p4 = scmp.ne.s32.totalorder %s2313_s17, 0 }
  0x75   : > { %s2466_s28 = scalar_select %p494_p8, %s2313_s17, 1 }
  0x76   : > { %519 = sbr.rel (%p1738_p4) target bundleno = 125 (0x7d), region = 68 }
  0x77   : > { %s496_s23 = scalar_lea.vmem %s2684_s2, %s2466_s28  ;;  %s499_s18 = scalar_lea.vmem %s2687_s5, %s2466_s28 }
  0x78   : > { %s1817_s22 = sshll.u32 %s2466_s28, 7  ;;  %s1818_s26 = sshll.u32 %s2466_s28, 4 }
  0x79   : > { %s2481_s8 = scalar_lea.vmem %s2688_s6, %s1817_s22  ;;  %s2486_s11 = scalar_lea.vmem %s2691_s9, %s1818_s26 }
  0x7a   : > { %s2491_s13 = scalar_lea.vmem %s2692_s10, %s1818_s26 }
  0x7b   : > { %v520_v0 = vld [vmem:[%s2682_s0] sm:$0xff]  ;;  %v521_v1 = vld [vmem:[%s2682_s0 + $0x8] sm:$0xff] }
  0x7c   : > { %522 = vst [vmem:[#allocation2] sm:$0xff] %v520_v0  ;;  %523 = vst [vmem:[#allocation2 + $0x8] sm:$0xff] %v521_v1 }
  0x7d PF: > { %v1992_v5 = vld [vmem:[%s2451_s21 + $0xac] ss:$12 sps:$4 sm:$0xff]   ;;  %v2235_v6 = vmov 0.0   ;;  %v1994_v7 = vld [vmem:[%s2451_s21 + $0xa8] ss:$12 sps:$4 sm:$0xff]   ;;  %v2236_v26 = vmov 0   ;;  %v891_v62 = vlaneseq }
  0x7e   : > { %1868 = vmatprep.subr.bf16.mxu1 %v2235_v6  ;;  %v1995_v8 = vld [vmem:[%s2451_s21 + $0xb0] ss:$12 sps:$4 sm:$0xff]   ;;  %711 = vmatprep.subr.bf16.mxu0 %v1992_v5  ;;  %v1996_v10 = vld [vmem:[%s2451_s21 + $0x94] ss:$12 sps:$4 sm:$0xff]   ;;  %v1999_v12 = vld [vmem:[%s2451_s21 + $0x98] ss:$12 sps:$4 sm:$0xff]  }
  0x7f   : > { %712 = vmatpush1.bf16.msra.mxu0 %v1994_v7  ;;  %1869 = vmatpush3.bf16.msra.mxu1 %v1995_v8  ;;  %v1998_v11 = vld [vmem:[%s2451_s21 + $0x90] ss:$12 sps:$4 sm:$0xff]   ;;  %v2002_v14 = vld [vmem:[%s2451_s21 + $0x78] ss:$12 sps:$4 sm:$0xff]   ;;  %v2003_v15 = vld [vmem:[%s2451_s21 + $0x80] ss:$12 sps:$4 sm:$0xff]  }
  0x80   : > { %1870 = vmatprep.subr.bf16.mxu1 %v2235_v6  ;;  %713 = vmatprep.subr.bf16.mxu0 %v1996_v10  ;;  %v2000_v13 = vld [vmem:[%s2451_s21 + $0x7c] ss:$12 sps:$4 sm:$0xff]   ;;  %v2004_v16 = vld [vmem:[%s2451_s21 + $0x64] ss:$12 sps:$4 sm:$0xff]   ;;  %v2006_v17 = vld [vmem:[%s2451_s21 + $0x60] ss:$12 sps:$4 sm:$0xff]  }
  0x81   : > { %v2007_v18 = vld [vmem:[%s2451_s21 + $0x68] ss:$12 sps:$4 sm:$0xff]   ;;  %v2008_v19 = vld [vmem:[%s2451_s21 + $0x4c] ss:$12 sps:$4 sm:$0xff]   ;;  %v2011_v21 = vld [vmem:[%s2451_s21 + $0x50] ss:$12 sps:$4 sm:$0xff]   ;;  %743 = vmatprep.mubr.bf16.mxu0 %v2236_v26 }
  0x82   : > { %v2010_v20 = vld [vmem:[%s2451_s21 + $0x48] ss:$12 sps:$4 sm:$0xff]   ;;  %v2014_v23 = vld [vmem:[%s2451_s21 + $0x30] ss:$12 sps:$4 sm:$0xff]   ;;  %v2015_v24 = vld [vmem:[%s2451_s21 + $0x38] ss:$12 sps:$4 sm:$0xff]  }
  0x83   : > { %v2502_v2 = vld [vmem:[#allocation2] sm:$0xff]  ;;  %v2504_v3 = vld [vmem:[#allocation2 + $0x8] sm:$0xff]  ;;  %714 = vmatpush1.bf16.msra.mxu0 %v1998_v11  ;;  %1871 = vmatpush3.bf16.msra.mxu1 %v1999_v12  ;;  %803 = vst [vmem:[%s2486_s11 + $0x4] sm:$0xf] %v2236_v26  ;;  %804 = vst [vmem:[%s2486_s11 + $0xc] sm:$0xf] %v2236_v26 }
  0x84   : > { %v526_v4 = vmul.f32 %v2502_v2, %v2502_v2  ;;  %v527_v9 = vmul.f32 %v2504_v3, %v2504_v3  ;;  %1872 = vmatprep.subr.bf16.mxu1 %v2235_v6  ;;  %715 = vmatprep.subr.bf16.mxu0 %v2000_v13  ;;  %v2012_v22 = vld [vmem:[%s2451_s21 + $0x34] ss:$12 sps:$4 sm:$0xff]   ;;  %v2016_v25 = vld [vmem:[%s2451_s21 + $0x1c] ss:$12 sps:$4 sm:$0xff]   ;;  %805 = vst [vmem:[%s2491_s13 + $0x4] sm:$0xf] %v2236_v26 }
  0x85   : > { %806 = vst [vmem:[%s2491_s13 + $0xc] sm:$0xf] %v2236_v26  ;;  %v2018_v27 = vld [vmem:[%s2451_s21 + $0x18] ss:$12 sps:$4 sm:$0xff]   ;;  %v2019_v28 = vld [vmem:[%s2451_s21 + $0x20] ss:$12 sps:$4 sm:$0xff]  }
  0x86   : > { %528 = vadd.xlane.f32.xlu0 %v526_v4  ;;  %vm2237_vm0 = vmmov 0   ;;  %v2020_v29 = vld [vmem:[%s2451_s21 + $0x4] ss:$12 sps:$4 sm:$0xff]   ;;  %v2022_v30 = vld [vmem:[%s2451_s21] ss:$12 sps:$4 sm:$0xff]   ;;  %vm970_vm1 = vcmask 1043456  }
  0x87   : > { %716 = vmatpush1.bf16.msra.mxu0 %v2002_v14  ;;  %1873 = vmatpush3.bf16.msra.mxu1 %v2003_v15  ;;  %v2023_v31 = vld [vmem:[%s2451_s21 + $0x8] ss:$12 sps:$4 sm:$0xff]   ;;  %v1739_v41 = vld [vmem:[%s496_s23] ss:$0 sm:$0xff]  ;;  %v2238_v63 = vmov 1966171168  }
  0x88   : > { %1874 = vmatprep.subr.bf16.mxu1 %v2235_v6  ;;  %717 = vmatprep.subr.bf16.mxu0 %v2004_v16  ;;  %v907_v0 = vunpack.c.l.s4 %v2238_v63  ;;  %v892_v1 = vshrl.u32 %v891_v62, 7  ;;  %v1764_v7 = vld.sshfl [vmem:[%s2683_s1] sm:$0x11 pattern:$0x75316420]  ;;  %v894_v13 = vand.u32 127, %v891_v62 }
  0x89   : > { %1884 = vmatprep.mubr.msk.bf16.mxu1 %vm2237_vm0, %v2235_v6  ;;  %vm942_vm7 = vcmask 64512   ;;  %p1812_p5 = scmp.ne.s32.totalorder %s2313_s17, 1 }
  0x8a   : > { %530 = vadd.xlane.f32.xlu0 %v527_v9  ;;  %v908_v4 = vunpack.c.0.s8 %v907_v0  ;;  %v905_v9 = vcombine.high %v1764_v7, %v1764_v7  ;;  %v930_v10 = vsub.s32 0, %v892_v1  ;;  %vm895_vm4 = vcmp.le.s32.totalorder %v894_v13, %v892_v1  ;;  %s2716_s3 = sld [smem:[#allocation15_spill]] (!%p1812_p5) }
  0x8b   : > { %718 = vmatpush1.bf16.msra.mxu0 %v2006_v17  ;;  %1875 = vmatpush3.bf16.msra.mxu1 %v2007_v18 }
  0x8c   : > { %719 = vmatprep.subr.bf16.mxu0 %v2008_v19  ;;  %1876 = vmatprep.subr.bf16.mxu1 %v2235_v6  ;;  %v911_v5 = vsub.s32 %v908_v4, %v892_v1  ;;  %v2032_v4 = vld [vmem:[%s2481_s8 + $0x70] ss:$8 sps:$4 sm:$0xff]  }
  0x8e   : > { %v912_v8 = vrot.slane %v1764_v7, %v911_v5  ;;  %v919_v12 = vrot.slane %v905_v9, %v911_v5  ;;  %v2034_v5 = vld [vmem:[%s2481_s8 + $0x74] ss:$8 sps:$4 sm:$0xff]  }
  0x8f   : > { %720 = vmatpush1.bf16.msra.mxu0 %v2010_v20  ;;  %1877 = vmatpush3.bf16.msra.mxu1 %v2011_v21 }
  0x90   : > { %721 = vmatprep.subr.bf16.mxu0 %v2012_v22  ;;  %1878 = vmatprep.subr.bf16.mxu1 %v2235_v6  ;;  %vm922_vm2 = vcmp.gt.f32.partialorder %v912_v8, 0.0  ;;  %vm923_vm3 = vcmp.gt.f32.partialorder %v919_v12, 0.0 }
  0x91   : > { %v926_v11 = vsel %vm922_vm2, 1, %v2236_v26  ;;  %v927_v15 = vsel %vm923_vm3, 1, %v2236_v26 }
  0x92   : > { %v931_v14 = vrot.slane %v926_v11, %v930_v10  ;;  %v935_v18 = vrot.slane %v927_v15, %v930_v10  ;;  %v2040_v15 = vld [vmem:[%s2481_s8 + $0x54] ss:$8 sps:$4 sm:$0xff]  }
  0x93   : > { %722 = vmatpush1.bf16.msra.mxu0 %v2014_v23  ;;  %1879 = vmatpush3.bf16.msra.mxu1 %v2015_v24 }
  0x94   : > { %723 = vmatprep.subr.bf16.mxu0 %v2016_v25  ;;  %1880 = vmatprep.subr.bf16.mxu1 %v2235_v6  ;;  %vm936_vm5 = vcmp.eq.s32.totalorder %v931_v14, 1  ;;  %vm937_vm8 = vcmp.eq.s32.totalorder %v935_v18, 1  ;;  %v2035_v14 = vld [vmem:[%s2481_s8 + $0x60] ss:$8 sps:$4 sm:$0xff]   ;;  %v2046_v18 = vld [vmem:[%s2481_s8 + $0x34] ss:$8 sps:$4 sm:$0xff]  }
  0x95   : > { %vm938_vm6 = vmand %vm895_vm4, %vm936_vm5 }
  0x96   : > { %vm939_vm9 = vmand %vm895_vm4, %vm937_vm8 }
  0x97   : > { %724 = vmatpush1.bf16.msra.mxu0 %v2018_v27  ;;  %1881 = vmatpush3.bf16.msra.mxu1 %v2019_v28 }
  0x98   : > { %725 = vmatprep.subr.bf16.mxu0 %v2020_v29  ;;  %1882 = vmatprep.subr.bf16.mxu1 %v2235_v6 }
  0x9b   : > { %726 = vmatpush1.bf16.msra.mxu0 %v2022_v30  ;;  %1883 = vmatpush3.bf16.msra.mxu1 %v2023_v31 }
  0x9c   : > { %1888 = vmatprep.subr.bf16.mxu1 %v2235_v6  ;;  %1912 = vmatprep.subr.bf16.mxu0 %v2235_v6 }
 0x10f   : > { %v529_v32 = vpop.xlane.xlu0 %528 }
 0x110   : > { %v533_v33 = vmul.f32 0.0078125, %v529_v32 }
 0x112   : > { %v535_v34 = vadd.f32 1e-06, %v533_v33 }
 0x113   : > { %v531_v35 = vpop.xlane.xlu0 %530 }
 0x114   : > { %2072 = vrsqrt.f32 %v535_v34  ;;  %v534_v36 = vmul.f32 0.0078125, %v531_v35 }
 0x116   : > { %v536_v37 = vadd.f32 1e-06, %v534_v36 }
 0x118   : > { %2074 = vrsqrt.f32 %v536_v37 }
 0x121   : > { %v2073_v38 = vpop.eup %2072 }
 0x122   : > { %v539_v39 = vmul.f32 %v2073_v38, %v2502_v2 }
 0x124   : > { %v548_v43 = vmul.f32 %v1739_v41, %v539_v39 }
 0x125   : > { %v2075_v40 = vpop.eup %2074 }
 0x126   : > { %v540_v42 = vmul.f32 %v2075_v40, %v2504_v3 }
 0x128   : > { %v549_v44 = vmul.f32 %v1739_v41, %v540_v42  ;;  %v2024_v42 = vld [vmem:[%s2458_s4 + $0x38] sm:$0xff]  }
 0x12a   : > { %v550_v45 = vpack.c.bf16 %v549_v44, %v548_v43  ;;  %v2025_v43 = vld [vmem:[%s2458_s4 + $0x30] sm:$0xff]   ;;  %v2026_v44 = vld [vmem:[%s2458_s4 + $0x28] sm:$0xff]  }
 0x12c   : > { %744 = vmatmul.mubr.bf16.vlgmr.msra.gmra.mxu0 %v550_v45  ;;  %1885 = vmatmul.mubr.bf16.vlgmr.msra.gmra.mxu1 %v550_v45  ;;  %v2027_v45 = vld [vmem:[%s2458_s4 + $0x20] sm:$0xff]  }
 0x12d   : > { %1890 = vmatprep.mubr.msk.bf16.mxu1 %vm2237_vm0, %v2235_v6  ;;  %1928 = vmatprep.mubr.msk.bf16.mxu0 %vm2237_vm0, %v2235_v6 }
 0x12e   : > { %1913 = vmatpush3.bf16.msra.mxu0 %v2024_v42  ;;  %v2057_v42 = vld [vmem:[%s2493_s15 + $0x38] sm:$0xff]  }
 0x12f   : > { %1914 = vmatprep.subr.bf16.mxu0 %v2235_v6 }
 0x132   : > { %1915 = vmatpush3.bf16.msra.mxu0 %v2025_v43  ;;  %v2058_v43 = vld [vmem:[%s2493_s15 + $0x70] sm:$0xff]  }
 0x133   : > { %1916 = vmatprep.subr.bf16.mxu0 %v2235_v6 }
 0x136   : > { %1917 = vmatpush3.bf16.msra.mxu0 %v2026_v44  ;;  %v2059_v44 = vld [vmem:[%s2493_s15 + $0x30] sm:$0xff]  }
 0x137   : > { %1918 = vmatprep.subr.bf16.mxu0 %v2235_v6 }
 0x13a   : > { %1919 = vmatpush3.bf16.msra.mxu0 %v2027_v45  ;;  %v2060_v45 = vld [vmem:[%s2493_s15 + $0x68] sm:$0xff]  }
 0x13b   : > { %1920 = vmatprep.subr.bf16.mxu0 %v2235_v6 }
 0x1ec   : > { %v745_v46 = vpop.f32.mrf.mxu0  ;;  %v788_v47 = vpop.f32.mrf.mxu1 }
 0x1ed   : > { %v797_v48 = vpack.c.bf16 %v788_v47, %v788_v47  ;;  %v807_v59 = vpack.c.bf16 %v745_v46, %v745_v46  ;;  %v2028_v46 = vld [vmem:[%s2458_s4 + $0x18] sm:$0xff]  }
 0x1ee   : > { %v747_v49 = vpop.f32.mrf.mxu0  ;;  %v1886_v50 = vpop.f32.mrf.mxu1  ;;  %1921 = vmatpush3.bf16.msra.mxu0 %v2028_v46  ;;  %v2061_v46 = vld [vmem:[%s2493_s15 + $0x28] sm:$0xff]  }
 0x1ef   : > { %801 = vst [vmem:[%s2491_s13] sm:$0xf] %v797_v48  ;;  %v795_v51 = vpack.c.bf16 %v747_v49, %v747_v49  ;;  %v972_v61 = vsel %vm970_vm1, %v797_v48, 0  ;;  %1922 = vmatprep.subr.bf16.mxu0 %v2235_v6 }
 0x1f0   : > { %v749_v52 = vpop.f32.mrf.mxu0  ;;  %v791_v53 = vpop.f32.mrf.mxu1 }
 0x1f1   : > { %799 = vst [vmem:[%s2486_s11] sm:$0xf] %v795_v51  ;;  %v798_v54 = vpack.c.bf16 %v791_v53, %v791_v53  ;;  %1889 = vmatpush3.bf16.xpose.msra.mxu1 %v795_v51  ;;  %v808_v60 = vpack.c.bf16 %v749_v52, %v749_v52 }
 0x1f2   : > { %v751_v55 = vpop.f32.mrf.mxu0  ;;  %v1887_v56 = vpop.f32.mrf.mxu1  ;;  %1894 = vmatprep.subr.bf16.mxu1 %v2235_v6 }
 0x1f3   : > { %802 = vst [vmem:[%s2491_s13 + $0x8] sm:$0xf] %v798_v54  ;;  %v2570_v57 = vsel %vm970_vm1, %v798_v54, 0  ;;  %v796_v58 = vpack.c.bf16 %v751_v55, %v751_v55  ;;  %v2029_v55 = vld [vmem:[%s2458_s4 + $0x10] sm:$0xff]   ;;  %v2030_v56 = vld [vmem:[%s2458_s4 + $0x8] sm:$0xff]  }
 0x1f4   : > { %1923 = vmatpush3.bf16.msra.mxu0 %v2029_v55  ;;  %v2070_v55 = vld [vmem:[%s2493_s15 + $0x40] sm:$0xff]  }
 0x1f5   : > { %800 = vst [vmem:[%s2486_s11 + $0x8] sm:$0xf] %v796_v58  ;;  %1924 = vmatprep.subr.bf16.mxu0 %v2235_v6 }
 0x1f8   : > { %1891 = vmatmul.mubr.bf16.vlgmr.msra.gmra.mxu1 %v807_v59  ;;  %1925 = vmatpush3.bf16.msra.mxu0 %v2030_v56  ;;  %v2071_v56 = vld [vmem:[%s2493_s15] sm:$0xff]  }
 0x1f9   : > { %1895 = vmatpush3.bf16.xpose.msra.mxu1 %v796_v58  ;;  %1896 = vmatprep.mubr.msk.bf16.mxu1 %vm2237_vm0, %v2235_v6 }
 0x1fa   : > { %1900 = vmatprep.subr.bf16.mxu1 %v2235_v6  ;;  %1926 = vmatprep.subr.bf16.mxu0 %v2235_v6 }
 0x200   : > { %1897 = vmatmul.mubr.bf16.vlgmr.msra.gmra.mxu1 %v808_v60 }
 0x201   : > { %1901 = vmatpush3.bf16.msra.mxu1 %v972_v61  ;;  %1902 = vmatprep.mubr.msk.bf16.mxu1 %vm2237_vm0, %v2235_v6 }
 0x202   : > { %1906 = vmatprep.subr.bf16.mxu1 %v2235_v6 }
 0x2b8   : > { %v843_v16 = vpop.f32.mrf.mxu1 }
 0x2b9   : > { %v889_v17 = vmul.f32 0.088388346, %v843_v16  ;;  %v2038_v16 = vld [vmem:[%s2481_s8 + $0x50] ss:$8 sps:$4 sm:$0xff]  }
 0x2ba   : > { %v1892_v19 = vpop.f32.mrf.mxu1 }
 0x2bb   : > { %v940_v20 = vsel %vm938_vm6, %v889_v17, -1e+30  ;;  %v2041_v17 = vld [vmem:[%s2481_s8 + $0x40] ss:$8 sps:$4 sm:$0xff]   ;;  %v2044_v19 = vld [vmem:[%s2481_s8 + $0x30] ss:$8 sps:$4 sm:$0xff]  }
 0x2bc   : > { %v846_v21 = vpop.f32.mrf.mxu1  ;;  %v943_v22 = vsel %vm942_vm7, %v940_v20, -inf }
 0x2bd   : > { %944 = vmax.xlane.f32.xlu1 %v943_v22  ;;  %v2047_v21 = vld [vmem:[%s2481_s8 + $0x20] ss:$8 sps:$4 sm:$0xff]   ;;  %v2052_v22 = vld [vmem:[%s2481_s8 + $0x14] ss:$8 sps:$4 sm:$0xff]  }
 0x2be   : > { %v1893_v23 = vpop.f32.mrf.mxu1 }
 0x2bf   : > { %v2050_v23 = vld [vmem:[%s2481_s8 + $0x10] ss:$8 sps:$4 sm:$0xff]  }
 0x2c0   : > { %v883_v24 = vpop.f32.mrf.mxu1 }
 0x2c1   : > { %v890_v25 = vmul.f32 0.088388346, %v883_v24  ;;  %v2055_v24 = vld [vmem:[%s2481_s8 + $0x4] ss:$8 sps:$4 sm:$0xff]  }
 0x2c2   : > { %v1898_v27 = vpop.f32.mrf.mxu1 }
 0x2c3   : > { %v941_v28 = vsel %vm939_vm9, %v890_v25, -1e+30  ;;  %v2053_v25 = vld [vmem:[%s2481_s8] ss:$8 sps:$4 sm:$0xff]  }
 0x2c4   : > { %v886_v29 = vpop.f32.mrf.mxu1  ;;  %v946_v30 = vsel %vm942_vm7, %v941_v28, -inf }
 0x2c5   : > { %947 = vmax.xlane.f32.xlu1 %v946_v30 }
 0x2c6   : > { %v1899_v31 = vpop.f32.mrf.mxu1 }
 0x346   : > { %v945_v32 = vpop.xlane.xlu1 %944 }
 0x347   : > { %v949_v33 = vsub.f32 %v940_v20, %v945_v32  ;;  %v2049_v20 = vld [vmem:[%s2481_s8 + $0x24] ss:$8 sps:$4 sm:$0xff]  }
 0x349   : > { %v951_v34 = vmul.f32 1.442695, %v949_v33 }
 0x34b   : > { %2076 = vpow2.f32 %v951_v34 }
 0x34e   : > { %v948_v35 = vpop.xlane.xlu1 %947 }
 0x34f   : > { %v950_v36 = vsub.f32 %v941_v28, %v948_v35 }
 0x351   : > { %v953_v37 = vmul.f32 1.442695, %v950_v36  ;;  %v1775_v36 = vld [vmem:[%s499_s18] ss:$0 sm:$0xff] }
 0x353   : > { %2078 = vpow2.f32 %v953_v37 }
 0x358   : > { %v2077_v38 = vpop.eup %2076 }
 0x359   : > { %v955_v39 = vsel %vm942_vm7, %v2077_v38, 0.0 }
 0x35a   : > { %956 = vadd.xlane.f32.xlu0 %v955_v39 }
 0x360   : > { %v2079_v40 = vpop.eup %2078 }
 0x361   : > { %v958_v41 = vsel %vm942_vm7, %v2079_v40, 0.0 }
 0x362   : > { %959 = vadd.xlane.f32.xlu1 %v958_v41  ;;  %v2056_v41 = vld [vmem:[%s2493_s15 + $0x78] sm:$0xff]  }
 0x3e3   : > { %v957_v47 = vpop.xlane.xlu0 %956 }
 0x3e4   : > { %2080 = vrcp.f32 %v957_v47  ;;  %v2062_v47 = vld [vmem:[%s2493_s15 + $0x60] sm:$0xff]  }
 0x3eb   : > { %v960_v48 = vpop.xlane.xlu1 %959 }
 0x3ec   : > { %2082 = vrcp.f32 %v960_v48  ;;  %v2063_v48 = vld [vmem:[%s2493_s15 + $0x20] sm:$0xff]  }
 0x3f1   : > { %v2081_v49 = vpop.eup %2080 }
 0x3f2   : > { %v963_v50 = vmul.f32 %v2081_v49, %v2077_v38  ;;  %v2064_v49 = vld [vmem:[%s2493_s15 + $0x58] sm:$0xff]  }
 0x3f4   : > { %v965_v51 = vpack.c.bf16 %v963_v50, %v963_v50  ;;  %v2065_v50 = vld [vmem:[%s2493_s15 + $0x18] sm:$0xff]  }
 0x3f6   : > { %1903 = vmatmul.mubr.msk.bf16.vlgmr.msra.gmra.mxu1 %vm942_vm7, %v965_v51  ;;  %v2066_v51 = vld [vmem:[%s2493_s15 + $0x50] sm:$0xff]  }
 0x3f7   : > { %1907 = vmatpush3.bf16.msra.mxu1 %v2570_v57  ;;  %1908 = vmatprep.mubr.msk.bf16.mxu1 %vm2237_vm0, %v2235_v6  ;;  %v2031_v57 = vld [vmem:[%s2458_s4] sm:$0xff]  }
 0x3f8   : > { %1927 = vmatpush3.bf16.msra.mxu0 %v2031_v57  ;;  %1288 = vmatprep.subr.bf16.mxu1 %v2034_v5 }
 0x3f9   : > { %v2083_v52 = vpop.eup %2082  ;;  %1846 = vmatprep.subr.bf16.mxu0 %v2056_v41 }
 0x3fa   : > { %v964_v53 = vmul.f32 %v2083_v52, %v2079_v40  ;;  %v2067_v52 = vld [vmem:[%s2493_s15 + $0x10] sm:$0xff]  }
 0x3fc   : > { %v966_v54 = vpack.c.bf16 %v964_v53, %v964_v53  ;;  %v2068_v53 = vld [vmem:[%s2493_s15 + $0x48] sm:$0xff]  }
 0x3fe   : > { %1909 = vmatmul.mubr.msk.bf16.vlgmr.msra.gmra.mxu1 %vm942_vm7, %v966_v54  ;;  %v2069_v54 = vld [vmem:[%s2493_s15 + $0x8] sm:$0xff]  }
 0x3ff   : > { %1320 = vmatprep.mubr.bf16.mxu1 %v2236_v26  ;;  %1289 = vmatpush1.bf16.msra.mxu1 %v2032_v4 }
 0x4b6   : > { %v1008_v58 = vpop.f32.mrf.mxu1 }
 0x4b8   : > { %v1904_v59 = vpop.f32.mrf.mxu1 }
 0x4ba   : > { %v1011_v60 = vpop.f32.mrf.mxu1 }
 0x4bc   : > { %v1905_v61 = vpop.f32.mrf.mxu1 }
 0x4be   : > { %v1054_v62 = vpop.f32.mrf.mxu1 }
 0x4bf   : > { %v1060_v63 = vpack.c.bf16 %v1054_v62, %v1008_v58 }
 0x4c0   : > { %v1910_v0 = vpop.f32.mrf.mxu1 }
 0x4c1   : > { %1929 = vmatmul.mubr.bf16.vlgmr.msra.gmra.mxu0 %v1060_v63 }
 0x4c2   : > { %v1057_v26 = vpop.f32.mrf.mxu1  ;;  %1847 = vmatpush3.bf16.msra.mxu0 %v2057_v42 }
 0x4c3   : > { %1848 = vmatprep.subr.bf16.mxu0 %v2058_v43 }
 0x4c4   : > { %v1911_v1 = vpop.f32.mrf.mxu1 }
 0x4c6   : > { %1849 = vmatpush3.bf16.msra.mxu0 %v2059_v44 }
 0x4c7   : > { %1850 = vmatprep.subr.bf16.mxu0 %v2060_v45 }
 0x4ca   : > { %1851 = vmatpush3.bf16.msra.mxu0 %v2061_v46 }
 0x4cb   : > { %1852 = vmatprep.subr.bf16.mxu0 %v2062_v47 }
 0x4ce   : > { %1853 = vmatpush3.bf16.msra.mxu0 %v2063_v48 }
 0x4cf   : > { %1854 = vmatprep.subr.bf16.mxu0 %v2064_v49 }
 0x4d2   : > { %1855 = vmatpush3.bf16.msra.mxu0 %v2065_v50 }
 0x4d3   : > { %1856 = vmatprep.subr.bf16.mxu0 %v2066_v51 }
 0x4d6   : > { %1857 = vmatpush3.bf16.msra.mxu0 %v2067_v52 }
 0x4d7   : > { %1858 = vmatprep.subr.bf16.mxu0 %v2068_v53 }
 0x4da   : > { %1859 = vmatpush3.bf16.msra.mxu0 %v2069_v54 }
 0x4db   : > { %1860 = vmatprep.subr.bf16.mxu0 %v2070_v55 }
 0x4de   : > { %1861 = vmatpush3.bf16.msra.mxu0 %v2071_v56 }
 0x581   : > { %v1159_v6 = vpop.f32.mrf.mxu0 }
 0x582   : > { %v2614_v7 = vadd.f32 %v1159_v6, %v2502_v2  ;;  %v2037_v2 = vld [vmem:[%s2481_s8 + $0x64] ss:$8 sps:$4 sm:$0xff]  }
 0x583   : > { %v1930_v8 = vpop.f32.mrf.mxu0  ;;  %1290 = vmatprep.subr.bf16.mxu1 %v2037_v2 }
 0x584   : > { %v1168_v9 = vmul.f32 %v2614_v7, %v2614_v7  ;;  %1291 = vmatpush1.bf16.msra.mxu1 %v2035_v14 }
 0x585   : > { %v1162_v10 = vpop.f32.mrf.mxu0  ;;  %1292 = vmatprep.subr.bf16.mxu1 %v2040_v15 }
 0x586   : > { %v2619_v11 = vadd.f32 %v1162_v10, %v2504_v3  ;;  %1170 = vadd.xlane.f32.xlu0 %v1168_v9  ;;  %v2043_v3 = vld [vmem:[%s2481_s8 + $0x44] ss:$8 sps:$4 sm:$0xff]  }
 0x587   : > { %v1931_v12 = vpop.f32.mrf.mxu0 }
 0x588   : > { %v1169_v13 = vmul.f32 %v2619_v11, %v2619_v11  ;;  %1293 = vmatpush1.bf16.msra.mxu1 %v2038_v16 }
 0x589   : > { %1294 = vmatprep.subr.bf16.mxu1 %v2043_v3 }
 0x58a   : > { %1172 = vadd.xlane.f32.xlu1 %v1169_v13 }
 0x58c   : > { %1295 = vmatpush1.bf16.msra.mxu1 %v2041_v17 }
 0x58d   : > { %1296 = vmatprep.subr.bf16.mxu1 %v2046_v18 }
 0x590   : > { %1297 = vmatpush1.bf16.msra.mxu1 %v2044_v19 }
 0x591   : > { %1298 = vmatprep.subr.bf16.mxu1 %v2049_v20 }
 0x594   : > { %1299 = vmatpush1.bf16.msra.mxu1 %v2047_v21 }
 0x595   : > { %1300 = vmatprep.subr.bf16.mxu1 %v2052_v22 }
 0x598   : > { %1301 = vmatpush1.bf16.msra.mxu1 %v2050_v23 }
 0x599   : > { %1302 = vmatprep.subr.bf16.mxu1 %v2055_v24 }
 0x59c   : > { %1303 = vmatpush1.bf16.msra.mxu1 %v2053_v25 }
 0x60f   : > { %v1171_v27 = vpop.xlane.xlu0 %1170 }
 0x610   : > { %v1174_v28 = vmul.f32 0.0078125, %v1171_v27 }
 0x612   : > { %v1176_v29 = vadd.f32 1e-06, %v1174_v28 }
 0x613   : > { %v1173_v30 = vpop.xlane.xlu1 %1172 }
 0x614   : > { %2084 = vrsqrt.f32 %v1176_v29  ;;  %v1175_v31 = vmul.f32 0.0078125, %v1173_v30 }
 0x616   : > { %v1177_v32 = vadd.f32 1e-06, %v1175_v31 }
 0x618   : > { %2086 = vrsqrt.f32 %v1177_v32 }
 0x621   : > { %v2085_v33 = vpop.eup %2084 }
 0x622   : > { %v1180_v34 = vmul.f32 %v2085_v33, %v2614_v7 }
 0x624   : > { %v1189_v38 = vmul.f32 %v1775_v36, %v1180_v34 }
 0x625   : > { %v2087_v35 = vpop.eup %2086 }
 0x626   : > { %v1181_v37 = vmul.f32 %v2087_v35, %v2619_v11 }
 0x628   : > { %v1190_v39 = vmul.f32 %v1775_v36, %v1181_v37 }
 0x62a   : > { %v1191_v40 = vpack.c.bf16 %v1190_v39, %v1189_v38 }
 0x62c   : > { %1321 = vmatmul.mubr.bf16.vlgmr.msra.gmra.mxu1 %v1191_v40 }
 0x6ec   : > { %v1322_v57 = vpop.f32.mrf.mxu1 }
 0x6ed   : > { %v1792_v58 = vmul.f32 -1.442695, %v1322_v57 }
 0x6ee   : > { %v1324_v59 = vpop.f32.mrf.mxu1 }
 0x6ef   : > { %v1793_v60 = vmul.f32 -1.442695, %v1324_v59  ;;  %2088 = vpow2.f32 %v1792_v58 }
 0x6f0   : > { %v1326_v61 = vpop.f32.mrf.mxu1 }
 0x6f1   : > { %2090 = vpow2.f32 %v1793_v60  ;;  %v1794_v62 = vmul.f32 -1.442695, %v1326_v61 }
 0x6f2   : > { %v1328_v63 = vpop.f32.mrf.mxu1 }
 0x6f3   : > { %2092 = vpow2.f32 %v1794_v62  ;;  %v1795_v0 = vmul.f32 -1.442695, %v1328_v63 }
 0x6f5   : > { %2094 = vpow2.f32 %v1795_v0 }
 0x6fc   : > { %v2089_v26 = vpop.eup %2088 }
 0x6fd   : > { %v1343_v6 = vadd.f32 1.0, %v2089_v26 }
 0x6fe   : > { %v2091_v1 = vpop.eup %2090 }
 0x6ff   : > { %v1344_v4 = vadd.f32 1.0, %v2091_v1 }
 0x700   : > { %v2093_v5 = vpop.eup %2092 }
 0x701   : > { %v1345_v8 = vadd.f32 1.0, %v2093_v5  ;;  %2096 = vrcp.f32 %v1344_v4 }
 0x702   : > { %v2095_v9 = vpop.eup %2094 }
 0x703   : > { %2098 = vrcp.f32 %v1345_v8  ;;  %v1346_v10 = vadd.f32 1.0, %v2095_v9 }
 0x704   : > { %2100 = vrcp.f32 %v1343_v6 }
 0x705   : > { %2102 = vrcp.f32 %v1346_v10 }
 0x70e   : > { %v2097_v12 = vpop.eup %2096 }
 0x70f   : > { %v1356_v16 = vmul.f32 %v2097_v12, %v1324_v59 }
 0x710   : > { %v2099_v13 = vpop.eup %2098 }
 0x711   : > { %v2101_v2 = vpop.eup %2100  ;;  %v1357_v15 = vmul.f32 %v2099_v13, %v1326_v61 }
 0x712   : > { %v2103_v14 = vpop.eup %2102  ;;  %v1355_v17 = vmul.f32 %v2101_v2, %v1322_v57 }
 0x713   : > { %v1358_v3 = vmul.f32 %v2103_v14, %v1328_v63 }
 0x714   : > { %v1359_v19 = vpack.c.bf16 %v1357_v15, %v1355_v17 }
 0x715   : > { %v1360_v18 = vpack.c.bf16 %v1358_v3, %v1356_v16 }
 0x717   : > { %1521 = vmatprep.mubr.bf16.mxu0 %v1360_v18 }
 0x718   : > { %1522 = vmatmul.mubr.bf16.vlgmr.msra.gmra.mxu0 %v1359_v19 }
 0x7d8   : > { %v1862_v20 = vpop.f32.mrf.mxu0 }
 0x7da   : > { %v1863_v21 = vpop.f32.mrf.mxu0 }
 0x7db   : > { %v1864_v22 = vadd.f32 %v1863_v21, %v1862_v20 }
 0x7dc   : > { %v1865_v23 = vpop.f32.mrf.mxu0 }
 0x7dd   : > { %v1530_v24 = vadd.f32 %v1864_v22, %v2614_v7 }
 0x7de   : > { %v1866_v25 = vpop.f32.mrf.mxu0 }
 0x7df   : > { %1532 = vst [vmem:[#allocation2] sm:$0xff] %v1530_v24  ;;  %v1867_v27 = vadd.f32 %v1866_v25, %v1865_v23  ;;  %1537 = sbr.rel (%p1812_p5) target bundleno = 2021 (0x7e5), region = 72 }
 0x7e1   : > { %v1531_v28 = vadd.f32 %v1867_v27, %v2619_v11 }
 0x7e3   : > { %1533 = vst [vmem:[#allocation2 + $0x8] sm:$0xff] %v1531_v28 }
 0x7e4   : > { %1538 = vst [vmem:[%s2716_s3 - $0x7] sm:$0x80] %v1530_v24  ;;  %1539 = vst [vmem:[%s2716_s3 - $0x6] sm:$0x80] %v1531_v28 }
 0x7e5 PF: > { %s2717_s16 = sld [smem:[#allocation11_spill]]  ;;  %s2720_s13 = smov %s2218_s14 }
 0x7e6   : > { %s2718_s25 = sld [smem:[#allocation10_spill]] }
 0x7e7   : > { %s2719_s15 = sld [smem:[#allocation12_spill]] }
 0x7eb   : > { %p24_p6 = scmp.ge.s32.totalorder %s2717_s16, 4  }
 0x7ec   : > { %s2721_s14 = smov %s2718_s25 }
 0x7ed   :  { %26 = sbr.rel (!%p24_p6) target bundleno = 9 (0x9), region = 153 }
 0x7f2   :  { %1583 = vsyncpa [#allocation4], 1 }
 0x7f3   :  { %1585 = vsyncpa [#allocation4 + $0x1], 1 }
 0x7f4   :  { %1586 = vsyncpa [#allocation6], 1 }
 0x7f5   :  { %1588 = vsyncpa [#allocation6 + $0x1], 1 }

// kernel: closed_call.58
= control target key start
LH: loop header
LB: loop body
LE: loop exit
PB: predicated region body
PF: predicated region fallthrough
CT: control target
= control target key end

     0   :  { %s2952_s27 = smov 0   ;;  %s3533_s0 = inlined_call_operand.<no memory space> [shape: s32[1], index: 0, kind: input, shape index: {}]   ;;  %s3534_s1 = inlined_call_operand.vmem [shape: f32[2,1,128], index: 1, kind: input, shape index: {}]   ;;  %s3535_s2 = inlined_call_operand.vmem [shape: f32[2,16], index: 2, kind: input, shape index: {}]   ;;  %s3536_s3 = inlined_call_operand.vmem [shape: bf16[2,2,16,128], index: 3, kind: input, shape index: {}]   ;;  %s3537_s4 = inlined_call_operand.vmem [shape: bf16[2,2,16,128], index: 4, kind: input, shape index: {}]   ;;  %s3538_s5 = inlined_call_operand.vmem [shape: f32[2,1,128], index: 5, kind: input, shape index: {}]   ;;  %s3539_s6 = inlined_call_operand.vmem [shape: bf16[2,128,384], index: 6, kind: input, shape index: {}]   ;;  %s3540_s7 = inlined_call_operand.vmem [shape: bf16[2,128,128], index: 7, kind: input, shape index: {}]   ;;  %s3541_s8 = inlined_call_operand.vmem [shape: f32[2,1,128], index: 8, kind: input, shape index: {}]   ;;  %s3542_s9 = inlined_call_operand.vmem [shape: bf16[2,128,256], index: 9, kind: input, shape index: {}]   ;;  %s3543_s10 = inlined_call_operand.vmem [shape: bf16[2,256,128], index: 10, kind: input, shape index: {}]   ;;  %s3544_s11 = inlined_call_operand.vmem [shape: f32[2,1,128], index: 11, kind: output, shape index: {0}]   ;;  %s3545_s12 = inlined_call_operand.vmem [shape: bf16[2,2,1,128], index: 12, kind: output, shape index: {1}]   ;;  %s3546_s13 = inlined_call_operand.vmem [shape: bf16[2,2,1,128], index: 13, kind: output, shape index: {2}]  }
   0x1   :  { %3549 = sst [smem:[#allocation6_spill]] %s3536_s3 }
   0x2   :  { %3550 = sst [smem:[#allocation7_spill]] %s3537_s4 }
   0x3   :  { %19 = sst [smem:[#allocation3]] %s3533_s0 }
   0x4 LB: > { %3551 = sst [smem:[#allocation4_spill]] %s2872_s27  ;;  %s2529_s28 = sadd.s32 4294967295, %s2872_s27   ;;  %s2872_s27 = sphi %s2952_s27, %s25_s27  }
   0x5   : > { %p2533_p0 = scmp.ge.s32.totalorder %s2872_s27, 1  ;;  %p430_p1 = scmp.lt.s32.totalorder %s2872_s27, 3 }
   0x7   : > { %p431_p2 = pnand %p2533_p0, %p430_p1 }
   0x9   : > { %434 = sbr.rel (%p431_p2) target bundleno = 2090 (0x82a), region = 60 }
   0xe   : > { %p506_p3 = scmp.lt.s32.totalorder %s2529_s28, 1  ;;  %s3552_s3 = sld [smem:[#allocation6_spill]] }
   0xf   : > { %s3553_s4 = sld [smem:[#allocation7_spill]]  ;;  %p2547_p4 = scmp.ne.s32.totalorder %s2529_s28, 0 }
  0x10   : > { %s2960_s29 = scalar_select %p506_p3, %s2529_s28, 1 }
  0x12   : > { %s2627_s0 = sshll.u32 %s2960_s29, 4  ;;  %s2744_s22 = smul.u32 192, %s2960_s29 }
  0x13   : > { %s2629_s23 = sshll.u32 %s2960_s29, 6  ;;  %s531_s14 = scalar_lea.vmem %s3541_s8, %s2960_s29 }
  0x14   : > { %s2970_s18 = scalar_lea.vmem %s3552_s3, %s2627_s0  ;;  %s2982_s26 = scalar_lea.vmem %s3540_s7, %s2629_s23 }
  0x15   : > { %s2975_s21 = scalar_lea.vmem %s3553_s4, %s2627_s0  ;;  %s2991_s17 = scalar_lea.vmem %s3539_s6, %s2744_s22 }
  0x16   : > { %3554 = sst [smem:[#allocation5_spill]] %s2975_s21  ;;  %s2630_s3 = sshll.u32 %s2960_s29, 7 }
  0x17   : > { %s2997_s20 = scalar_lea.vmem %s3542_s9, %s2630_s3  ;;  %s3002_s23 = scalar_lea.vmem %s3543_s10, %s2630_s3 }
  0x18   : > { %s2545_s24 = sshll.u32 %s2960_s29, 1  ;;  %554 = sbr.rel (%p2547_p4) target bundleno = 31 (0x1f), region = 64 }
  0x19   : > { %s3008_s30 = scalar_lea.vmem %s3545_s12, %s2545_s24  ;;  %s3013_s16 = scalar_lea.vmem %s3546_s13, %s2545_s24 }
  0x1d   : > { %v555_v0 = vld [vmem:[%s3534_s1] sm:$0x3]  }
  0x1e   : > { %557 = vst [vmem:[%s3544_s11] sm:$0x3] %v555_v0  }
  0x1f PF: > { %v570_v3 = vlaneseq  ;;  %v2874_v6 = vmov 1966171168   ;;  %vm582_vm0 = vcmask 1041408   ;;  %v2760_v15 = vld [vmem:[%s2991_s17 + $0xac] ss:$12 sps:$4 sm:$0xff]   ;;  %v2875_v18 = vmov 0.0   ;;  %s3555_s22 = scalar_lea.vmem %s3538_s5, %s2960_s29 }
  0x20   : > { %v568_v7 = vunpack.c.l.s4 %v2874_v6  ;;  %v2762_v16 = vld [vmem:[%s2991_s17 + $0xa8] ss:$12 sps:$4 sm:$0xff]   ;;  %v2763_v17 = vld [vmem:[%s2991_s17 + $0xb0] ss:$12 sps:$4 sm:$0xff]   ;;  %806 = vmatprep.subr.bf16.mxu0 %v2760_v15  ;;  %2680 = vmatprep.subr.bf16.mxu1 %v2875_v18  ;;  %v2767_v21 = vld [vmem:[%s2991_s17 + $0x98] ss:$12 sps:$4 sm:$0xff]  }
  0x21   : > { %v3036_v8 = vshrl.u32 %v570_v3, 7  ;;  %807 = vmatpush1.bf16.msra.mxu0 %v2762_v16  ;;  %2681 = vmatpush3.bf16.msra.mxu1 %v2763_v17  ;;  %v2764_v19 = vld [vmem:[%s2991_s17 + $0x94] ss:$12 sps:$4 sm:$0xff]   ;;  %v2766_v20 = vld [vmem:[%s2991_s17 + $0x90] ss:$12 sps:$4 sm:$0xff]   ;;  %v2876_v31 = vmov 0  }
  0x22   : > { %v569_v10 = vunpack.c.0.s8 %v568_v7  ;;  %2682 = vmatprep.subr.bf16.mxu1 %v2875_v18  ;;  %v2768_v22 = vld [vmem:[%s2991_s17 + $0x7c] ss:$12 sps:$4 sm:$0xff]   ;;  %808 = vmatprep.subr.bf16.mxu0 %v2764_v19  ;;  %v2770_v23 = vld [vmem:[%s2991_s17 + $0x78] ss:$12 sps:$4 sm:$0xff]   ;;  %v2771_v24 = vld [vmem:[%s2991_s17 + $0x80] ss:$12 sps:$4 sm:$0xff]  }
  0x23   : > { %v2772_v25 = vld [vmem:[%s2991_s17 + $0x64] ss:$12 sps:$4 sm:$0xff]   ;;  %v2774_v26 = vld [vmem:[%s2991_s17 + $0x60] ss:$12 sps:$4 sm:$0xff]   ;;  %v2775_v27 = vld [vmem:[%s2991_s17 + $0x68] ss:$12 sps:$4 sm:$0xff]   ;;  %838 = vmatprep.mubr.bf16.mxu0 %v2876_v31  ;;  %2759 = vset.pattern.permute.xlu1 %v2876_v31 }
  0x24   : > { %v3039_v11 = vsub.s32 %v569_v10, %v3036_v8  ;;  %v2776_v28 = vld [vmem:[%s2991_s17 + $0x4c] ss:$12 sps:$4 sm:$0xff]   ;;  %v2778_v29 = vld [vmem:[%s2991_s17 + $0x48] ss:$12 sps:$4 sm:$0xff]   ;;  %v2779_v30 = vld [vmem:[%s2991_s17 + $0x50] ss:$12 sps:$4 sm:$0xff]   ;;  %2758 = vset.pattern.permute.xlu0 %v2876_v31 }
  0x25   : > { %v3024_v1 = vld [vmem:[%s3544_s11] sm:$0x1]  ;;  %v3029_v2 = vld [vmem:[%s3544_s11 + $0x1] sm:$0x1]  ;;  %809 = vmatpush1.bf16.msra.mxu0 %v2766_v20  ;;  %2683 = vmatpush3.bf16.msra.mxu1 %v2767_v21  ;;  %vm2877_vm1 = vmmov 0   ;;  %v3090_v46 = vsub.s32 0, %v3036_v8 }
  0x26   : > { %v562_v4 = vmul.f32 %v3024_v1, %v3024_v1  ;;  %v563_v5 = vmul.f32 %v3029_v2, %v3029_v2  ;;  %810 = vmatprep.subr.bf16.mxu0 %v2768_v22  ;;  %2684 = vmatprep.subr.bf16.mxu1 %v2875_v18  ;;  %v2780_v32 = vld [vmem:[%s2991_s17 + $0x34] ss:$12 sps:$4 sm:$0xff]   ;;  %v2782_v33 = vld [vmem:[%s2991_s17 + $0x30] ss:$12 sps:$4 sm:$0xff]   ;;  %v2783_v34 = vld [vmem:[%s2991_s17 + $0x38] ss:$12 sps:$4 sm:$0xff]  }
  0x27   : > { %2696 = vmatprep.mubr.msk.bf16.mxu1 %vm2877_vm1, %v2875_v18  ;;  %v2784_v35 = vld [vmem:[%s2991_s17 + $0x1c] ss:$12 sps:$4 sm:$0xff]   ;;  %v2786_v36 = vld [vmem:[%s2991_s17 + $0x18] ss:$12 sps:$4 sm:$0xff]   ;;  %v2787_v37 = vld [vmem:[%s2991_s17 + $0x20] ss:$12 sps:$4 sm:$0xff]  }
  0x28   : > { %v566_v9 = vcombine.low %v562_v4, %v563_v5  ;;  %v2788_v38 = vld [vmem:[%s2991_s17 + $0x4] ss:$12 sps:$4 sm:$0xff]   ;;  %v2790_v39 = vld [vmem:[%s2991_s17] ss:$12 sps:$4 sm:$0xff]   ;;  %v2791_v40 = vld [vmem:[%s2991_s17 + $0x8] ss:$12 sps:$4 sm:$0xff]  }
  0x29   : > { %811 = vmatpush1.bf16.msra.mxu0 %v2770_v23  ;;  %2685 = vmatpush3.bf16.msra.mxu1 %v2771_v24  ;;  %v2548_v44 = vld [vmem:[%s3555_s22] ss:$0 sm:$0xff]  ;;  %v3093_v47 = vsub.s32 1, %v3036_v8  ;;  %vm674_vm2 = vcmask 1041409   ;;  %vm909_vm3 = vcmask 1040384   ;;  %v2793_v19 = vld [vmem:[%s2970_s18 + $0x8] sm:$0xff]  }
  0x2a   : > { %v573_v12 = vrot.slane %v566_v9, %v3039_v11  ;;  %812 = vmatprep.subr.bf16.mxu0 %v2772_v25  ;;  %2686 = vmatprep.subr.bf16.mxu1 %v2875_v18  ;;  %v615_v45 = vrot.slane %v2548_v44, %v3039_v11  ;;  %v2792_v0 = vld [vmem:[%s2970_s18] sm:$0xff]   ;;  %vm910_vm4 = vsmask.f32 256  ;;  %s561_s18 = sld [smem:[#allocation3]]  ;;  %vm1130_vm8 = vcmask 122880  }
  0x2b   : > { %vm3119_vm5 = vmand %vm909_vm3, %vm910_vm4  ;;  %v940_v24 = vld [vmem:[%s3013_s16] sm:$0x1]  ;;  %vm1161_vm10 = vcmask 130048   ;;  %vm1606_vm11 = vcmask 130112   ;;  %vm1613_vm12 = vcmask 195712   ;;  %vm1620_vm13 = vcmask 261312  }
  0x2c   : > { %v580_v13 = vrot.slane %v573_v12, %v3039_v11  ;;  %v616_v48 = vcombine.high %v615_v45, %v615_v45  ;;  %v623_v52 = vrot.slane %v615_v45, %v3039_v11  ;;  %v2577_v45 = vld.sshfl [vmem:[%s3535_s2] sm:$0x11 pattern:$0x75316420]  ;;  %vm1627_vm14 = vcmask 326912  }
  0x2d   : > { %813 = vmatpush1.bf16.msra.mxu0 %v2774_v26  ;;  %2687 = vmatpush3.bf16.msra.mxu1 %v2775_v27  ;;  %vm1634_vm15 = vcmask 392512   ;;  %vm1648_vm3 = vcmask 523712   ;;  %vm1655_vm4 = vcmask 589312  }
  0x2e   : > { %v583_v14 = vsel %vm582_vm0, %v580_v13, 0.0  ;;  %814 = vmatprep.subr.bf16.mxu0 %v2776_v28  ;;  %2688 = vmatprep.subr.bf16.mxu1 %v2875_v18  ;;  %v630_v53 = vrot.slane %v616_v48, %v3039_v11  ;;  %v3151_v48 = vand.u32 127, %v570_v3 }
  0x2f   : > { %584 = vadd.xlane.f32.xlu0 %v583_v14 }
  0x31   : > { %815 = vmatpush1.bf16.msra.mxu0 %v2778_v29  ;;  %2689 = vmatpush3.bf16.msra.mxu1 %v2779_v30 }
  0x32   : > { %816 = vmatprep.subr.bf16.mxu0 %v2780_v32  ;;  %2690 = vmatprep.subr.bf16.mxu1 %v2875_v18 }
  0x35   : > { %817 = vmatpush1.bf16.msra.mxu0 %v2782_v33  ;;  %2691 = vmatpush3.bf16.msra.mxu1 %v2783_v34  ;;  %v943_v33 = vld [vmem:[%s3013_s16 + $0x1] sm:$0x1]  ;;  %v912_v34 = vld [vmem:[%s3008_s30] sm:$0x1] }
  0x36   : > { %818 = vmatprep.subr.bf16.mxu0 %v2784_v35  ;;  %2692 = vmatprep.subr.bf16.mxu1 %v2875_v18 }
  0x39   : > { %819 = vmatpush1.bf16.msra.mxu0 %v2786_v36  ;;  %2693 = vmatpush3.bf16.msra.mxu1 %v2787_v37 }
  0x3a   : > { %820 = vmatprep.subr.bf16.mxu0 %v2788_v38  ;;  %2694 = vmatprep.subr.bf16.mxu1 %v2875_v18 }
  0x3d   : > { %821 = vmatpush1.bf16.msra.mxu0 %v2790_v39  ;;  %2695 = vmatpush3.bf16.msra.mxu1 %v2791_v40  ;;  %v915_v39 = vld [vmem:[%s3008_s30 + $0x1] sm:$0x1] }
  0x3e   : > { %2700 = vmatprep.subr.bf16.mxu1 %v2875_v18  ;;  %2724 = vmatprep.subr.bf16.mxu0 %v2875_v18 }
  0xb8   : > { %v585_v41 = vpop.xlane.xlu0 %584 }
  0xb9   : > { %v587_v42 = vmul.f32 0.0078125, %v585_v41 }
  0xbb   : > { %v588_v43 = vadd.f32 1e-06, %v587_v42 }
  0xbd   : > { %2844 = vrsqrt.f32 %v588_v43 }
  0xca   : > { %v2845_v49 = vpop.eup %2844 }
  0xcb   : > { %v594_v50 = vrot.slane %v2845_v49, %v3090_v46  ;;  %v598_v51 = vrot.slane %v2845_v49, %v3093_v47  ;;  %v1114_v49 = vrot.slane %v2577_v45, %v3039_v11 }
  0xcd   : > { %v601_v54 = vmul.f32 %v594_v50, %v3024_v1  ;;  %v602_v55 = vmul.f32 %v598_v51, %v3029_v2  ;;  %v1075_v50 = vstv %s561_s18  ;;  %vm1124_vm7 = vcmp.gt.f32.partialorder %v1114_v49, 0.0 }
  0xce   : > { %vm3155_vm6 = vcmp.eq.s32.totalorder %v3151_v48, %v1075_v50 }
  0xcf   : > { %v633_v56 = vmul.f32 %v623_v52, %v601_v54  ;;  %v634_v57 = vmul.f32 %v630_v53, %v602_v55  ;;  %v1107_v53 = vcombine.high %v2577_v45, %v2577_v45 }
  0xd1   : > { %v635_v58 = vpack.c.bf16 %v633_v56, %v633_v56  ;;  %v636_v59 = vpack.c.bf16 %v634_v57, %v634_v57  ;;  %v2878_v57 = vmov -1e+30  }
  0xd2   : > { %v1126_v3 = vsel %vm1124_vm7, 0.0, %v2878_v57  ;;  %vm1676_vm7 = vcmask 786112  }
  0xd3   : > { %v672_v60 = vunpack.c.l.b16 %v636_v59  ;;  %v671_v61 = vunpack.c.l.b16 %v635_v58 }
  0xd5   : > { %v673_v62 = vrot.slane %v672_v60, 7  ;;  %v1121_v60 = vrot.slane %v1107_v53, %v3039_v11 }
  0xd7   : > { %v675_v63 = vsel %vm674_vm2, %v673_v62, %v671_v61  ;;  %vm1125_vm9 = vcmp.gt.f32.partialorder %v1121_v60, 0.0 }
  0xd8   : > { %v676_v4 = vpack.c.b16 %v675_v63, %v675_v63 }
  0xda   : > { %839 = vmatmul.mubr.bf16.vlgmr.msra.gmra.mxu0 %v676_v4  ;;  %2697 = vmatmul.mubr.bf16.vlgmr.msra.gmra.mxu1 %v676_v4 }
  0xdb   : > { %2701 = vmatpush3.bf16.xpose.msra.mxu1 %v2792_v0  ;;  %2702 = vmatprep.mubr.msk.bf16.mxu1 %vm2877_vm1, %v2875_v18 }
  0xdc   : > { %2706 = vmatprep.subr.bf16.mxu1 %v2875_v18  ;;  %2740 = vmatprep.mubr.msk.bf16.mxu0 %vm2877_vm1, %v2875_v18 }
 0x19a   : > { %v840_v1 = vpop.f32.mrf.mxu0  ;;  %v3108_v2 = vpop.f32.mrf.mxu1 }
 0x19b   : > { %v961_v5 = vrot.slane %v840_v1, %v3039_v11  ;;  %v918_v6 = vpack.c.bf16 %v3108_v2, %v3108_v2 }
 0x19c   : > { %v842_v7 = vpop.f32.mrf.mxu0  ;;  %v2698_v9 = vpop.f32.mrf.mxu1 }
 0x19d   : > { %v969_v10 = vrot.slane %v961_v5, %v3039_v11  ;;  %v926_v12 = vrot.slane %v918_v6, %v3039_v11  ;;  %v887_v13 = vpack.c.bf16 %v842_v7, %v842_v7  ;;  %v962_v14 = vcombine.high %v961_v5, %v961_v5 }
 0x19e   : > { %v1077_v15 = vmul.f32 %v842_v7, %v840_v1  ;;  %v844_v16 = vpop.f32.mrf.mxu0  ;;  %v884_v17 = vpop.f32.mrf.mxu1  ;;  %v1127_v6 = vsel %vm1125_vm9, 0.0, %v2878_v57  ;;  %vm1690_vm9 = vcmask 917312  }
 0x19f   : > { %v979_v20 = vpack.c.bf16 %v969_v10, %v969_v10  ;;  %v933_v21 = vrot.slane %v926_v12, %v3039_v11  ;;  %v895_v22 = vrot.slane %v887_v13, %v3039_v11  ;;  %v976_v32 = vrot.slane %v962_v14, %v3039_v11 }
 0x1a0   : > { %v2699_v25 = vpop.f32.mrf.mxu1  ;;  %v1078_v26 = vsel %vm582_vm0, %v1077_v15, 0.0  ;;  %v845_v27 = vpop.f32.mrf.mxu0 }
 0x1a1   : > { %v935_v28 = vunpack.i.h.s16 %v933_v21  ;;  %v2574_v29 = vpack.i.b16 %v933_v21, %v933_v21  ;;  %v902_v30 = vrot.slane %v895_v22, %v3039_v11  ;;  %1079 = vadd.xlane.f32.xlu0 %v1078_v26  ;;  %2703 = vmatmul.mubr.bf16.vlgmr.msra.gmra.mxu1 %v979_v20  ;;  %v980_v43 = vpack.c.bf16 %v976_v32, %v976_v32 }
 0x1a2   : > { %2707 = vmatpush3.bf16.xpose.msra.mxu1 %v2793_v19  ;;  %2708 = vmatprep.mubr.msk.bf16.mxu1 %vm2877_vm1, %v2875_v18  ;;  %v1341_v26 = vrot.slane %v3108_v2, %v3093_v47 }
 0x1a3   : > { %v937_v35 = vpack.i.b16 %v935_v28, %v935_v28  ;;  %v941_v36 = vsel %vm3119_vm5, %v2574_v29, %v940_v24  ;;  %v904_v37 = vunpack.i.h.s16 %v902_v30  ;;  %v2573_v38 = vpack.i.b16 %v902_v30, %v902_v30  ;;  %2712 = vmatprep.subr.bf16.mxu1 %v2875_v18 }
 0x1a4   : > { %942 = vst [vmem:[%s3013_s16] sm:$0x1] %v941_v36  ;;  %v1274_v28 = vrot.slane %v3108_v2, %v3090_v46 }
 0x1a5   : > { %v944_v40 = vsel %vm3119_vm5, %v937_v35, %v943_v33  ;;  %v906_v41 = vpack.i.b16 %v904_v37, %v904_v37  ;;  %v913_v42 = vsel %vm3119_vm5, %v2573_v38, %v912_v34 }
 0x1a6   : > { %945 = vst [vmem:[%s3013_s16 + $0x1] sm:$0x1] %v944_v40  ;;  %914 = vst [vmem:[%s3008_s30] sm:$0x1] %v913_v42 }
 0x1a7   : > { %v916_v44 = vsel %vm3119_vm5, %v906_v41, %v915_v39  ;;  %vm1662_vm5 = vcmask 654912  }
 0x1a8   : > { %917 = vst [vmem:[%s3008_s30 + $0x1] sm:$0x1] %v916_v44  ;;  %s3560_s30 = sld [smem:[#allocation5_spill]] }
 0x1a9   : > { %2709 = vmatmul.mubr.bf16.vlgmr.msra.gmra.mxu1 %v980_v43 }
 0x1aa   : > { %2714 = vmatprep.mubr.msk.bf16.mxu1 %vm2877_vm1, %v2875_v18 }
 0x1ae   : > { %v2794_v27 = vld [vmem:[%s3560_s30] sm:$0xff]   ;;  %v2795_v33 = vld [vmem:[%s3560_s30 + $0x8] sm:$0xff]  }
 0x1af   : > { %2713 = vmatpush3.bf16.msra.mxu1 %v2794_v27 }
 0x1b0   : > { %2718 = vmatprep.subr.bf16.mxu1 %v2875_v18 }
 0x22a   : > { %v1080_v51 = vpop.xlane.xlu0 %1079 }
 0x22b   : > { %v1085_v54 = vrot.slane %v1080_v51, %v3090_v46  ;;  %v1089_v4 = vrot.slane %v1080_v51, %v3093_v47 }
 0x261   : > { %v1021_v55 = vpop.f32.mrf.mxu1 }
 0x262   : > { %v1094_v56 = vsel %vm3155_vm6, %v1085_v54, %v1021_v55 }
 0x263   : > { %v1096_v58 = vmul.f32 0.088388346, %v1094_v56  ;;  %v2704_v59 = vpop.f32.mrf.mxu1 }
 0x265   : > { %v1024_v61 = vpop.f32.mrf.mxu1  ;;  %v1128_v62 = vadd.f32 %v1126_v3, %v1096_v58 }
 0x267   : > { %v2705_v63 = vpop.f32.mrf.mxu1  ;;  %v1131_v0 = vsel %vm1130_vm8, %v1128_v62, -inf }
 0x268   : > { %1132 = vmax.xlane.f32.xlu1 %v1131_v0 }
 0x269   : > { %v1067_v1 = vpop.f32.mrf.mxu1 }
 0x26a   : > { %v1095_v5 = vsel %vm3155_vm6, %v1089_v4, %v1067_v1 }
 0x26b   : > { %v1097_v7 = vmul.f32 0.088388346, %v1095_v5  ;;  %v2710_v9 = vpop.f32.mrf.mxu1 }
 0x26d   : > { %v1070_v10 = vpop.f32.mrf.mxu1  ;;  %v1129_v12 = vadd.f32 %v1127_v6, %v1097_v7 }
 0x26f   : > { %v2711_v13 = vpop.f32.mrf.mxu1  ;;  %v1134_v14 = vsel %vm1130_vm8, %v1129_v12, -inf }
 0x270   : > { %1135 = vmax.xlane.f32.xlu1 %v1134_v14 }
 0x2f1   : > { %v1133_v15 = vpop.xlane.xlu1 %1132 }
 0x2f2   : > { %v1137_v16 = vsub.f32 %v1128_v62, %v1133_v15 }
 0x2f4   : > { %v1139_v17 = vmul.f32 1.442695, %v1137_v16 }
 0x2f6   : > { %2846 = vpow2.f32 %v1139_v17 }
 0x2f9   : > { %v1136_v19 = vpop.xlane.xlu1 %1135 }
 0x2fa   : > { %v1138_v20 = vsub.f32 %v1129_v12, %v1136_v19 }
 0x2fc   : > { %v1141_v21 = vmul.f32 1.442695, %v1138_v20 }
 0x2fe   : > { %2848 = vpow2.f32 %v1141_v21 }
 0x303   : > { %v2847_v22 = vpop.eup %2846 }
 0x304   : > { %v1143_v23 = vsel %vm1130_vm8, %v2847_v22, 0.0 }
 0x305   : > { %1144 = vadd.xlane.f32.xlu0 %v1143_v23 }
 0x30b   : > { %v2849_v24 = vpop.eup %2848 }
 0x30c   : > { %v1146_v25 = vsel %vm1130_vm8, %v2849_v24, 0.0 }
 0x30d   : > { %1147 = vadd.xlane.f32.xlu1 %v1146_v25 }
 0x31b   : > { %1343 = vbcast.lane.b32.xlu0 %v1341_v26, 256 }
 0x31e   : > { %1347 = vbcast.lane.b32.xlu1 %v1341_v26, 264 }
 0x31f   : > { %1280 = vbcast.lane.b32.xlu0 %v1274_v28, 264 }
 0x322   : > { %1351 = vbcast.lane.b32.xlu1 %v1341_v26, 272 }
 0x323   : > { %1284 = vbcast.lane.b32.xlu0 %v1274_v28, 272 }
 0x326   : > { %1276 = vbcast.lane.b32.xlu1 %v1274_v28, 256 }
 0x327   : > { %1288 = vbcast.lane.b32.xlu0 %v1274_v28, 280 }
 0x32a   : > { %1355 = vbcast.lane.b32.xlu1 %v1341_v26, 280 }
 0x32b   : > { %1292 = vbcast.lane.b32.xlu0 %v1274_v28, 288 }
 0x32e   : > { %1359 = vbcast.lane.b32.xlu1 %v1341_v26, 288 }
 0x32f   : > { %1296 = vbcast.lane.b32.xlu0 %v1274_v28, 296 }
 0x332   : > { %1363 = vbcast.lane.b32.xlu1 %v1341_v26, 296 }
 0x333   : > { %1300 = vbcast.lane.b32.xlu0 %v1274_v28, 304 }
 0x336   : > { %1367 = vbcast.lane.b32.xlu1 %v1341_v26, 304 }
 0x337   : > { %1304 = vbcast.lane.b32.xlu0 %v1274_v28, 312 }
 0x33a   : > { %1371 = vbcast.lane.b32.xlu1 %v1341_v26, 312 }
 0x33b   : > { %1308 = vbcast.lane.b32.xlu0 %v1274_v28, 320 }
 0x33e   : > { %1375 = vbcast.lane.b32.xlu1 %v1341_v26, 320 }
 0x33f   : > { %1312 = vbcast.lane.b32.xlu0 %v1274_v28, 328 }
 0x342   : > { %1379 = vbcast.lane.b32.xlu1 %v1341_v26, 328 }
 0x343   : > { %1316 = vbcast.lane.b32.xlu0 %v1274_v28, 336 }
 0x346   : > { %1383 = vbcast.lane.b32.xlu1 %v1341_v26, 336 }
 0x347   : > { %1320 = vbcast.lane.b32.xlu0 %v1274_v28, 344 }
 0x34a   : > { %1387 = vbcast.lane.b32.xlu1 %v1341_v26, 344 }
 0x34b   : > { %1324 = vbcast.lane.b32.xlu0 %v1274_v28, 352 }
 0x34e   : > { %1391 = vbcast.lane.b32.xlu1 %v1341_v26, 352 }
 0x34f   : > { %1328 = vbcast.lane.b32.xlu0 %v1274_v28, 360 }
 0x352   : > { %1395 = vbcast.lane.b32.xlu1 %v1341_v26, 360 }
 0x353   : > { %1332 = vbcast.lane.b32.xlu0 %v1274_v28, 368 }
 0x356   : > { %1399 = vbcast.lane.b32.xlu1 %v1341_v26, 368 }
 0x35a   : > { %1403 = vbcast.lane.b32.xlu1 %v1341_v26, 376 }
 0x35e   : > { %1336 = vbcast.lane.b32.xlu1 %v1274_v28, 376 }
 0x38e   : > { %v1145_v2 = vpop.xlane.xlu0 %1144 }
 0x38f   : > { %2850 = vrcp.f32 %v1145_v2 }
 0x392   : > { %v1344_v49 = vpop.permute.xlu0 %1343 }
 0x396   : > { %v1148_v29 = vpop.xlane.xlu1 %1147  ;;  %v1281_v51 = vpop.permute.xlu0 %1280 }
 0x397   : > { %2852 = vrcp.f32 %v1148_v29 }
 0x39a   : > { %v3186_v42 = vpop.permute.xlu1 %1347  ;;  %v1285_v54 = vpop.permute.xlu0 %1284 }
 0x39c   : > { %v2851_v30 = vpop.eup %2850 }
 0x39d   : > { %v1151_v32 = vmul.f32 %v2851_v30, %v2847_v22 }
 0x39e   : > { %v3188_v43 = vpop.permute.xlu1 %1351  ;;  %v1289_v55 = vpop.permute.xlu0 %1288 }
 0x39f   : > { %v1153_v34 = vpack.c.bf16 %v1151_v32, %v1151_v32  ;;  %v1254_v35 = vsel %vm3155_vm6, %v1151_v32, 0.0 }
 0x3a0   : > { %v1256_v36 = vsel %vm1130_vm8, %v1254_v35, 0.0 }
 0x3a1   : > { %2715 = vmatmul.mubr.msk.bf16.vlgmr.msra.gmra.mxu1 %vm1161_vm10, %v1153_v34  ;;  %1257 = vadd.xlane.f32.xlu1 %v1256_v36 }
 0x3a2   : > { %2719 = vmatpush3.bf16.msra.mxu1 %v2795_v33  ;;  %2720 = vmatprep.mubr.msk.bf16.mxu1 %vm2877_vm1, %v2875_v18  ;;  %v1277_v44 = vpop.permute.xlu1 %1276  ;;  %v1293_v57 = vpop.permute.xlu0 %1292  ;;  %vm1641_vm1 = vcmask 458112  }
 0x3a4   : > { %v2853_v37 = vpop.eup %2852 }
 0x3a5   : > { %v1152_v38 = vmul.f32 %v2853_v37, %v2849_v24 }
 0x3a6   : > { %v1356_v45 = vpop.permute.xlu1 %1355  ;;  %v1297_v58 = vpop.permute.xlu0 %1296 }
 0x3a7   : > { %v1255_v39 = vsel %vm3155_vm6, %v1152_v38, 0.0  ;;  %v1154_v40 = vpack.c.bf16 %v1152_v38, %v1152_v38  ;;  %vm1669_vm6 = vcmask 720512  }
 0x3a8   : > { %v1259_v41 = vsel %vm1130_vm8, %v1255_v39, 0.0  ;;  %vm1683_vm8 = vcmask 851712  }
 0x3a9   : > { %1260 = vadd.xlane.f32.xlu0 %v1259_v41  ;;  %2721 = vmatmul.mubr.msk.bf16.vlgmr.msra.gmra.mxu1 %vm1161_vm10, %v1154_v40  ;;  %vm1697_vm10 = vcmask 982912  }
 0x3aa   : > { %2139 = vmatprep.mubr.bf16.mxu1 %v2876_v31  ;;  %v1360_v50 = vpop.permute.xlu1 %1359  ;;  %v1301_v60 = vpop.permute.xlu0 %1300 }
 0x3ae   : > { %v1364_v53 = vpop.permute.xlu1 %1363  ;;  %v1305_v61 = vpop.permute.xlu0 %1304 }
 0x3b2   : > { %v1368_v52 = vpop.permute.xlu1 %1367  ;;  %v1309_v63 = vpop.permute.xlu0 %1308 }
 0x3b6   : > { %v1372_v56 = vpop.permute.xlu1 %1371  ;;  %v1313_v4 = vpop.permute.xlu0 %1312 }
 0x3ba   : > { %v1376_v3 = vpop.permute.xlu1 %1375  ;;  %v1317_v5 = vpop.permute.xlu0 %1316 }
 0x3be   : > { %v1380_v59 = vpop.permute.xlu1 %1379  ;;  %v1321_v7 = vpop.permute.xlu0 %1320 }
 0x3c2   : > { %v1384_v31 = vpop.permute.xlu1 %1383  ;;  %v3198_v10 = vpop.permute.xlu0 %1324 }
 0x3c6   : > { %v1388_v62 = vpop.permute.xlu1 %1387  ;;  %v3200_v13 = vpop.permute.xlu0 %1328 }
 0x3ca   : > { %v3190_v0 = vpop.permute.xlu1 %1391  ;;  %v3207_v19 = vpop.permute.xlu0 %1332 }
 0x3ce   : > { %v3192_v1 = vpop.permute.xlu1 %1395 }
 0x3d2   : > { %v3194_v6 = vpop.permute.xlu1 %1399 }
 0x3d6   : > { %v3196_v9 = vpop.permute.xlu1 %1403 }
 0x3da   : > { %v1337_v12 = vpop.permute.xlu1 %1336 }
 0x42a   : > { %v1258_v14 = vpop.xlane.xlu1 %1257 }
 0x42b   : > { %v3203_v15 = vrot.slane %v1258_v14, %v3090_v46 }
 0x42d   : > { %v1438_v16 = vmul.f32 %v1281_v51, %v3203_v15  ;;  %v1437_v17 = vmul.f32 %v1277_v44, %v3203_v15  ;;  %v1439_v20 = vmul.f32 %v1285_v54, %v3203_v15  ;;  %v3211_v21 = vmul.f32 %v1337_v12, %v3203_v15 }
 0x42e   : > { %v1440_v24 = vmul.f32 %v1289_v55, %v3203_v15  ;;  %v1441_v26 = vmul.f32 %v1293_v57, %v3203_v15  ;;  %v1442_v28 = vmul.f32 %v1297_v58, %v3203_v15  ;;  %v1443_v29 = vmul.f32 %v1301_v60, %v3203_v15  ;;  %v2799_v58 = vld [vmem:[%s2982_s26 + $0x20] sm:$0xff]  }
 0x42f   : > { %1505 = vperm.xlu1 %2759, %v1438_v16   ;;  %1502 = vperm.xlu0 %2758, %v1437_v17   ;;  %v1444_v32 = vmul.f32 %v1305_v61, %v3203_v15  ;;  %v1445_v34 = vmul.f32 %v1309_v63, %v3203_v15  ;;  %v1446_v36 = vmul.f32 %v1313_v4, %v3203_v15  ;;  %v2801_v4 = vld [vmem:[%s2982_s26 + $0x10] sm:$0xff]  }
 0x430   : > { %v1447_v38 = vmul.f32 %v1317_v5, %v3203_v15  ;;  %v1450_v57 = vmul.f32 %v3200_v13, %v3203_v15  ;;  %v2802_v5 = vld [vmem:[%s2982_s26 + $0x8] sm:$0xff]  }
 0x432   : > { %v1261_v22 = vpop.xlane.xlu0 %1260 }
 0x433   : > { %v3214_v23 = vrot.slane %v1261_v22, %v3090_v46  ;;  %1508 = vperm.xlu1 %2759, %v1439_v20  }
 0x435   : > { %v1453_v25 = vmul.f32 %v1344_v49, %v3214_v23  ;;  %v1456_v27 = vmul.f32 %v1356_v45, %v3214_v23  ;;  %v1457_v2 = vmul.f32 %v1360_v50, %v3214_v23  ;;  %v1458_v30 = vmul.f32 %v1364_v53, %v3214_v23  ;;  %v2796_v49 = vld [vmem:[%s2982_s26 + $0x38] sm:$0xff]  }
 0x436   : > { %v1459_v33 = vmul.f32 %v1368_v52, %v3214_v23  ;;  %v1460_v35 = vmul.f32 %v1372_v56, %v3214_v23  ;;  %v1461_v37 = vmul.f32 %v1376_v3, %v3214_v23  ;;  %v1462_v39 = vmul.f32 %v1380_v59, %v3214_v23  ;;  %2725 = vmatpush3.bf16.msra.mxu0 %v2796_v49  ;;  %v2798_v52 = vld [vmem:[%s2982_s26 + $0x28] sm:$0xff]  }
 0x437   : > { %1511 = vperm.xlu1 %2759, %v1440_v24   ;;  %1550 = vperm.xlu0 %2758, %v1453_v25   ;;  %v1454_v40 = vmul.f32 %v3186_v42, %v3214_v23  ;;  %v1463_v41 = vmul.f32 %v1384_v31, %v3214_v23  ;;  %v1455_v44 = vmul.f32 %v3188_v43, %v3214_v23  ;;  %v2797_v42 = vld [vmem:[%s2982_s26 + $0x30] sm:$0xff]  }
 0x438   : > { %v1464_v45 = vmul.f32 %v1388_v62, %v3214_v23  ;;  %v1448_v50 = vmul.f32 %v1321_v7, %v3203_v15  ;;  %v1465_v51 = vmul.f32 %v3190_v0, %v3214_v23  ;;  %2726 = vmatprep.subr.bf16.mxu0 %v2875_v18  ;;  %v1449_v53 = vmul.f32 %v3198_v10, %v3203_v15  ;;  %v2800_v62 = vld [vmem:[%s2982_s26 + $0x18] sm:$0xff]  }
 0x439   : > { %v1466_v54 = vmul.f32 %v3192_v1, %v3214_v23  ;;  %v1467_v3 = vmul.f32 %v3194_v6, %v3214_v23  ;;  %v1451_v31 = vmul.f32 %v3207_v19, %v3203_v15  ;;  %v1468_v61 = vmul.f32 %v3196_v9, %v3214_v23  ;;  %v2803_v6 = vld [vmem:[%s2982_s26] sm:$0xff]  }
 0x43a   : > { %2727 = vmatpush3.bf16.msra.mxu0 %v2797_v42  ;;  %v1671_v42 = vadd.s32 4294967208, %v3151_v48 }
 0x43b   : > { %1514 = vperm.xlu1 %2759, %v1441_v26   ;;  %1559 = vperm.xlu0 %2758, %v1456_v27   ;;  %v1601_v26 = vadd.s32 4294967288, %v3151_v48  ;;  %v1608_v27 = vadd.s32 4294967280, %v3151_v48 }
 0x43c   : > { %2728 = vmatprep.subr.bf16.mxu0 %v2875_v18 }
 0x43e   : > { %2729 = vmatpush3.bf16.msra.mxu0 %v2798_v52 }
 0x43f   : > { %1517 = vperm.xlu1 %2759, %v1442_v28   ;;  %1562 = vperm.xlu0 %2758, %v1457_v2   ;;  %v1615_v28 = vadd.s32 4294967272, %v3151_v48  ;;  %v1622_v2 = vadd.s32 4294967264, %v3151_v48 }
 0x440   : > { %2730 = vmatprep.subr.bf16.mxu0 %v2875_v18 }
 0x442   : > { %2731 = vmatpush3.bf16.msra.mxu0 %v2799_v58 }
 0x443   : > { %1520 = vperm.xlu1 %2759, %v1443_v29   ;;  %1565 = vperm.xlu0 %2758, %v1458_v30  }
 0x444   : > { %2732 = vmatprep.subr.bf16.mxu0 %v2875_v18 }
 0x446   : > { %2733 = vmatpush3.bf16.msra.mxu0 %v2800_v62 }
 0x447   : > { %1523 = vperm.xlu1 %2759, %v1444_v32   ;;  %1568 = vperm.xlu0 %2758, %v1459_v33   ;;  %v3314_v32 = vsub.s32 %v1601_v26, %v3036_v8  ;;  %v3318_v33 = vsub.s32 %v3151_v48, %v3036_v8 }
 0x448   : > { %2734 = vmatprep.subr.bf16.mxu0 %v2875_v18 }
 0x44a   : > { %2735 = vmatpush3.bf16.msra.mxu0 %v2801_v4 }
 0x44b   : > { %1526 = vperm.xlu1 %2759, %v1445_v34   ;;  %1571 = vperm.xlu0 %2758, %v1460_v35   ;;  %v1629_v34 = vadd.s32 4294967256, %v3151_v48  ;;  %v3322_v35 = vsub.s32 %v1608_v27, %v3036_v8 }
 0x44c   : > { %2736 = vmatprep.subr.bf16.mxu0 %v2875_v18 }
 0x44d   : > { %v3337_v49 = vsub.s32 %v1629_v34, %v3036_v8 }
 0x44e   : > { %2737 = vmatpush3.bf16.msra.mxu0 %v2802_v5 }
 0x44f   : > { %1529 = vperm.xlu1 %2759, %v1446_v36   ;;  %1574 = vperm.xlu0 %2758, %v1461_v37   ;;  %v1636_v36 = vadd.s32 4294967248, %v3151_v48  ;;  %v3326_v37 = vsub.s32 %v1615_v28, %v3036_v8 }
 0x450   : > { %2738 = vmatprep.subr.bf16.mxu0 %v2875_v18 }
 0x452   : > { %2739 = vmatpush3.bf16.msra.mxu0 %v2803_v6  ;;  %v1692_v6 = vadd.s32 4294967184, %v3151_v48 }
 0x453   : > { %1532 = vperm.xlu1 %2759, %v1447_v38   ;;  %1577 = vperm.xlu0 %2758, %v1462_v39   ;;  %v3329_v38 = vsub.s32 %v1622_v2, %v3036_v8  ;;  %v1643_v39 = vadd.s32 4294967240, %v3151_v48 }
 0x457   : > { %1553 = vperm.xlu1 %2759, %v1454_v40   ;;  %1580 = vperm.xlu0 %2758, %v1463_v41  }
 0x45b   : > { %1556 = vperm.xlu1 %2759, %v1455_v44   ;;  %1583 = vperm.xlu0 %2758, %v1464_v45   ;;  %v1650_v44 = vadd.s32 4294967232, %v3151_v48  ;;  %v1657_v45 = vadd.s32 4294967224, %v3151_v48 }
 0x45d   : > { %v3352_v58 = vsub.s32 %v1650_v44, %v3036_v8 }
 0x45f   : > { %1535 = vperm.xlu1 %2759, %v1448_v50   ;;  %1586 = vperm.xlu0 %2758, %v1465_v51   ;;  %v1664_v50 = vadd.s32 4294967216, %v3151_v48 }
 0x461   : > { %v3244_v43 = vpop.f32.mrf.mxu1  ;;  %v3361_v62 = vsub.s32 %v1664_v50, %v3036_v8 }
 0x463   : > { %v2716_v55 = vpop.f32.mrf.mxu1  ;;  %1538 = vperm.xlu1 %2759, %v1449_v53   ;;  %1589 = vperm.xlu0 %2758, %v1466_v54   ;;  %v3343_v53 = vsub.s32 %v1636_v36, %v3036_v8  ;;  %v1678_v54 = vadd.s32 4294967200, %v3151_v48 }
 0x464   : > { %v3348_v55 = vsub.s32 %v1643_v39, %v3036_v8 }
 0x465   : > { %v1202_v56 = vpop.f32.mrf.mxu1  ;;  %v3371_v5 = vsub.s32 %v1678_v54, %v3036_v8 }
 0x467   : > { %v2717_v59 = vpop.f32.mrf.mxu1  ;;  %1541 = vperm.xlu1 %2759, %v1450_v57   ;;  %1592 = vperm.xlu0 %2758, %v1467_v3   ;;  %v1685_v3 = vadd.s32 4294967192, %v3151_v48 }
 0x468   : > { %v3355_v59 = vsub.s32 %v1657_v45, %v3036_v8  ;;  %v1699_v45 = vadd.s32 4294967176, %v3151_v48 }
 0x469   : > { %v3258_v60 = vpop.f32.mrf.mxu1  ;;  %v3380_v28 = vsub.s32 %v1685_v3, %v3036_v8 }
 0x46b   : > { %v2722_v63 = vpop.f32.mrf.mxu1  ;;  %1544 = vperm.xlu1 %2759, %v1451_v31   ;;  %1595 = vperm.xlu0 %2758, %v1468_v61  }
 0x46d   : > { %v1251_v0 = vpop.f32.mrf.mxu1 }
 0x46e   : > { %v3365_v0 = vsub.s32 %v1671_v42, %v3036_v8 }
 0x46f   : > { %v2723_v1 = vpop.f32.mrf.mxu1  ;;  %1547 = vperm.xlu0 %2758, %v3211_v21  }
 0x4aa   : > { %v3273_v7 = vpop.permute.xlu1 %1505  ;;  %v3275_v9 = vpop.permute.xlu0 %1502 }
 0x4ab   : > { %v1600_v2 = vrot.slane %v3275_v9, %v3318_v33 }
 0x4ae   : > { %v3277_v10 = vpop.permute.xlu1 %1508 }
 0x4af   : > { %v1612_v36 = vrot.slane %v3277_v10, %v3322_v35 }
 0x4b2   : > { %v3279_v12 = vpop.permute.xlu1 %1511  ;;  %v1551_v13 = vpop.permute.xlu0 %1550 }
 0x4b3   : > { %v1709_v52 = vrot.slane %v1551_v13, %v3318_v33 }
 0x4b6   : > { %v3281_v14 = vpop.permute.xlu1 %1514  ;;  %v3283_v15 = vpop.permute.xlu0 %1559 }
 0x4b7   : > { %v1723_v61 = vrot.slane %v3283_v15, %v3326_v37  ;;  %v1626_v33 = vrot.slane %v3281_v14, %v3329_v38 }
 0x4ba   : > { %v3285_v16 = vpop.permute.xlu1 %1517  ;;  %v3287_v17 = vpop.permute.xlu0 %1562 }
 0x4bb   : > { %v1728_v4 = vrot.slane %v3287_v17, %v3329_v38  ;;  %v1605_v17 = vrot.slane %v3273_v7, %v3314_v32  ;;  %v1619_v7 = vrot.slane %v3279_v12, %v3326_v37 }
 0x4bd   : > { %v1607_v12 = vsel %vm1606_vm11, %v1605_v17, %v1600_v2 }
 0x4be   : > { %v3289_v19 = vpop.permute.xlu1 %1520  ;;  %v3291_v18 = vpop.permute.xlu0 %1565  ;;  %v1614_v14 = vsel %vm1613_vm12, %v1612_v36, %v1607_v12 }
 0x4bf   : > { %v1733_v13 = vrot.slane %v3291_v18, %v3337_v49  ;;  %v1621_v48 = vsel %vm1620_vm13, %v1619_v7, %v1614_v14  ;;  %v2865_v14 = vld [vmem:[%s3544_s11 + $0x1] sm:$0x1] }
 0x4c2   : > { %v3293_v20 = vpop.permute.xlu1 %1523  ;;  %v3295_v21 = vpop.permute.xlu0 %1568 }
 0x4c3   : > { %v1738_v34 = vrot.slane %v3295_v21, %v3343_v53  ;;  %v1695_v21 = vsub.s32 %v1692_v6, %v3036_v8  ;;  %v1647_v42 = vrot.slane %v3293_v20, %v3348_v55 }
 0x4c6   : > { %v3297_v22 = vpop.permute.xlu1 %1526  ;;  %v3299_v23 = vpop.permute.xlu0 %1571 }
 0x4c7   : > { %v1743_v39 = vrot.slane %v3299_v23, %v3348_v55  ;;  %v1654_v54 = vrot.slane %v3297_v22, %v3352_v58 }
 0x4ca   : > { %v3301_v24 = vpop.permute.xlu1 %1529  ;;  %v3303_v25 = vpop.permute.xlu0 %1574 }
 0x4cb   : > { %v1748_v9 = vrot.slane %v3303_v25, %v3352_v58  ;;  %v1633_v25 = vrot.slane %v3285_v16, %v3337_v49  ;;  %v1628_v49 = vsel %vm1627_vm14, %v1626_v33, %v1621_v48  ;;  %v1661_v20 = vrot.slane %v3301_v24, %v3355_v59 }
 0x4ce   : > { %v3309_v29 = vpop.permute.xlu1 %1532  ;;  %v3311_v30 = vpop.permute.xlu0 %1577 }
 0x4cf   : > { %v1753_v10 = vrot.slane %v3311_v30, %v3355_v59  ;;  %v1640_v30 = vrot.slane %v3289_v19, %v3343_v53  ;;  %v1668_v22 = vrot.slane %v3309_v29, %v3361_v62 }
 0x4d2   : > { %v1554_v40 = vpop.permute.xlu1 %1553  ;;  %v3332_v41 = vpop.permute.xlu0 %1580 }
 0x4d3   : > { %v1713_v51 = vrot.slane %v1554_v40, %v3314_v32  ;;  %v1758_v37 = vrot.slane %v3332_v41, %v3361_v62 }
 0x4d5   : > { %v1714_v63 = vsel %vm1606_vm11, %v1713_v51, %v1709_v52  ;;  %vm1704_vm11 = vcmask 1048512  }
 0x4d6   : > { %v1557_v56 = vpop.permute.xlu1 %1556  ;;  %v1584_v57 = vpop.permute.xlu0 %1583 }
 0x4d7   : > { %v1718_v31 = vrot.slane %v1557_v56, %v3322_v35  ;;  %v1763_v51 = vrot.slane %v1584_v57, %v3365_v0  ;;  %v1702_v56 = vsub.s32 %v1699_v45, %v3036_v8  ;;  %v1635_v57 = vsel %vm1634_vm15, %v1633_v25, %v1628_v49  ;;  %v2806_v49 = vld [vmem:[%s2997_s20 + $0x74] ss:$8 sps:$4 sm:$0xff]  }
 0x4d8   : > { %2107 = vmatprep.subr.bf16.mxu1 %v2806_v49 }
 0x4d9   : > { %v1719_v1 = vsel %vm1613_vm12, %v1718_v31, %v1714_v63  ;;  %v1642_v31 = vsel %vm1641_vm1, %v1640_v30, %v1635_v57  ;;  %v2815_v57 = vld [vmem:[%s2997_s20 + $0x44] ss:$8 sps:$4 sm:$0xff]  }
 0x4da   : > { %v1724_v15 = vsel %vm1620_vm13, %v1723_v61, %v1719_v1  ;;  %v3377_v26 = vpop.permute.xlu1 %1535  ;;  %v1587_v27 = vpop.permute.xlu0 %1586  ;;  %v1649_v61 = vsel %vm1648_vm3, %v1647_v42, %v1642_v31  ;;  %v2821_v31 = vld [vmem:[%s2997_s20 + $0x24] ss:$8 sps:$4 sm:$0xff]  }
 0x4db   : > { %v1729_v18 = vsel %vm1627_vm14, %v1728_v4, %v1724_v15  ;;  %v1768_v41 = vrot.slane %v1587_v27, %v3371_v5  ;;  %v1675_v8 = vrot.slane %v3377_v26, %v3365_v0  ;;  %v1656_v24 = vsel %vm1655_vm4, %v1654_v54, %v1649_v61  ;;  %v2804_v54 = vld [vmem:[%s2997_s20 + $0x70] ss:$8 sps:$4 sm:$0xff]  }
 0x4dc   : > { %v1734_v40 = vsel %vm1634_vm15, %v1733_v13, %v1729_v18  ;;  %v1663_v6 = vsel %vm1662_vm5, %v1661_v20, %v1656_v24  ;;  %2108 = vmatpush1.bf16.msra.mxu1 %v2804_v54  ;;  %v2813_v20 = vld [vmem:[%s2997_s20 + $0x40] ss:$8 sps:$4 sm:$0xff]   ;;  %v2822_v61 = vld [vmem:[%s2997_s20 + $0x10] ss:$8 sps:$4 sm:$0xff]  }
 0x4dd   : > { %v1739_v32 = vsel %vm1641_vm1, %v1738_v34, %v1734_v40  ;;  %v1670_v13 = vsel %vm1669_vm6, %v1668_v22, %v1663_v6  ;;  %v2819_v22 = vld [vmem:[%s2997_s20 + $0x20] ss:$8 sps:$4 sm:$0xff]  }
 0x4de   : > { %v1744_v23 = vsel %vm1648_vm3, %v1743_v39, %v1739_v32  ;;  %v1539_v35 = vpop.permute.xlu1 %1538  ;;  %v1590_v44 = vpop.permute.xlu0 %1589  ;;  %v1677_v26 = vsel %vm1676_vm7, %v1675_v8, %v1670_v13  ;;  %v2827_v8 = vld [vmem:[%s2997_s20 + $0x4] ss:$8 sps:$4 sm:$0xff]  }
 0x4df   : > { %v1749_v50 = vsel %vm1655_vm4, %v1748_v9, %v1744_v23  ;;  %v1773_v3 = vrot.slane %v1590_v44, %v3380_v28  ;;  %v1682_v59 = vrot.slane %v1539_v35, %v3371_v5 }
 0x4e0   : > { %v1754_v38 = vsel %vm1662_vm5, %v1753_v10, %v1749_v50 }
 0x4e1   : > { %v1759_v16 = vsel %vm1669_vm6, %v1758_v37, %v1754_v38  ;;  %v1684_v17 = vsel %vm1683_vm8, %v1682_v59, %v1677_v26 }
 0x4e2   : > { %v1764_v19 = vsel %vm1676_vm7, %v1763_v51, %v1759_v16  ;;  %v1542_v53 = vpop.permute.xlu1 %1541  ;;  %v1593_v52 = vpop.permute.xlu0 %1592 }
 0x4e3   : > { %v1769_v55 = vsel %vm1683_vm8, %v1768_v41, %v1764_v19  ;;  %v1778_v58 = vrot.slane %v1593_v52, %v1695_v21  ;;  %v1689_v29 = vrot.slane %v1542_v53, %v3380_v28  ;;  %v2809_v19 = vld [vmem:[%s2997_s20 + $0x64] ss:$8 sps:$4 sm:$0xff]   ;;  %v2807_v53 = vld [vmem:[%s2997_s20 + $0x60] ss:$8 sps:$4 sm:$0xff]   ;;  %v2812_v52 = vld [vmem:[%s2997_s20 + $0x54] ss:$8 sps:$4 sm:$0xff]  }
 0x4e4   : > { %v1774_v63 = vsel %vm1690_vm9, %v1773_v3, %v1769_v55  ;;  %2109 = vmatprep.subr.bf16.mxu1 %v2809_v19  ;;  %v2816_v55 = vld [vmem:[%s2997_s20 + $0x30] ss:$8 sps:$4 sm:$0xff]   ;;  %v2818_v3 = vld [vmem:[%s2997_s20 + $0x34] ss:$8 sps:$4 sm:$0xff]  }
 0x4e5   : > { %v1779_v15 = vsel %vm1697_vm10, %v1778_v58, %v1774_v63  ;;  %v1691_v34 = vsel %vm1690_vm9, %v1689_v29, %v1684_v17  ;;  %2110 = vmatpush1.bf16.msra.mxu1 %v2807_v53  ;;  %v2824_v58 = vld [vmem:[%s2997_s20 + $0x14] ss:$8 sps:$4 sm:$0xff]   ;;  %v2825_v63 = vld [vmem:[%s2997_s20] ss:$8 sps:$4 sm:$0xff]  }
 0x4e6   : > { %v1545_v4 = vpop.permute.xlu1 %1544  ;;  %v1596_v1 = vpop.permute.xlu0 %1595  ;;  %2111 = vmatprep.subr.bf16.mxu1 %v2812_v52 }
 0x4e7   : > { %v1783_v62 = vrot.slane %v1596_v1, %v1702_v56  ;;  %v1696_v0 = vrot.slane %v1545_v4, %v1695_v21  ;;  %v2590_v1 = vld [vmem:[%s531_s14] ss:$0 sm:$0xff] }
 0x4e8   : > { %v1981_v6 = vrot.slane %v2590_v1, %v3039_v11 }
 0x4e9   : > { %v1784_v27 = vsel %vm1704_vm11, %v1783_v62, %v1779_v15  ;;  %v1698_v28 = vsel %vm1697_vm10, %v1696_v0, %v1691_v34 }
 0x4ea   : > { %v1788_v5 = vadd.f32 %v1784_v27, %v3258_v60  ;;  %v1548_v2 = vpop.permute.xlu0 %1547  ;;  %v1982_v29 = vcombine.high %v1981_v6, %v1981_v6  ;;  %v1989_v0 = vrot.slane %v1981_v6, %v3039_v11 }
 0x4eb   : > { %v1703_v18 = vrot.slane %v1548_v2, %v1702_v56  ;;  %v2810_v56 = vld [vmem:[%s2997_s20 + $0x50] ss:$8 sps:$4 sm:$0xff]  }
 0x4ec   : > { %v1790_v36 = vpack.c.bf16 %v1788_v5, %v1788_v5  ;;  %2112 = vmatpush1.bf16.msra.mxu1 %v2810_v56  ;;  %v1996_v26 = vrot.slane %v1982_v29, %v3039_v11 }
 0x4ed   : > { %v1705_v39 = vsel %vm1704_vm11, %v1703_v18, %v1698_v28  ;;  %2113 = vmatprep.subr.bf16.mxu1 %v2815_v57 }
 0x4ee   : > { %v1810_v40 = vunpack.c.l.b16 %v1790_v36  ;;  %v1787_v7 = vadd.f32 %v1705_v39, %v3244_v43  ;;  %v2864_v43 = vld [vmem:[%s3544_s11] sm:$0x1] }
 0x4f0   : > { %v1789_v9 = vpack.c.bf16 %v1787_v7, %v1787_v7  ;;  %v1811_v32 = vrot.slane %v1810_v40, 7  ;;  %2114 = vmatpush1.bf16.msra.mxu1 %v2813_v20  ;;  %v2828_v40 = vld [vmem:[%s3002_s23 + $0x78] sm:$0xff]  }
 0x4f1   : > { %2115 = vmatprep.subr.bf16.mxu1 %v2818_v3  ;;  %v2829_v7 = vld [vmem:[%s3002_s23 + $0x38] sm:$0xff]   ;;  %2658 = vmatprep.subr.bf16.mxu0 %v2828_v40 }
 0x4f2   : > { %v1809_v21 = vunpack.c.l.b16 %v1789_v9  ;;  %v2830_v9 = vld [vmem:[%s3002_s23 + $0x70] sm:$0xff]  }
 0x4f4   : > { %v1812_v33 = vsel %vm674_vm2, %v1811_v32, %v1809_v21  ;;  %2116 = vmatpush1.bf16.msra.mxu1 %v2816_v55  ;;  %v2831_v32 = vld [vmem:[%s3002_s23 + $0x30] sm:$0xff]   ;;  %v2832_v21 = vld [vmem:[%s3002_s23 + $0x68] sm:$0xff]  }
 0x4f5   : > { %v1813_v10 = vpack.c.b16 %v1812_v33, %v1812_v33  ;;  %2117 = vmatprep.subr.bf16.mxu1 %v2821_v31  ;;  %v2833_v33 = vld [vmem:[%s3002_s23 + $0x28] sm:$0xff]  }
 0x4f7   : > { %2741 = vmatmul.mubr.bf16.vlgmr.msra.gmra.mxu0 %v1813_v10  ;;  %v2834_v10 = vld [vmem:[%s3002_s23 + $0x60] sm:$0xff]  }
 0x4f8   : > { %2118 = vmatpush1.bf16.msra.mxu1 %v2819_v22  ;;  %2659 = vmatpush3.bf16.msra.mxu0 %v2829_v7 }
 0x4f9   : > { %2119 = vmatprep.subr.bf16.mxu1 %v2824_v58  ;;  %2660 = vmatprep.subr.bf16.mxu0 %v2830_v9 }
 0x4fc   : > { %2120 = vmatpush1.bf16.msra.mxu1 %v2822_v61  ;;  %2661 = vmatpush3.bf16.msra.mxu0 %v2831_v32 }
 0x4fd   : > { %2121 = vmatprep.subr.bf16.mxu1 %v2827_v8  ;;  %2662 = vmatprep.subr.bf16.mxu0 %v2832_v21 }
 0x500   : > { %2122 = vmatpush1.bf16.msra.mxu1 %v2825_v63  ;;  %2663 = vmatpush3.bf16.msra.mxu0 %v2833_v33 }
 0x501   : > { %2664 = vmatprep.subr.bf16.mxu0 %v2834_v10 }
 0x5b7   : > { %v1897_v60 = vpop.f32.mrf.mxu0 }
 0x5b8   : > { %v1910_v23 = vrot.slane %v1897_v60, %v3039_v11  ;;  %v2835_v60 = vld [vmem:[%s3002_s23 + $0x20] sm:$0xff]  }
 0x5b9   : > { %v2742_v35 = vpop.f32.mrf.mxu0  ;;  %2665 = vmatpush3.bf16.msra.mxu0 %v2835_v60 }
 0x5ba   : > { %v1911_v44 = vcombine.high %v1910_v23, %v1910_v23  ;;  %v1918_v45 = vrot.slane %v1910_v23, %v3039_v11  ;;  %v2836_v23 = vld [vmem:[%s3002_s23 + $0x58] sm:$0xff]  }
 0x5bb   : > { %v1900_v12 = vpop.f32.mrf.mxu0  ;;  %v2837_v35 = vld [vmem:[%s3002_s23 + $0x18] sm:$0xff]   ;;  %2666 = vmatprep.subr.bf16.mxu0 %v2836_v23 }
 0x5bc   : > { %v1925_v25 = vrot.slane %v1911_v44, %v3039_v11  ;;  %v3460_v37 = vadd.f32 %v2864_v43, %v1918_v45  ;;  %v2838_v44 = vld [vmem:[%s3002_s23 + $0x50] sm:$0xff]   ;;  %v2840_v12 = vld [vmem:[%s3002_s23 + $0x48] sm:$0xff]   ;;  %v2842_v43 = vld [vmem:[%s3002_s23 + $0x40] sm:$0xff]  }
 0x5bd   : > { %v2743_v50 = vpop.f32.mrf.mxu0  ;;  %2667 = vmatpush3.bf16.msra.mxu0 %v2837_v35  ;;  %v2839_v45 = vld [vmem:[%s3002_s23 + $0x10] sm:$0xff]  }
 0x5be   : > { %v3465_v30 = vadd.f32 %v2865_v14, %v1925_v25  ;;  %v1930_v38 = vmul.f32 %v3460_v37, %v3460_v37  ;;  %2668 = vmatprep.subr.bf16.mxu0 %v2838_v44  ;;  %v2841_v25 = vld [vmem:[%s3002_s23 + $0x8] sm:$0xff]   ;;  %v2843_v50 = vld [vmem:[%s3002_s23] sm:$0xff]  }
 0x5c0   : > { %v1931_v51 = vmul.f32 %v3465_v30, %v3465_v30 }
 0x5c1   : > { %2669 = vmatpush3.bf16.msra.mxu0 %v2839_v45 }
 0x5c2   : > { %v1934_v48 = vcombine.low %v1930_v38, %v1931_v51  ;;  %2670 = vmatprep.subr.bf16.mxu0 %v2840_v12 }
 0x5c4   : > { %v1941_v42 = vrot.slane %v1934_v48, %v3039_v11 }
 0x5c5   : > { %2671 = vmatpush3.bf16.msra.mxu0 %v2841_v25 }
 0x5c6   : > { %v1948_v16 = vrot.slane %v1941_v42, %v3039_v11  ;;  %2672 = vmatprep.subr.bf16.mxu0 %v2842_v43 }
 0x5c8   : > { %v1950_v41 = vsel %vm582_vm0, %v1948_v16, 0.0 }
 0x5c9   : > { %1951 = vadd.xlane.f32.xlu1 %v1950_v41  ;;  %2673 = vmatpush3.bf16.msra.mxu0 %v2843_v50 }
 0x652   : > { %v1952_v24 = vpop.xlane.xlu1 %1951 }
 0x653   : > { %v1953_v59 = vmul.f32 0.0078125, %v1952_v24 }
 0x655   : > { %v1954_v4 = vadd.f32 1e-06, %v1953_v59 }
 0x657   : > { %2854 = vrsqrt.f32 %v1954_v4 }
 0x664   : > { %v2855_v62 = vpop.eup %2854 }
 0x665   : > { %v1960_v13 = vrot.slane %v2855_v62, %v3090_v46  ;;  %v1964_v15 = vrot.slane %v2855_v62, %v3093_v47 }
 0x667   : > { %v1967_v27 = vmul.f32 %v1960_v13, %v3460_v37  ;;  %v1968_v17 = vmul.f32 %v1964_v15, %v3465_v30 }
 0x669   : > { %v1999_v5 = vmul.f32 %v1989_v0, %v1967_v27  ;;  %v2000_v2 = vmul.f32 %v1996_v26, %v1968_v17 }
 0x66b   : > { %v2001_v34 = vpack.c.bf16 %v1999_v5, %v1999_v5  ;;  %v2002_v18 = vpack.c.bf16 %v2000_v2, %v2000_v2 }
 0x66d   : > { %v2022_v46 = vunpack.c.l.b16 %v2002_v18  ;;  %v2021_v28 = vunpack.c.l.b16 %v2001_v34 }
 0x66f   : > { %v2023_v47 = vrot.slane %v2022_v46, 7 }
 0x671   : > { %v2024_v36 = vsel %vm674_vm2, %v2023_v47, %v2021_v28 }
 0x672   : > { %v2025_v39 = vpack.c.b16 %v2024_v36, %v2024_v36 }
 0x674   : > { %2140 = vmatmul.mubr.bf16.vlgmr.msra.gmra.mxu1 %v2025_v39 }
 0x734   : > { %v2141_v14 = vpop.f32.mrf.mxu1 }
 0x735   : > { %v2607_v38 = vmul.f32 -1.442695, %v2141_v14 }
 0x736   : > { %v2143_v51 = vpop.f32.mrf.mxu1 }
 0x737   : > { %2856 = vpow2.f32 %v2607_v38  ;;  %v2608_v48 = vmul.f32 -1.442695, %v2143_v51 }
 0x738   : > { %v2145_v42 = vpop.f32.mrf.mxu1 }
 0x739   : > { %2858 = vpow2.f32 %v2608_v48 }
 0x73a   : > { %v2146_v16 = vpop.f32.mrf.mxu1 }
 0x744   : > { %v2857_v41 = vpop.eup %2856 }
 0x745   : > { %v2154_v49 = vadd.f32 1.0, %v2857_v41 }
 0x746   : > { %v2859_v54 = vpop.eup %2858 }
 0x747   : > { %2860 = vrcp.f32 %v2154_v49  ;;  %v2155_v19 = vadd.f32 1.0, %v2859_v54 }
 0x749   : > { %2862 = vrcp.f32 %v2155_v19 }
 0x754   : > { %v2861_v53 = vpop.eup %2860 }
 0x755   : > { %v2160_v56 = vmul.f32 %v2861_v53, %v2141_v14 }
 0x756   : > { %v2863_v52 = vpop.eup %2862 }
 0x757   : > { %v2161_v57 = vmul.f32 %v2863_v52, %v2143_v51  ;;  %v2162_v55 = vpack.c.bf16 %v2160_v56, %v2160_v56 }
 0x759   : > { %v2163_v20 = vpack.c.bf16 %v2161_v57, %v2161_v57 }
 0x75b   : > { %2324 = vmatprep.mubr.bf16.mxu0 %v2163_v20 }
 0x75c   : > { %2325 = vmatmul.mubr.bf16.vlgmr.msra.gmra.mxu0 %v2162_v55 }
 0x81c   : > { %v2674_v3 = vpop.f32.mrf.mxu0 }
 0x81e   : > { %v2675_v31 = vpop.f32.mrf.mxu0 }
 0x81f   : > { %v2676_v22 = vadd.f32 %v2675_v31, %v2674_v3 }
 0x820   : > { %v2677_v58 = vpop.f32.mrf.mxu0 }
 0x821   : > { %v2339_v61 = vrot.slane %v2676_v22, %v3039_v11 }
 0x822   : > { %v2678_v8 = vpop.f32.mrf.mxu0 }
 0x823   : > { %v2340_v63 = vcombine.high %v2339_v61, %v2339_v61  ;;  %v2347_v24 = vrot.slane %v2339_v61, %v3039_v11 }
 0x825   : > { %v2354_v59 = vrot.slane %v2340_v63, %v3039_v11  ;;  %v2357_v4 = vadd.f32 %v2347_v24, %v3460_v37 }
 0x827   : > { %v2358_v1 = vadd.f32 %v2354_v59, %v3465_v30  ;;  %2359 = vst [vmem:[%s3544_s11] sm:$0x1] %v2357_v4 }
 0x829   : > { %2360 = vst [vmem:[%s3544_s11 + $0x1] sm:$0x1] %v2358_v1 }
 0x82a PF: > { %s3561_s25 = sld [smem:[#allocation4_spill]] }
 0x830   : > { %s25_s27 = sadd.s32 1, %s3561_s25  }
 0x831   : > { %p22_p5 = scmp.ge.s32.totalorder %s25_s27, 4  }
 0x833   :  { %24 = sbr.rel (!%p22_p5) target bundleno = 4 (0x4), region = 135 }

</bundles_post_ra>
